<compile_context>
chip_gen: v7x
topology: tpu7x:2x2x1
jax: 0.10.0
libtpu: 0.0.40
codegen_flags: <defaults>
</compile_context>

<pallas_src>
import numpy as np
import jax
import jax.numpy as jnp
from jax.experimental import pallas as pl
from jax.experimental.pallas import tpu as pltpu


# ----------------------------------------------------------------------------
# In-kernel helpers
# ----------------------------------------------------------------------------
def _reflect_pad_into(pad_ref, t, H, W, Cin, p):
    """Write a reflect-padded copy of t (H, W*Cin) into pad_ref (H+2p, (W+2p)*Cin).

    Activations are stored flattened as (rows, W*Cin) so a "column" of the image
    is a lane-slice of width Cin.  Rows are reflected first (from the unpadded
    input), then columns (from the row-padded buffer), which also fills the
    corners with the double reflection -- identical to torch/np 'reflect'.
    """
    # interior
    pad_ref[p:p + H, p * Cin:(p + W) * Cin] = t
    # top / bottom reflected rows
    for i in range(p):
        pad_ref[p - 1 - i:p - i, p * Cin:(p + W) * Cin] = t[1 + i:2 + i, :]
        pad_ref[p + H + i:p + H + i + 1, p * Cin:(p + W) * Cin] = (
            t[H - 2 - i:H - 1 - i, :])
    # left / right reflected columns (covers corners)
    for i in range(p):
        pad_ref[:, (p - 1 - i) * Cin:(p - i) * Cin] = (
            pad_ref[:, (p + 1 + i) * Cin:(p + 2 + i) * Cin])
        pad_ref[:, (p + W + i) * Cin:(p + W + i + 1) * Cin] = (
            pad_ref[:, (p + W - 2 - i) * Cin:(p + W - 1 - i) * Cin])


def _conv_layer(t, pad_ref, w_ref, b_ref, H, W, Cin, p, extra=None):
    """One reflect-padded 'same' conv.  t: (H, W*Cin) -> (H, W*Cout) in f32.

    w_ref holds block-banded weights (K, (W+2p)*Cin, W*Cout), so the whole
    W-direction convolution is a single matmul per kernel row kh.  `extra`
    (optional, shape (H, W*Cout)) is folded into the accumulator (residual).
    """
    K = 2 * p + 1
    _reflect_pad_into(pad_ref, t, H, W, Cin, p)
    # First kernel row initializes the accumulator; remaining rows accumulate.
    acc = jnp.dot(pad_ref[0:H, :], w_ref[0], preferred_element_type=jnp.float32)
    for kh in range(1, K):                         # static unroll, K <= 9
        acc = acc + jnp.dot(pad_ref[kh:kh + H, :], w_ref[kh],
                            preferred_element_type=jnp.float32)
    acc = acc + b_ref[...]                         # (1, W*Cout) broadcast over H
    if extra is not None:
        acc = acc + extra                          # fused residual add
    return acc


def make_pop2_kernel(H, W, layer_cfg):
    """layer_cfg: list of (pad, Cin, Cout) for the 5 conv layers."""
    n = len(layer_cfg)

    def kernel(*refs):
        x_ref = refs[0]
        w_refs = refs[1:1 + 2 * n:2]
        b_refs = refs[2:2 + 2 * n:2]
        o_ref = refs[1 + 2 * n]
        pad_refs = refs[2 + 2 * n:]

        x = x_ref[...].astype(jnp.float32)         # (H, W*3)
        h = x
        for li, (p, cin, _cout) in enumerate(layer_cfg):
            extra = x if li == 3 else None         # Kernel2: c4(...) + x residual
            h = _conv_layer(h, pad_refs[li], w_refs[li], b_refs[li],
                            H, W, cin, p, extra=extra)
        o_ref[...] = jnp.clip(h, 0.0, 1.0).astype(o_ref.dtype)   # Pop2 clamp

    return kernel


# ----------------------------------------------------------------------------
# Parameter layout transforms (done once, outside the forward pass)
# ----------------------------------------------------------------------------
def _banded_weight(w, W):
    """(K, K, Cin, Cout) -> (K, (W+2p)*Cin, W*Cout) block-banded matrix.

    wb[kh, (j+kw)*Cin + ci, j*Cout + co] = w[kh, kw, ci, co], zeros elsewhere,
    so  out[:, j*Cout+co] = sum_kh pad_rows[kh] @ wb[kh]  implements the conv.
    """
    K, _, Cin, Cout = w.shape
    p = K // 2
    WP = W + 2 * p
    blk = w.reshape(K, K * Cin, Cout)              # [kh, kw*Cin+ci, co]
    wb = jnp.zeros((K, WP * Cin, W * Cout), w.dtype)
    for j in range(W):
        wb = wb.at[:, j * Cin:(j + K) * Cin, j * Cout:(j + 1) * Cout].set(blk)
    return wb


def prepare_params(k1_params, final_params, W):
    """Convert (w, b) per layer into (banded_w, lane-tiled bias)."""
    prepared = []
    for (w, b) in list(k1_params) + [final_params]:
        Cout = w.shape[-1]
        prepared.append((_banded_weight(w, W),
                         jnp.tile(b.reshape(1, Cout), (1, W))))   # (1, W*Cout)
    return prepared


# ----------------------------------------------------------------------------
# Forward pass (NCHW in / NCHW out, like the PyTorch module)
# ----------------------------------------------------------------------------
@jax.jit
def pop2_forward(x_nchw, prepared):
    B, C, H, W = x_nchw.shape
    # derive static per-layer config from the prepared-weight shapes
    layer_cfg = []
    for wb, bf in prepared:
        K = wb.shape[0]
        p = K // 2
        cin = wb.shape[1] // (W + 2 * p)
        cout = bf.shape[1] // W
        layer_cfg.append((p, cin, cout))

    # NCHW -> NHWC -> flattened (B, H, W*C); cheap XLA layout plumbing.
    x_flat = jnp.transpose(x_nchw, (0, 2, 3, 1)).reshape(B, H, W * C)

    args = [x_flat]
    in_specs = [pl.BlockSpec((None, H, W * C), lambda b: (b, 0, 0))]
    for wb, bf in prepared:
        args += [wb, bf]
        in_specs += [pl.BlockSpec(wb.shape, lambda b: (0, 0, 0)),
                     pl.BlockSpec(bf.shape, lambda b: (0, 0))]

    # one reflect-padded VMEM scratch buffer per layer (all tiny, < 50 KiB total)
    scratch_shapes = [
        pltpu.VMEM((H + 2 * p, (W + 2 * p) * cin), jnp.float32)
        for (p, cin, _cout) in layer_cfg
    ]

    out_cout = layer_cfg[-1][2]
    out_flat = pl.pallas_call(
        make_pop2_kernel(H, W, layer_cfg),
        out_shape=jax.ShapeDtypeStruct((B, H, W * out_cout), x_nchw.dtype),
        grid=(B,),
        in_specs=in_specs,
        out_specs=pl.BlockSpec((None, H, W * out_cout), lambda b: (b, 0, 0)),
        scratch_shapes=scratch_shapes,
        compiler_params=pltpu.CompilerParams(
            dimension_semantics=("parallel",)),     # v7x: split batch across 2 TCs
    )(*args)

    return jnp.transpose(out_flat.reshape(B, H, W, out_cout), (0, 3, 1, 2))


# ----------------------------------------------------------------------------
# Parameter init (same shape/scale convention as torch.nn.Conv2d)
# ----------------------------------------------------------------------------
def init_conv_params(key, cin, cout, k):
    kw_key, kb_key = jax.random.split(key)
    fan_in = cin * k * k
    bound = 1.0 / np.sqrt(fan_in)
    w = jax.random.uniform(kw_key, (k, k, cin, cout), jnp.float32, -bound, bound)
    b = jax.random.uniform(kb_key, (1, cout), jnp.float32, -bound, bound)
    return w, b


# ----------------------------------------------------------------------------
# Pure-JAX reference (correctness check only)
# ----------------------------------------------------------------------------
def conv_ref(x_nhwc, w, b, residual=None, clamp=False):
    p = w.shape[0] // 2
    xp = jnp.pad(x_nhwc, ((0, 0), (p, p), (p, p), (0, 0)), mode="reflect")
    y = jax.lax.conv_general_dilated(
        xp, w, (1, 1), "VALID",
        dimension_numbers=("NHWC", "HWIO", "NHWC"),
        precision=jax.lax.Precision.HIGHEST,
    ) + b.reshape(1, 1, 1, -1)
    if residual is not None:
        y = y + residual
    if clamp:
        y = jnp.clip(y, 0.0, 1.0)
    return y


def pop2_reference(x_nchw, k1_params, final_params):
    x = jnp.transpose(x_nchw, (0, 2, 3, 1))
    h = conv_ref(x, *k1_params[0])
    h = conv_ref(h, *k1_params[1])
    h = conv_ref(h, *k1_params[2])
    h = conv_ref(h, *k1_params[3], residual=x)
    h = conv_ref(h, *final_params, clamp=True)
    return jnp.transpose(h, (0, 3, 1, 2))


if __name__ == "__main__":
    key = jax.random.PRNGKey(0)
    keys = jax.random.split(key, 10)

    # k1 = Kernel2()
    k1_params = [
        init_conv_params(keys[0], 3, 6, 9),
        init_conv_params(keys[1], 6, 12, 7),
        init_conv_params(keys[2], 12, 6, 5),
        init_conv_params(keys[3], 6, 3, 3),
    ]
    # k2 = Kernel2() is declared in Pop2.__init__ but unused by Pop2.forward.
    # final = Conv2d(3, 3, 3, padding=1, padding_mode='reflect')
    final_params = init_conv_params(keys[8], 3, 3, 3)

    # Input (NCHW like PyTorch): batch=2, channels=3, spatial=16x16.
    x = jax.random.uniform(keys[9], (2, 3, 16, 16), jnp.float32)

    prepared = prepare_params(k1_params, final_params, W=16)

    out = pop2_forward(x, prepared)
    out = jax.block_until_ready(out)

    ref = pop2_reference(x, k1_params, final_params)
    # Tolerance covers default (bf16-pass) MXU precision vs. the HIGHEST-precision
    # reference; observed deviations are O(1e-3).
    np.testing.assert_allclose(np.asarray(out), np.asarray(ref),
                               rtol=1e-2, atol=1e-2)

    print("KERNEL_OK")
</pallas_src>

<mosaic_0001>
module attributes {stable_mosaic.version = 11 : i64} {
  func.func @kernel(%arg0: i32, %arg1: memref<1x16x48xf32, #tpu.memory_space<vmem>>, %arg2: memref<9x72x96xf32, #tpu.memory_space<vmem>>, %arg3: memref<1x96xf32, #tpu.memory_space<vmem>>, %arg4: memref<7x132x192xf32, #tpu.memory_space<vmem>>, %arg5: memref<1x192xf32, #tpu.memory_space<vmem>>, %arg6: memref<5x240x96xf32, #tpu.memory_space<vmem>>, %arg7: memref<1x96xf32, #tpu.memory_space<vmem>>, %arg8: memref<3x108x48xf32, #tpu.memory_space<vmem>>, %arg9: memref<1x48xf32, #tpu.memory_space<vmem>>, %arg10: memref<3x54x48xf32, #tpu.memory_space<vmem>>, %arg11: memref<1x48xf32, #tpu.memory_space<vmem>>, %arg12: memref<1x16x48xf32, #tpu.memory_space<vmem>>, %arg13: memref<24x72xf32, #tpu.memory_space<vmem>>, %arg14: memref<22x132xf32, #tpu.memory_space<vmem>>, %arg15: memref<20x240xf32, #tpu.memory_space<vmem>>, %arg16: memref<18x108xf32, #tpu.memory_space<vmem>>, %arg17: memref<18x54xf32, #tpu.memory_space<vmem>>) attributes {dimension_semantics = [#tpu.dimension_semantics<parallel>], iteration_bounds = array<i64: 2>, scalar_prefetch = 0 : i64, scratch_operands = 5 : i64, tpu.core_type = #tpu.core_type<tc>, window_params = [{transform_indices = @transform_0, window_bounds = array<i64: 1, 16, 48>}, {pipeline_mode = #tpu.pipeline_mode<synchronous>, transform_indices = @transform_1, window_bounds = array<i64: 9, 72, 96>}, {pipeline_mode = #tpu.pipeline_mode<synchronous>, transform_indices = @transform_2, window_bounds = array<i64: 1, 96>}, {pipeline_mode = #tpu.pipeline_mode<synchronous>, transform_indices = @transform_3, window_bounds = array<i64: 7, 132, 192>}, {pipeline_mode = #tpu.pipeline_mode<synchronous>, transform_indices = @transform_4, window_bounds = array<i64: 1, 192>}, {pipeline_mode = #tpu.pipeline_mode<synchronous>, transform_indices = @transform_5, window_bounds = array<i64: 5, 240, 96>}, {pipeline_mode = #tpu.pipeline_mode<synchronous>, transform_indices = @transform_6, window_bounds = array<i64: 1, 96>}, {pipeline_mode = #tpu.pipeline_mode<synchronous>, transform_indices = @transform_7, window_bounds = array<i64: 3, 108, 48>}, {pipeline_mode = #tpu.pipeline_mode<synchronous>, transform_indices = @transform_8, window_bounds = array<i64: 1, 48>}, {pipeline_mode = #tpu.pipeline_mode<synchronous>, transform_indices = @transform_9, window_bounds = array<i64: 3, 54, 48>}, {pipeline_mode = #tpu.pipeline_mode<synchronous>, transform_indices = @transform_10, window_bounds = array<i64: 1, 48>}, {transform_indices = @transform_11, window_bounds = array<i64: 1, 16, 48>}]} {
    %c0 = arith.constant 0 : index
    %c0_0 = arith.constant 0 : index
    %c0_1 = arith.constant 0 : index
    %0 = vector.load %arg1[%c0, %c0_0, %c0_1] : memref<1x16x48xf32, #tpu.memory_space<vmem>>, vector<1x16x48xf32>
    %1 = vector.shape_cast %0 : vector<1x16x48xf32> to vector<16x48xf32>
    %c4 = arith.constant 4 : index
    %c12 = arith.constant 12 : index
    %2 = vector.load %arg13[%c4, %c12] : memref<24x72xf32, #tpu.memory_space<vmem>>, vector<16x48xf32>
    tpu.vector_store %arg13[%c4, %c12], %1 {strides = array<i32>} : memref<24x72xf32, #tpu.memory_space<vmem>>, vector<16x48xf32>,
    %3 = vector.extract_strided_slice %1 {offsets = [1, 0], sizes = [1, 48], strides = [1, 1]} : vector<16x48xf32> to vector<1x48xf32>
    %c3 = arith.constant 3 : index
    %c12_2 = arith.constant 12 : index
    %4 = vector.load %arg13[%c3, %c12_2] : memref<24x72xf32, #tpu.memory_space<vmem>>, vector<1x48xf32>
    tpu.vector_store %arg13[%c3, %c12_2], %3 {strides = array<i32>} : memref<24x72xf32, #tpu.memory_space<vmem>>, vector<1x48xf32>,
    %5 = vector.extract_strided_slice %1 {offsets = [14, 0], sizes = [1, 48], strides = [1, 1]} : vector<16x48xf32> to vector<1x48xf32>
    %c20 = arith.constant 20 : index
    %c12_3 = arith.constant 12 : index
    %6 = vector.load %arg13[%c20, %c12_3] : memref<24x72xf32, #tpu.memory_space<vmem>>, vector<1x48xf32>
    tpu.vector_store %arg13[%c20, %c12_3], %5 {strides = array<i32>} : memref<24x72xf32, #tpu.memory_space<vmem>>, vector<1x48xf32>,
    %7 = vector.extract_strided_slice %1 {offsets = [2, 0], sizes = [1, 48], strides = [1, 1]} : vector<16x48xf32> to vector<1x48xf32>
    %c2 = arith.constant 2 : index
    %c12_4 = arith.constant 12 : index
    %8 = vector.load %arg13[%c2, %c12_4] : memref<24x72xf32, #tpu.memory_space<vmem>>, vector<1x48xf32>
    tpu.vector_store %arg13[%c2, %c12_4], %7 {strides = array<i32>} : memref<24x72xf32, #tpu.memory_space<vmem>>, vector<1x48xf32>,
    %9 = vector.extract_strided_slice %1 {offsets = [13, 0], sizes = [1, 48], strides = [1, 1]} : vector<16x48xf32> to vector<1x48xf32>
    %c21 = arith.constant 21 : index
    %c12_5 = arith.constant 12 : index
    %10 = vector.load %arg13[%c21, %c12_5] : memref<24x72xf32, #tpu.memory_space<vmem>>, vector<1x48xf32>
    tpu.vector_store %arg13[%c21, %c12_5], %9 {strides = array<i32>} : memref<24x72xf32, #tpu.memory_space<vmem>>, vector<1x48xf32>,
    %11 = vector.extract_strided_slice %1 {offsets = [3, 0], sizes = [1, 48], strides = [1, 1]} : vector<16x48xf32> to vector<1x48xf32>
    %c1 = arith.constant 1 : index
    %c12_6 = arith.constant 12 : index
    %12 = vector.load %arg13[%c1, %c12_6] : memref<24x72xf32, #tpu.memory_space<vmem>>, vector<1x48xf32>
    tpu.vector_store %arg13[%c1, %c12_6], %11 {strides = array<i32>} : memref<24x72xf32, #tpu.memory_space<vmem>>, vector<1x48xf32>,
    %13 = vector.extract_strided_slice %1 {offsets = [12, 0], sizes = [1, 48], strides = [1, 1]} : vector<16x48xf32> to vector<1x48xf32>
    %c22 = arith.constant 22 : index
    %c12_7 = arith.constant 12 : index
    %14 = vector.load %arg13[%c22, %c12_7] : memref<24x72xf32, #tpu.memory_space<vmem>>, vector<1x48xf32>
    tpu.vector_store %arg13[%c22, %c12_7], %13 {strides = array<i32>} : memref<24x72xf32, #tpu.memory_space<vmem>>, vector<1x48xf32>,
    %15 = vector.extract_strided_slice %1 {offsets = [4, 0], sizes = [1, 48], strides = [1, 1]} : vector<16x48xf32> to vector<1x48xf32>
    %c0_8 = arith.constant 0 : index
    %c12_9 = arith.constant 12 : index
    %16 = vector.load %arg13[%c0_8, %c12_9] : memref<24x72xf32, #tpu.memory_space<vmem>>, vector<1x48xf32>
    tpu.vector_store %arg13[%c0_8, %c12_9], %15 {strides = array<i32>} : memref<24x72xf32, #tpu.memory_space<vmem>>, vector<1x48xf32>,
    %17 = vector.extract_strided_slice %1 {offsets = [11, 0], sizes = [1, 48], strides = [1, 1]} : vector<16x48xf32> to vector<1x48xf32>
    %c23 = arith.constant 23 : index
    %c12_10 = arith.constant 12 : index
    %18 = vector.load %arg13[%c23, %c12_10] : memref<24x72xf32, #tpu.memory_space<vmem>>, vector<1x48xf32>
    tpu.vector_store %arg13[%c23, %c12_10], %17 {strides = array<i32>} : memref<24x72xf32, #tpu.memory_space<vmem>>, vector<1x48xf32>,
    %c0_11 = arith.constant 0 : index
    %c15 = arith.constant 15 : index
    %19 = vector.load %arg13[%c0_11, %c15] : memref<24x72xf32, #tpu.memory_space<vmem>>, vector<24x3xf32>
    %c0_12 = arith.constant 0 : index
    %c9 = arith.constant 9 : index
    %20 = vector.load %arg13[%c0_12, %c9] : memref<24x72xf32, #tpu.memory_space<vmem>>, vector<24x3xf32>
    tpu.vector_store %arg13[%c0_12, %c9], %19 {strides = array<i32>} : memref<24x72xf32, #tpu.memory_space<vmem>>, vector<24x3xf32>,
    %c0_13 = arith.constant 0 : index
    %c54 = arith.constant 54 : index
    %21 = vector.load %arg13[%c0_13, %c54] : memref<24x72xf32, #tpu.memory_space<vmem>>, vector<24x3xf32>
    %c0_14 = arith.constant 0 : index
    %c60 = arith.constant 60 : index
    %22 = vector.load %arg13[%c0_14, %c60] : memref<24x72xf32, #tpu.memory_space<vmem>>, vector<24x3xf32>
    tpu.vector_store %arg13[%c0_14, %c60], %21 {strides = array<i32>} : memref<24x72xf32, #tpu.memory_space<vmem>>, vector<24x3xf32>,
    %c0_15 = arith.constant 0 : index
    %c18 = arith.constant 18 : index
    %23 = vector.load %arg13[%c0_15, %c18] : memref<24x72xf32, #tpu.memory_space<vmem>>, vector<24x3xf32>
    %c0_16 = arith.constant 0 : index
    %c6 = arith.constant 6 : index
    %24 = vector.load %arg13[%c0_16, %c6] : memref<24x72xf32, #tpu.memory_space<vmem>>, vector<24x3xf32>
    tpu.vector_store %arg13[%c0_16, %c6], %23 {strides = array<i32>} : memref<24x72xf32, #tpu.memory_space<vmem>>, vector<24x3xf32>,
    %c0_17 = arith.constant 0 : index
    %c51 = arith.constant 51 : index
    %25 = vector.load %arg13[%c0_17, %c51] : memref<24x72xf32, #tpu.memory_space<vmem>>, vector<24x3xf32>
    %c0_18 = arith.constant 0 : index
    %c63 = arith.constant 63 : index
    %26 = vector.load %arg13[%c0_18, %c63] : memref<24x72xf32, #tpu.memory_space<vmem>>, vector<24x3xf32>
    tpu.vector_store %arg13[%c0_18, %c63], %25 {strides = array<i32>} : memref<24x72xf32, #tpu.memory_space<vmem>>, vector<24x3xf32>,
    %c0_19 = arith.constant 0 : index
    %c21_20 = arith.constant 21 : index
    %27 = vector.load %arg13[%c0_19, %c21_20] : memref<24x72xf32, #tpu.memory_space<vmem>>, vector<24x3xf32>
    %c0_21 = arith.constant 0 : index
    %c3_22 = arith.constant 3 : index
    %28 = vector.load %arg13[%c0_21, %c3_22] : memref<24x72xf32, #tpu.memory_space<vmem>>, vector<24x3xf32>
    tpu.vector_store %arg13[%c0_21, %c3_22], %27 {strides = array<i32>} : memref<24x72xf32, #tpu.memory_space<vmem>>, vector<24x3xf32>,
    %c0_23 = arith.constant 0 : index
    %c48 = arith.constant 48 : index
    %29 = vector.load %arg13[%c0_23, %c48] : memref<24x72xf32, #tpu.memory_space<vmem>>, vector<24x3xf32>
    %c0_24 = arith.constant 0 : index
    %c66 = arith.constant 66 : index
    %30 = vector.load %arg13[%c0_24, %c66] : memref<24x72xf32, #tpu.memory_space<vmem>>, vector<24x3xf32>
    tpu.vector_store %arg13[%c0_24, %c66], %29 {strides = array<i32>} : memref<24x72xf32, #tpu.memory_space<vmem>>, vector<24x3xf32>,
    %c0_25 = arith.constant 0 : index
    %c24 = arith.constant 24 : index
    %31 = vector.load %arg13[%c0_25, %c24] : memref<24x72xf32, #tpu.memory_space<vmem>>, vector<24x3xf32>
    %c0_26 = arith.constant 0 : index
    %c0_27 = arith.constant 0 : index
    %32 = vector.load %arg13[%c0_26, %c0_27] : memref<24x72xf32, #tpu.memory_space<vmem>>, vector<24x3xf32>
    tpu.vector_store %arg13[%c0_26, %c0_27], %31 {strides = array<i32>} : memref<24x72xf32, #tpu.memory_space<vmem>>, vector<24x3xf32>,
    %c0_28 = arith.constant 0 : index
    %c45 = arith.constant 45 : index
    %33 = vector.load %arg13[%c0_28, %c45] : memref<24x72xf32, #tpu.memory_space<vmem>>, vector<24x3xf32>
    %c0_29 = arith.constant 0 : index
    %c69 = arith.constant 69 : index
    %34 = vector.load %arg13[%c0_29, %c69] : memref<24x72xf32, #tpu.memory_space<vmem>>, vector<24x3xf32>
    tpu.vector_store %arg13[%c0_29, %c69], %33 {strides = array<i32>} : memref<24x72xf32, #tpu.memory_space<vmem>>, vector<24x3xf32>,
    %c0_30 = arith.constant 0 : index
    %c0_31 = arith.constant 0 : index
    %35 = vector.load %arg13[%c0_30, %c0_31] : memref<24x72xf32, #tpu.memory_space<vmem>>, vector<16x72xf32>
    %c0_32 = arith.constant 0 : index
    %c0_33 = arith.constant 0 : index
    %c0_34 = arith.constant 0 : index
    %36 = vector.load %arg2[%c0_32, %c0_33, %c0_34] : memref<9x72x96xf32, #tpu.memory_space<vmem>>, vector<1x72x96xf32>
    %37 = vector.shape_cast %36 : vector<1x72x96xf32> to vector<72x96xf32>
    %cst = arith.constant dense<0.000000e+00> : vector<16x96xf32>
    %38 = tpu.matmul %35, %37, %cst {dimension_numbers = #tpu.dot_dimension_numbers<[1], [0], [0], [1], [0, 0, 1, 1], [], []>} : vector<16x72xf32>, vector<72x96xf32>, vector<16x96xf32> -> vector<16x96xf32>
    %c1_35 = arith.constant 1 : index
    %c0_36 = arith.constant 0 : index
    %39 = vector.load %arg13[%c1_35, %c0_36] : memref<24x72xf32, #tpu.memory_space<vmem>>, vector<16x72xf32>
    %c1_37 = arith.constant 1 : index
    %c0_38 = arith.constant 0 : index
    %c0_39 = arith.constant 0 : index
    %40 = vector.load %arg2[%c1_37, %c0_38, %c0_39] : memref<9x72x96xf32, #tpu.memory_space<vmem>>, vector<1x72x96xf32>
    %41 = vector.shape_cast %40 : vector<1x72x96xf32> to vector<72x96xf32>
    %cst_40 = arith.constant dense<0.000000e+00> : vector<16x96xf32>
    %42 = tpu.matmul %39, %41, %cst_40 {dimension_numbers = #tpu.dot_dimension_numbers<[1], [0], [0], [1], [0, 0, 1, 1], [], []>} : vector<16x72xf32>, vector<72x96xf32>, vector<16x96xf32> -> vector<16x96xf32>
    %43 = arith.addf %38, %42 : vector<16x96xf32>
    %c2_41 = arith.constant 2 : index
    %c0_42 = arith.constant 0 : index
    %44 = vector.load %arg13[%c2_41, %c0_42] : memref<24x72xf32, #tpu.memory_space<vmem>>, vector<16x72xf32>
    %c2_43 = arith.constant 2 : index
    %c0_44 = arith.constant 0 : index
    %c0_45 = arith.constant 0 : index
    %45 = vector.load %arg2[%c2_43, %c0_44, %c0_45] : memref<9x72x96xf32, #tpu.memory_space<vmem>>, vector<1x72x96xf32>
    %46 = vector.shape_cast %45 : vector<1x72x96xf32> to vector<72x96xf32>
    %cst_46 = arith.constant dense<0.000000e+00> : vector<16x96xf32>
    %47 = tpu.matmul %44, %46, %cst_46 {dimension_numbers = #tpu.dot_dimension_numbers<[1], [0], [0], [1], [0, 0, 1, 1], [], []>} : vector<16x72xf32>, vector<72x96xf32>, vector<16x96xf32> -> vector<16x96xf32>
    %48 = arith.addf %43, %47 : vector<16x96xf32>
    %c3_47 = arith.constant 3 : index
    %c0_48 = arith.constant 0 : index
    %49 = vector.load %arg13[%c3_47, %c0_48] : memref<24x72xf32, #tpu.memory_space<vmem>>, vector<16x72xf32>
    %c3_49 = arith.constant 3 : index
    %c0_50 = arith.constant 0 : index
    %c0_51 = arith.constant 0 : index
    %50 = vector.load %arg2[%c3_49, %c0_50, %c0_51] : memref<9x72x96xf32, #tpu.memory_space<vmem>>, vector<1x72x96xf32>
    %51 = vector.shape_cast %50 : vector<1x72x96xf32> to vector<72x96xf32>
    %cst_52 = arith.constant dense<0.000000e+00> : vector<16x96xf32>
    %52 = tpu.matmul %49, %51, %cst_52 {dimension_numbers = #tpu.dot_dimension_numbers<[1], [0], [0], [1], [0, 0, 1, 1], [], []>} : vector<16x72xf32>, vector<72x96xf32>, vector<16x96xf32> -> vector<16x96xf32>
    %53 = arith.addf %48, %52 : vector<16x96xf32>
    %c4_53 = arith.constant 4 : index
    %c0_54 = arith.constant 0 : index
    %54 = vector.load %arg13[%c4_53, %c0_54] : memref<24x72xf32, #tpu.memory_space<vmem>>, vector<16x72xf32>
    %c4_55 = arith.constant 4 : index
    %c0_56 = arith.constant 0 : index
    %c0_57 = arith.constant 0 : index
    %55 = vector.load %arg2[%c4_55, %c0_56, %c0_57] : memref<9x72x96xf32, #tpu.memory_space<vmem>>, vector<1x72x96xf32>
    %56 = vector.shape_cast %55 : vector<1x72x96xf32> to vector<72x96xf32>
    %cst_58 = arith.constant dense<0.000000e+00> : vector<16x96xf32>
    %57 = tpu.matmul %54, %56, %cst_58 {dimension_numbers = #tpu.dot_dimension_numbers<[1], [0], [0], [1], [0, 0, 1, 1], [], []>} : vector<16x72xf32>, vector<72x96xf32>, vector<16x96xf32> -> vector<16x96xf32>
    %58 = arith.addf %53, %57 : vector<16x96xf32>
    %c5 = arith.constant 5 : index
    %c0_59 = arith.constant 0 : index
    %59 = vector.load %arg13[%c5, %c0_59] : memref<24x72xf32, #tpu.memory_space<vmem>>, vector<16x72xf32>
    %c5_60 = arith.constant 5 : index
    %c0_61 = arith.constant 0 : index
    %c0_62 = arith.constant 0 : index
    %60 = vector.load %arg2[%c5_60, %c0_61, %c0_62] : memref<9x72x96xf32, #tpu.memory_space<vmem>>, vector<1x72x96xf32>
    %61 = vector.shape_cast %60 : vector<1x72x96xf32> to vector<72x96xf32>
    %cst_63 = arith.constant dense<0.000000e+00> : vector<16x96xf32>
    %62 = tpu.matmul %59, %61, %cst_63 {dimension_numbers = #tpu.dot_dimension_numbers<[1], [0], [0], [1], [0, 0, 1, 1], [], []>} : vector<16x72xf32>, vector<72x96xf32>, vector<16x96xf32> -> vector<16x96xf32>
    %63 = arith.addf %58, %62 : vector<16x96xf32>
    %c6_64 = arith.constant 6 : index
    %c0_65 = arith.constant 0 : index
    %64 = vector.load %arg13[%c6_64, %c0_65] : memref<24x72xf32, #tpu.memory_space<vmem>>, vector<16x72xf32>
    %c6_66 = arith.constant 6 : index
    %c0_67 = arith.constant 0 : index
    %c0_68 = arith.constant 0 : index
    %65 = vector.load %arg2[%c6_66, %c0_67, %c0_68] : memref<9x72x96xf32, #tpu.memory_space<vmem>>, vector<1x72x96xf32>
    %66 = vector.shape_cast %65 : vector<1x72x96xf32> to vector<72x96xf32>
    %cst_69 = arith.constant dense<0.000000e+00> : vector<16x96xf32>
    %67 = tpu.matmul %64, %66, %cst_69 {dimension_numbers = #tpu.dot_dimension_numbers<[1], [0], [0], [1], [0, 0, 1, 1], [], []>} : vector<16x72xf32>, vector<72x96xf32>, vector<16x96xf32> -> vector<16x96xf32>
    %68 = arith.addf %63, %67 : vector<16x96xf32>
    %c7 = arith.constant 7 : index
    %c0_70 = arith.constant 0 : index
    %69 = vector.load %arg13[%c7, %c0_70] : memref<24x72xf32, #tpu.memory_space<vmem>>, vector<16x72xf32>
    %c7_71 = arith.constant 7 : index
    %c0_72 = arith.constant 0 : index
    %c0_73 = arith.constant 0 : index
    %70 = vector.load %arg2[%c7_71, %c0_72, %c0_73] : memref<9x72x96xf32, #tpu.memory_space<vmem>>, vector<1x72x96xf32>
    %71 = vector.shape_cast %70 : vector<1x72x96xf32> to vector<72x96xf32>
    %cst_74 = arith.constant dense<0.000000e+00> : vector<16x96xf32>
    %72 = tpu.matmul %69, %71, %cst_74 {dimension_numbers = #tpu.dot_dimension_numbers<[1], [0], [0], [1], [0, 0, 1, 1], [], []>} : vector<16x72xf32>, vector<72x96xf32>, vector<16x96xf32> -> vector<16x96xf32>
    %73 = arith.addf %68, %72 : vector<16x96xf32>
    %c8 = arith.constant 8 : index
    %c0_75 = arith.constant 0 : index
    %74 = vector.load %arg13[%c8, %c0_75] : memref<24x72xf32, #tpu.memory_space<vmem>>, vector<16x72xf32>
    %c8_76 = arith.constant 8 : index
    %c0_77 = arith.constant 0 : index
    %c0_78 = arith.constant 0 : index
    %75 = vector.load %arg2[%c8_76, %c0_77, %c0_78] : memref<9x72x96xf32, #tpu.memory_space<vmem>>, vector<1x72x96xf32>
    %76 = vector.shape_cast %75 : vector<1x72x96xf32> to vector<72x96xf32>
    %cst_79 = arith.constant dense<0.000000e+00> : vector<16x96xf32>
    %77 = tpu.matmul %74, %76, %cst_79 {dimension_numbers = #tpu.dot_dimension_numbers<[1], [0], [0], [1], [0, 0, 1, 1], [], []>} : vector<16x72xf32>, vector<72x96xf32>, vector<16x96xf32> -> vector<16x96xf32>
    %78 = arith.addf %73, %77 : vector<16x96xf32>
    %c0_80 = arith.constant 0 : index
    %c0_81 = arith.constant 0 : index
    %79 = vector.load %arg3[%c0_80, %c0_81] : memref<1x96xf32, #tpu.memory_space<vmem>>, vector<1x96xf32>
    %80 = vector.broadcast %79 : vector<1x96xf32> to vector<16x96xf32>
    %81 = arith.addf %78, %80 : vector<16x96xf32>
    %c3_82 = arith.constant 3 : index
    %c18_83 = arith.constant 18 : index
    %82 = vector.load %arg14[%c3_82, %c18_83] : memref<22x132xf32, #tpu.memory_space<vmem>>, vector<16x96xf32>
    tpu.vector_store %arg14[%c3_82, %c18_83], %81 {strides = array<i32>} : memref<22x132xf32, #tpu.memory_space<vmem>>, vector<16x96xf32>,
    %83 = vector.extract_strided_slice %81 {offsets = [1, 0], sizes = [1, 96], strides = [1, 1]} : vector<16x96xf32> to vector<1x96xf32>
    %c2_84 = arith.constant 2 : index
    %c18_85 = arith.constant 18 : index
    %84 = vector.load %arg14[%c2_84, %c18_85] : memref<22x132xf32, #tpu.memory_space<vmem>>, vector<1x96xf32>
    tpu.vector_store %arg14[%c2_84, %c18_85], %83 {strides = array<i32>} : memref<22x132xf32, #tpu.memory_space<vmem>>, vector<1x96xf32>,
    %85 = vector.extract_strided_slice %81 {offsets = [14, 0], sizes = [1, 96], strides = [1, 1]} : vector<16x96xf32> to vector<1x96xf32>
    %c19 = arith.constant 19 : index
    %c18_86 = arith.constant 18 : index
    %86 = vector.load %arg14[%c19, %c18_86] : memref<22x132xf32, #tpu.memory_space<vmem>>, vector<1x96xf32>
    tpu.vector_store %arg14[%c19, %c18_86], %85 {strides = array<i32>} : memref<22x132xf32, #tpu.memory_space<vmem>>, vector<1x96xf32>,
    %87 = vector.extract_strided_slice %81 {offsets = [2, 0], sizes = [1, 96], strides = [1, 1]} : vector<16x96xf32> to vector<1x96xf32>
    %c1_87 = arith.constant 1 : index
    %c18_88 = arith.constant 18 : index
    %88 = vector.load %arg14[%c1_87, %c18_88] : memref<22x132xf32, #tpu.memory_space<vmem>>, vector<1x96xf32>
    tpu.vector_store %arg14[%c1_87, %c18_88], %87 {strides = array<i32>} : memref<22x132xf32, #tpu.memory_space<vmem>>, vector<1x96xf32>,
    %89 = vector.extract_strided_slice %81 {offsets = [13, 0], sizes = [1, 96], strides = [1, 1]} : vector<16x96xf32> to vector<1x96xf32>
    %c20_89 = arith.constant 20 : index
    %c18_90 = arith.constant 18 : index
    %90 = vector.load %arg14[%c20_89, %c18_90] : memref<22x132xf32, #tpu.memory_space<vmem>>, vector<1x96xf32>
    tpu.vector_store %arg14[%c20_89, %c18_90], %89 {strides = array<i32>} : memref<22x132xf32, #tpu.memory_space<vmem>>, vector<1x96xf32>,
    %91 = vector.extract_strided_slice %81 {offsets = [3, 0], sizes = [1, 96], strides = [1, 1]} : vector<16x96xf32> to vector<1x96xf32>
    %c0_91 = arith.constant 0 : index
    %c18_92 = arith.constant 18 : index
    %92 = vector.load %arg14[%c0_91, %c18_92] : memref<22x132xf32, #tpu.memory_space<vmem>>, vector<1x96xf32>
    tpu.vector_store %arg14[%c0_91, %c18_92], %91 {strides = array<i32>} : memref<22x132xf32, #tpu.memory_space<vmem>>, vector<1x96xf32>,
    %93 = vector.extract_strided_slice %81 {offsets = [12, 0], sizes = [1, 96], strides = [1, 1]} : vector<16x96xf32> to vector<1x96xf32>
    %c21_93 = arith.constant 21 : index
    %c18_94 = arith.constant 18 : index
    %94 = vector.load %arg14[%c21_93, %c18_94] : memref<22x132xf32, #tpu.memory_space<vmem>>, vector<1x96xf32>
    tpu.vector_store %arg14[%c21_93, %c18_94], %93 {strides = array<i32>} : memref<22x132xf32, #tpu.memory_space<vmem>>, vector<1x96xf32>,
    %c0_95 = arith.constant 0 : index
    %c24_96 = arith.constant 24 : index
    %95 = vector.load %arg14[%c0_95, %c24_96] : memref<22x132xf32, #tpu.memory_space<vmem>>, vector<22x6xf32>
    %c0_97 = arith.constant 0 : index
    %c12_98 = arith.constant 12 : index
    %96 = vector.load %arg14[%c0_97, %c12_98] : memref<22x132xf32, #tpu.memory_space<vmem>>, vector<22x6xf32>
    tpu.vector_store %arg14[%c0_97, %c12_98], %95 {strides = array<i32>} : memref<22x132xf32, #tpu.memory_space<vmem>>, vector<22x6xf32>,
    %c0_99 = arith.constant 0 : index
    %c102 = arith.constant 102 : index
    %97 = vector.load %arg14[%c0_99, %c102] : memref<22x132xf32, #tpu.memory_space<vmem>>, vector<22x6xf32>
    %c0_100 = arith.constant 0 : index
    %c114 = arith.constant 114 : index
    %98 = vector.load %arg14[%c0_100, %c114] : memref<22x132xf32, #tpu.memory_space<vmem>>, vector<22x6xf32>
    tpu.vector_store %arg14[%c0_100, %c114], %97 {strides = array<i32>} : memref<22x132xf32, #tpu.memory_space<vmem>>, vector<22x6xf32>,
    %c0_101 = arith.constant 0 : index
    %c30 = arith.constant 30 : index
    %99 = vector.load %arg14[%c0_101, %c30] : memref<22x132xf32, #tpu.memory_space<vmem>>, vector<22x6xf32>
    %c0_102 = arith.constant 0 : index
    %c6_103 = arith.constant 6 : index
    %100 = vector.load %arg14[%c0_102, %c6_103] : memref<22x132xf32, #tpu.memory_space<vmem>>, vector<22x6xf32>
    tpu.vector_store %arg14[%c0_102, %c6_103], %99 {strides = array<i32>} : memref<22x132xf32, #tpu.memory_space<vmem>>, vector<22x6xf32>,
    %c0_104 = arith.constant 0 : index
    %c96 = arith.constant 96 : index
    %101 = vector.load %arg14[%c0_104, %c96] : memref<22x132xf32, #tpu.memory_space<vmem>>, vector<22x6xf32>
    %c0_105 = arith.constant 0 : index
    %c120 = arith.constant 120 : index
    %102 = vector.load %arg14[%c0_105, %c120] : memref<22x132xf32, #tpu.memory_space<vmem>>, vector<22x6xf32>
    tpu.vector_store %arg14[%c0_105, %c120], %101 {strides = array<i32>} : memref<22x132xf32, #tpu.memory_space<vmem>>, vector<22x6xf32>,
    %c0_106 = arith.constant 0 : index
    %c36 = arith.constant 36 : index
    %103 = vector.load %arg14[%c0_106, %c36] : memref<22x132xf32, #tpu.memory_space<vmem>>, vector<22x6xf32>
    %c0_107 = arith.constant 0 : index
    %c0_108 = arith.constant 0 : index
    %104 = vector.load %arg14[%c0_107, %c0_108] : memref<22x132xf32, #tpu.memory_space<vmem>>, vector<22x6xf32>
    tpu.vector_store %arg14[%c0_107, %c0_108], %103 {strides = array<i32>} : memref<22x132xf32, #tpu.memory_space<vmem>>, vector<22x6xf32>,
    %c0_109 = arith.constant 0 : index
    %c90 = arith.constant 90 : index
    %105 = vector.load %arg14[%c0_109, %c90] : memref<22x132xf32, #tpu.memory_space<vmem>>, vector<22x6xf32>
    %c0_110 = arith.constant 0 : index
    %c126 = arith.constant 126 : index
    %106 = vector.load %arg14[%c0_110, %c126] : memref<22x132xf32, #tpu.memory_space<vmem>>, vector<22x6xf32>
    tpu.vector_store %arg14[%c0_110, %c126], %105 {strides = array<i32>} : memref<22x132xf32, #tpu.memory_space<vmem>>, vector<22x6xf32>,
    %c0_111 = arith.constant 0 : index
    %c0_112 = arith.constant 0 : index
    %107 = vector.load %arg14[%c0_111, %c0_112] : memref<22x132xf32, #tpu.memory_space<vmem>>, vector<16x132xf32>
    %c0_113 = arith.constant 0 : index
    %c0_114 = arith.constant 0 : index
    %c0_115 = arith.constant 0 : index
    %108 = vector.load %arg4[%c0_113, %c0_114, %c0_115] : memref<7x132x192xf32, #tpu.memory_space<vmem>>, vector<1x132x192xf32>
    %109 = vector.shape_cast %108 : vector<1x132x192xf32> to vector<132x192xf32>
    %cst_116 = arith.constant dense<0.000000e+00> : vector<16x192xf32>
    %110 = tpu.matmul %107, %109, %cst_116 {dimension_numbers = #tpu.dot_dimension_numbers<[1], [0], [0], [1], [0, 0, 1, 1], [], []>} : vector<16x132xf32>, vector<132x192xf32>, vector<16x192xf32> -> vector<16x192xf32>
    %c1_117 = arith.constant 1 : index
    %c0_118 = arith.constant 0 : index
    %111 = vector.load %arg14[%c1_117, %c0_118] : memref<22x132xf32, #tpu.memory_space<vmem>>, vector<16x132xf32>
    %c1_119 = arith.constant 1 : index
    %c0_120 = arith.constant 0 : index
    %c0_121 = arith.constant 0 : index
    %112 = vector.load %arg4[%c1_119, %c0_120, %c0_121] : memref<7x132x192xf32, #tpu.memory_space<vmem>>, vector<1x132x192xf32>
    %113 = vector.shape_cast %112 : vector<1x132x192xf32> to vector<132x192xf32>
    %cst_122 = arith.constant dense<0.000000e+00> : vector<16x192xf32>
    %114 = tpu.matmul %111, %113, %cst_122 {dimension_numbers = #tpu.dot_dimension_numbers<[1], [0], [0], [1], [0, 0, 1, 1], [], []>} : vector<16x132xf32>, vector<132x192xf32>, vector<16x192xf32> -> vector<16x192xf32>
    %115 = arith.addf %110, %114 : vector<16x192xf32>
    %c2_123 = arith.constant 2 : index
    %c0_124 = arith.constant 0 : index
    %116 = vector.load %arg14[%c2_123, %c0_124] : memref<22x132xf32, #tpu.memory_space<vmem>>, vector<16x132xf32>
    %c2_125 = arith.constant 2 : index
    %c0_126 = arith.constant 0 : index
    %c0_127 = arith.constant 0 : index
    %117 = vector.load %arg4[%c2_125, %c0_126, %c0_127] : memref<7x132x192xf32, #tpu.memory_space<vmem>>, vector<1x132x192xf32>
    %118 = vector.shape_cast %117 : vector<1x132x192xf32> to vector<132x192xf32>
    %cst_128 = arith.constant dense<0.000000e+00> : vector<16x192xf32>
    %119 = tpu.matmul %116, %118, %cst_128 {dimension_numbers = #tpu.dot_dimension_numbers<[1], [0], [0], [1], [0, 0, 1, 1], [], []>} : vector<16x132xf32>, vector<132x192xf32>, vector<16x192xf32> -> vector<16x192xf32>
    %120 = arith.addf %115, %119 : vector<16x192xf32>
    %c3_129 = arith.constant 3 : index
    %c0_130 = arith.constant 0 : index
    %121 = vector.load %arg14[%c3_129, %c0_130] : memref<22x132xf32, #tpu.memory_space<vmem>>, vector<16x132xf32>
    %c3_131 = arith.constant 3 : index
    %c0_132 = arith.constant 0 : index
    %c0_133 = arith.constant 0 : index
    %122 = vector.load %arg4[%c3_131, %c0_132, %c0_133] : memref<7x132x192xf32, #tpu.memory_space<vmem>>, vector<1x132x192xf32>
    %123 = vector.shape_cast %122 : vector<1x132x192xf32> to vector<132x192xf32>
    %cst_134 = arith.constant dense<0.000000e+00> : vector<16x192xf32>
    %124 = tpu.matmul %121, %123, %cst_134 {dimension_numbers = #tpu.dot_dimension_numbers<[1], [0], [0], [1], [0, 0, 1, 1], [], []>} : vector<16x132xf32>, vector<132x192xf32>, vector<16x192xf32> -> vector<16x192xf32>
    %125 = arith.addf %120, %124 : vector<16x192xf32>
    %c4_135 = arith.constant 4 : index
    %c0_136 = arith.constant 0 : index
    %126 = vector.load %arg14[%c4_135, %c0_136] : memref<22x132xf32, #tpu.memory_space<vmem>>, vector<16x132xf32>
    %c4_137 = arith.constant 4 : index
    %c0_138 = arith.constant 0 : index
    %c0_139 = arith.constant 0 : index
    %127 = vector.load %arg4[%c4_137, %c0_138, %c0_139] : memref<7x132x192xf32, #tpu.memory_space<vmem>>, vector<1x132x192xf32>
    %128 = vector.shape_cast %127 : vector<1x132x192xf32> to vector<132x192xf32>
    %cst_140 = arith.constant dense<0.000000e+00> : vector<16x192xf32>
    %129 = tpu.matmul %126, %128, %cst_140 {dimension_numbers = #tpu.dot_dimension_numbers<[1], [0], [0], [1], [0, 0, 1, 1], [], []>} : vector<16x132xf32>, vector<132x192xf32>, vector<16x192xf32> -> vector<16x192xf32>
    %130 = arith.addf %125, %129 : vector<16x192xf32>
    %c5_141 = arith.constant 5 : index
    %c0_142 = arith.constant 0 : index
    %131 = vector.load %arg14[%c5_141, %c0_142] : memref<22x132xf32, #tpu.memory_space<vmem>>, vector<16x132xf32>
    %c5_143 = arith.constant 5 : index
    %c0_144 = arith.constant 0 : index
    %c0_145 = arith.constant 0 : index
    %132 = vector.load %arg4[%c5_143, %c0_144, %c0_145] : memref<7x132x192xf32, #tpu.memory_space<vmem>>, vector<1x132x192xf32>
    %133 = vector.shape_cast %132 : vector<1x132x192xf32> to vector<132x192xf32>
    %cst_146 = arith.constant dense<0.000000e+00> : vector<16x192xf32>
    %134 = tpu.matmul %131, %133, %cst_146 {dimension_numbers = #tpu.dot_dimension_numbers<[1], [0], [0], [1], [0, 0, 1, 1], [], []>} : vector<16x132xf32>, vector<132x192xf32>, vector<16x192xf32> -> vector<16x192xf32>
    %135 = arith.addf %130, %134 : vector<16x192xf32>
    %c6_147 = arith.constant 6 : index
    %c0_148 = arith.constant 0 : index
    %136 = vector.load %arg14[%c6_147, %c0_148] : memref<22x132xf32, #tpu.memory_space<vmem>>, vector<16x132xf32>
    %c6_149 = arith.constant 6 : index
    %c0_150 = arith.constant 0 : index
    %c0_151 = arith.constant 0 : index
    %137 = vector.load %arg4[%c6_149, %c0_150, %c0_151] : memref<7x132x192xf32, #tpu.memory_space<vmem>>, vector<1x132x192xf32>
    %138 = vector.shape_cast %137 : vector<1x132x192xf32> to vector<132x192xf32>
    %cst_152 = arith.constant dense<0.000000e+00> : vector<16x192xf32>
    %139 = tpu.matmul %136, %138, %cst_152 {dimension_numbers = #tpu.dot_dimension_numbers<[1], [0], [0], [1], [0, 0, 1, 1], [], []>} : vector<16x132xf32>, vector<132x192xf32>, vector<16x192xf32> -> vector<16x192xf32>
    %140 = arith.addf %135, %139 : vector<16x192xf32>
    %c0_153 = arith.constant 0 : index
    %c0_154 = arith.constant 0 : index
    %141 = vector.load %arg5[%c0_153, %c0_154] : memref<1x192xf32, #tpu.memory_space<vmem>>, vector<1x192xf32>
    %142 = vector.broadcast %141 : vector<1x192xf32> to vector<16x192xf32>
    %143 = arith.addf %140, %142 : vector<16x192xf32>
    %c2_155 = arith.constant 2 : index
    %c24_156 = arith.constant 24 : index
    %144 = vector.load %arg15[%c2_155, %c24_156] : memref<20x240xf32, #tpu.memory_space<vmem>>, vector<16x192xf32>
    tpu.vector_store %arg15[%c2_155, %c24_156], %143 {strides = array<i32>} : memref<20x240xf32, #tpu.memory_space<vmem>>, vector<16x192xf32>,
    %145 = vector.extract_strided_slice %143 {offsets = [1, 0], sizes = [1, 192], strides = [1, 1]} : vector<16x192xf32> to vector<1x192xf32>
    %c1_157 = arith.constant 1 : index
    %c24_158 = arith.constant 24 : index
    %146 = vector.load %arg15[%c1_157, %c24_158] : memref<20x240xf32, #tpu.memory_space<vmem>>, vector<1x192xf32>
    tpu.vector_store %arg15[%c1_157, %c24_158], %145 {strides = array<i32>} : memref<20x240xf32, #tpu.memory_space<vmem>>, vector<1x192xf32>,
    %147 = vector.extract_strided_slice %143 {offsets = [14, 0], sizes = [1, 192], strides = [1, 1]} : vector<16x192xf32> to vector<1x192xf32>
    %c18_159 = arith.constant 18 : index
    %c24_160 = arith.constant 24 : index
    %148 = vector.load %arg15[%c18_159, %c24_160] : memref<20x240xf32, #tpu.memory_space<vmem>>, vector<1x192xf32>
    tpu.vector_store %arg15[%c18_159, %c24_160], %147 {strides = array<i32>} : memref<20x240xf32, #tpu.memory_space<vmem>>, vector<1x192xf32>,
    %149 = vector.extract_strided_slice %143 {offsets = [2, 0], sizes = [1, 192], strides = [1, 1]} : vector<16x192xf32> to vector<1x192xf32>
    %c0_161 = arith.constant 0 : index
    %c24_162 = arith.constant 24 : index
    %150 = vector.load %arg15[%c0_161, %c24_162] : memref<20x240xf32, #tpu.memory_space<vmem>>, vector<1x192xf32>
    tpu.vector_store %arg15[%c0_161, %c24_162], %149 {strides = array<i32>} : memref<20x240xf32, #tpu.memory_space<vmem>>, vector<1x192xf32>,
    %151 = vector.extract_strided_slice %143 {offsets = [13, 0], sizes = [1, 192], strides = [1, 1]} : vector<16x192xf32> to vector<1x192xf32>
    %c19_163 = arith.constant 19 : index
    %c24_164 = arith.constant 24 : index
    %152 = vector.load %arg15[%c19_163, %c24_164] : memref<20x240xf32, #tpu.memory_space<vmem>>, vector<1x192xf32>
    tpu.vector_store %arg15[%c19_163, %c24_164], %151 {strides = array<i32>} : memref<20x240xf32, #tpu.memory_space<vmem>>, vector<1x192xf32>,
    %c0_165 = arith.constant 0 : index
    %c36_166 = arith.constant 36 : index
    %153 = vector.load %arg15[%c0_165, %c36_166] : memref<20x240xf32, #tpu.memory_space<vmem>>, vector<20x12xf32>
    %c0_167 = arith.constant 0 : index
    %c12_168 = arith.constant 12 : index
    %154 = vector.load %arg15[%c0_167, %c12_168] : memref<20x240xf32, #tpu.memory_space<vmem>>, vector<20x12xf32>
    tpu.vector_store %arg15[%c0_167, %c12_168], %153 {strides = array<i32>} : memref<20x240xf32, #tpu.memory_space<vmem>>, vector<20x12xf32>,
    %c0_169 = arith.constant 0 : index
    %c192 = arith.constant 192 : index
    %155 = vector.load %arg15[%c0_169, %c192] : memref<20x240xf32, #tpu.memory_space<vmem>>, vector<20x12xf32>
    %c0_170 = arith.constant 0 : index
    %c216 = arith.constant 216 : index
    %156 = vector.load %arg15[%c0_170, %c216] : memref<20x240xf32, #tpu.memory_space<vmem>>, vector<20x12xf32>
    tpu.vector_store %arg15[%c0_170, %c216], %155 {strides = array<i32>} : memref<20x240xf32, #tpu.memory_space<vmem>>, vector<20x12xf32>,
    %c0_171 = arith.constant 0 : index
    %c48_172 = arith.constant 48 : index
    %157 = vector.load %arg15[%c0_171, %c48_172] : memref<20x240xf32, #tpu.memory_space<vmem>>, vector<20x12xf32>
    %c0_173 = arith.constant 0 : index
    %c0_174 = arith.constant 0 : index
    %158 = vector.load %arg15[%c0_173, %c0_174] : memref<20x240xf32, #tpu.memory_space<vmem>>, vector<20x12xf32>
    tpu.vector_store %arg15[%c0_173, %c0_174], %157 {strides = array<i32>} : memref<20x240xf32, #tpu.memory_space<vmem>>, vector<20x12xf32>,
    %c0_175 = arith.constant 0 : index
    %c180 = arith.constant 180 : index
    %159 = vector.load %arg15[%c0_175, %c180] : memref<20x240xf32, #tpu.memory_space<vmem>>, vector<20x12xf32>
    %c0_176 = arith.constant 0 : index
    %c228 = arith.constant 228 : index
    %160 = vector.load %arg15[%c0_176, %c228] : memref<20x240xf32, #tpu.memory_space<vmem>>, vector<20x12xf32>
    tpu.vector_store %arg15[%c0_176, %c228], %159 {strides = array<i32>} : memref<20x240xf32, #tpu.memory_space<vmem>>, vector<20x12xf32>,
    %c0_177 = arith.constant 0 : index
    %c0_178 = arith.constant 0 : index
    %161 = vector.load %arg15[%c0_177, %c0_178] : memref<20x240xf32, #tpu.memory_space<vmem>>, vector<16x240xf32>
    %c0_179 = arith.constant 0 : index
    %c0_180 = arith.constant 0 : index
    %c0_181 = arith.constant 0 : index
    %162 = vector.load %arg6[%c0_179, %c0_180, %c0_181] : memref<5x240x96xf32, #tpu.memory_space<vmem>>, vector<1x240x96xf32>
    %163 = vector.shape_cast %162 : vector<1x240x96xf32> to vector<240x96xf32>
    %cst_182 = arith.constant dense<0.000000e+00> : vector<16x96xf32>
    %164 = tpu.matmul %161, %163, %cst_182 {dimension_numbers = #tpu.dot_dimension_numbers<[1], [0], [0], [1], [0, 0, 1, 1], [], []>} : vector<16x240xf32>, vector<240x96xf32>, vector<16x96xf32> -> vector<16x96xf32>
    %c1_183 = arith.constant 1 : index
    %c0_184 = arith.constant 0 : index
    %165 = vector.load %arg15[%c1_183, %c0_184] : memref<20x240xf32, #tpu.memory_space<vmem>>, vector<16x240xf32>
    %c1_185 = arith.constant 1 : index
    %c0_186 = arith.constant 0 : index
    %c0_187 = arith.constant 0 : index
    %166 = vector.load %arg6[%c1_185, %c0_186, %c0_187] : memref<5x240x96xf32, #tpu.memory_space<vmem>>, vector<1x240x96xf32>
    %167 = vector.shape_cast %166 : vector<1x240x96xf32> to vector<240x96xf32>
    %cst_188 = arith.constant dense<0.000000e+00> : vector<16x96xf32>
    %168 = tpu.matmul %165, %167, %cst_188 {dimension_numbers = #tpu.dot_dimension_numbers<[1], [0], [0], [1], [0, 0, 1, 1], [], []>} : vector<16x240xf32>, vector<240x96xf32>, vector<16x96xf32> -> vector<16x96xf32>
    %169 = arith.addf %164, %168 : vector<16x96xf32>
    %c2_189 = arith.constant 2 : index
    %c0_190 = arith.constant 0 : index
    %170 = vector.load %arg15[%c2_189, %c0_190] : memref<20x240xf32, #tpu.memory_space<vmem>>, vector<16x240xf32>
    %c2_191 = arith.constant 2 : index
    %c0_192 = arith.constant 0 : index
    %c0_193 = arith.constant 0 : index
    %171 = vector.load %arg6[%c2_191, %c0_192, %c0_193] : memref<5x240x96xf32, #tpu.memory_space<vmem>>, vector<1x240x96xf32>
    %172 = vector.shape_cast %171 : vector<1x240x96xf32> to vector<240x96xf32>
    %cst_194 = arith.constant dense<0.000000e+00> : vector<16x96xf32>
    %173 = tpu.matmul %170, %172, %cst_194 {dimension_numbers = #tpu.dot_dimension_numbers<[1], [0], [0], [1], [0, 0, 1, 1], [], []>} : vector<16x240xf32>, vector<240x96xf32>, vector<16x96xf32> -> vector<16x96xf32>
    %174 = arith.addf %169, %173 : vector<16x96xf32>
    %c3_195 = arith.constant 3 : index
    %c0_196 = arith.constant 0 : index
    %175 = vector.load %arg15[%c3_195, %c0_196] : memref<20x240xf32, #tpu.memory_space<vmem>>, vector<16x240xf32>
    %c3_197 = arith.constant 3 : index
    %c0_198 = arith.constant 0 : index
    %c0_199 = arith.constant 0 : index
    %176 = vector.load %arg6[%c3_197, %c0_198, %c0_199] : memref<5x240x96xf32, #tpu.memory_space<vmem>>, vector<1x240x96xf32>
    %177 = vector.shape_cast %176 : vector<1x240x96xf32> to vector<240x96xf32>
    %cst_200 = arith.constant dense<0.000000e+00> : vector<16x96xf32>
    %178 = tpu.matmul %175, %177, %cst_200 {dimension_numbers = #tpu.dot_dimension_numbers<[1], [0], [0], [1], [0, 0, 1, 1], [], []>} : vector<16x240xf32>, vector<240x96xf32>, vector<16x96xf32> -> vector<16x96xf32>
    %179 = arith.addf %174, %178 : vector<16x96xf32>
    %c4_201 = arith.constant 4 : index
    %c0_202 = arith.constant 0 : index
    %180 = vector.load %arg15[%c4_201, %c0_202] : memref<20x240xf32, #tpu.memory_space<vmem>>, vector<16x240xf32>
    %c4_203 = arith.constant 4 : index
    %c0_204 = arith.constant 0 : index
    %c0_205 = arith.constant 0 : index
    %181 = vector.load %arg6[%c4_203, %c0_204, %c0_205] : memref<5x240x96xf32, #tpu.memory_space<vmem>>, vector<1x240x96xf32>
    %182 = vector.shape_cast %181 : vector<1x240x96xf32> to vector<240x96xf32>
    %cst_206 = arith.constant dense<0.000000e+00> : vector<16x96xf32>
    %183 = tpu.matmul %180, %182, %cst_206 {dimension_numbers = #tpu.dot_dimension_numbers<[1], [0], [0], [1], [0, 0, 1, 1], [], []>} : vector<16x240xf32>, vector<240x96xf32>, vector<16x96xf32> -> vector<16x96xf32>
    %184 = arith.addf %179, %183 : vector<16x96xf32>
    %c0_207 = arith.constant 0 : index
    %c0_208 = arith.constant 0 : index
    %185 = vector.load %arg7[%c0_207, %c0_208] : memref<1x96xf32, #tpu.memory_space<vmem>>, vector<1x96xf32>
    %186 = vector.broadcast %185 : vector<1x96xf32> to vector<16x96xf32>
    %187 = arith.addf %184, %186 : vector<16x96xf32>
    %c1_209 = arith.constant 1 : index
    %c6_210 = arith.constant 6 : index
    %188 = vector.load %arg16[%c1_209, %c6_210] : memref<18x108xf32, #tpu.memory_space<vmem>>, vector<16x96xf32>
    tpu.vector_store %arg16[%c1_209, %c6_210], %187 {strides = array<i32>} : memref<18x108xf32, #tpu.memory_space<vmem>>, vector<16x96xf32>,
    %189 = vector.extract_strided_slice %187 {offsets = [1, 0], sizes = [1, 96], strides = [1, 1]} : vector<16x96xf32> to vector<1x96xf32>
    %c0_211 = arith.constant 0 : index
    %c6_212 = arith.constant 6 : index
    %190 = vector.load %arg16[%c0_211, %c6_212] : memref<18x108xf32, #tpu.memory_space<vmem>>, vector<1x96xf32>
    tpu.vector_store %arg16[%c0_211, %c6_212], %189 {strides = array<i32>} : memref<18x108xf32, #tpu.memory_space<vmem>>, vector<1x96xf32>,
    %191 = vector.extract_strided_slice %187 {offsets = [14, 0], sizes = [1, 96], strides = [1, 1]} : vector<16x96xf32> to vector<1x96xf32>
    %c17 = arith.constant 17 : index
    %c6_213 = arith.constant 6 : index
    %192 = vector.load %arg16[%c17, %c6_213] : memref<18x108xf32, #tpu.memory_space<vmem>>, vector<1x96xf32>
    tpu.vector_store %arg16[%c17, %c6_213], %191 {strides = array<i32>} : memref<18x108xf32, #tpu.memory_space<vmem>>, vector<1x96xf32>,
    %c0_214 = arith.constant 0 : index
    %c12_215 = arith.constant 12 : index
    %193 = vector.load %arg16[%c0_214, %c12_215] : memref<18x108xf32, #tpu.memory_space<vmem>>, vector<18x6xf32>
    %c0_216 = arith.constant 0 : index
    %c0_217 = arith.constant 0 : index
    %194 = vector.load %arg16[%c0_216, %c0_217] : memref<18x108xf32, #tpu.memory_space<vmem>>, vector<18x6xf32>
    tpu.vector_store %arg16[%c0_216, %c0_217], %193 {strides = array<i32>} : memref<18x108xf32, #tpu.memory_space<vmem>>, vector<18x6xf32>,
    %c0_218 = arith.constant 0 : index
    %c90_219 = arith.constant 90 : index
    %195 = vector.load %arg16[%c0_218, %c90_219] : memref<18x108xf32, #tpu.memory_space<vmem>>, vector<18x6xf32>
    %c0_220 = arith.constant 0 : index
    %c102_221 = arith.constant 102 : index
    %196 = vector.load %arg16[%c0_220, %c102_221] : memref<18x108xf32, #tpu.memory_space<vmem>>, vector<18x6xf32>
    tpu.vector_store %arg16[%c0_220, %c102_221], %195 {strides = array<i32>} : memref<18x108xf32, #tpu.memory_space<vmem>>, vector<18x6xf32>,
    %c0_222 = arith.constant 0 : index
    %c0_223 = arith.constant 0 : index
    %197 = vector.load %arg16[%c0_222, %c0_223] : memref<18x108xf32, #tpu.memory_space<vmem>>, vector<16x108xf32>
    %c0_224 = arith.constant 0 : index
    %c0_225 = arith.constant 0 : index
    %c0_226 = arith.constant 0 : index
    %198 = vector.load %arg8[%c0_224, %c0_225, %c0_226] : memref<3x108x48xf32, #tpu.memory_space<vmem>>, vector<1x108x48xf32>
    %199 = vector.shape_cast %198 : vector<1x108x48xf32> to vector<108x48xf32>
    %cst_227 = arith.constant dense<0.000000e+00> : vector<16x48xf32>
    %200 = tpu.matmul %197, %199, %cst_227 {dimension_numbers = #tpu.dot_dimension_numbers<[1], [0], [0], [1], [0, 0, 1, 1], [], []>} : vector<16x108xf32>, vector<108x48xf32>, vector<16x48xf32> -> vector<16x48xf32>
    %c1_228 = arith.constant 1 : index
    %c0_229 = arith.constant 0 : index
    %201 = vector.load %arg16[%c1_228, %c0_229] : memref<18x108xf32, #tpu.memory_space<vmem>>, vector<16x108xf32>
    %c1_230 = arith.constant 1 : index
    %c0_231 = arith.constant 0 : index
    %c0_232 = arith.constant 0 : index
    %202 = vector.load %arg8[%c1_230, %c0_231, %c0_232] : memref<3x108x48xf32, #tpu.memory_space<vmem>>, vector<1x108x48xf32>
    %203 = vector.shape_cast %202 : vector<1x108x48xf32> to vector<108x48xf32>
    %cst_233 = arith.constant dense<0.000000e+00> : vector<16x48xf32>
    %204 = tpu.matmul %201, %203, %cst_233 {dimension_numbers = #tpu.dot_dimension_numbers<[1], [0], [0], [1], [0, 0, 1, 1], [], []>} : vector<16x108xf32>, vector<108x48xf32>, vector<16x48xf32> -> vector<16x48xf32>
    %205 = arith.addf %200, %204 : vector<16x48xf32>
    %c2_234 = arith.constant 2 : index
    %c0_235 = arith.constant 0 : index
    %206 = vector.load %arg16[%c2_234, %c0_235] : memref<18x108xf32, #tpu.memory_space<vmem>>, vector<16x108xf32>
    %c2_236 = arith.constant 2 : index
    %c0_237 = arith.constant 0 : index
    %c0_238 = arith.constant 0 : index
    %207 = vector.load %arg8[%c2_236, %c0_237, %c0_238] : memref<3x108x48xf32, #tpu.memory_space<vmem>>, vector<1x108x48xf32>
    %208 = vector.shape_cast %207 : vector<1x108x48xf32> to vector<108x48xf32>
    %cst_239 = arith.constant dense<0.000000e+00> : vector<16x48xf32>
    %209 = tpu.matmul %206, %208, %cst_239 {dimension_numbers = #tpu.dot_dimension_numbers<[1], [0], [0], [1], [0, 0, 1, 1], [], []>} : vector<16x108xf32>, vector<108x48xf32>, vector<16x48xf32> -> vector<16x48xf32>
    %210 = arith.addf %205, %209 : vector<16x48xf32>
    %c0_240 = arith.constant 0 : index
    %c0_241 = arith.constant 0 : index
    %211 = vector.load %arg9[%c0_240, %c0_241] : memref<1x48xf32, #tpu.memory_space<vmem>>, vector<1x48xf32>
    %212 = vector.broadcast %211 : vector<1x48xf32> to vector<16x48xf32>
    %213 = arith.addf %210, %212 : vector<16x48xf32>
    %214 = arith.addf %213, %1 : vector<16x48xf32>
    %c1_242 = arith.constant 1 : index
    %c3_243 = arith.constant 3 : index
    %215 = vector.load %arg17[%c1_242, %c3_243] : memref<18x54xf32, #tpu.memory_space<vmem>>, vector<16x48xf32>
    tpu.vector_store %arg17[%c1_242, %c3_243], %214 {strides = array<i32>} : memref<18x54xf32, #tpu.memory_space<vmem>>, vector<16x48xf32>,
    %216 = vector.extract_strided_slice %214 {offsets = [1, 0], sizes = [1, 48], strides = [1, 1]} : vector<16x48xf32> to vector<1x48xf32>
    %c0_244 = arith.constant 0 : index
    %c3_245 = arith.constant 3 : index
    %217 = vector.load %arg17[%c0_244, %c3_245] : memref<18x54xf32, #tpu.memory_space<vmem>>, vector<1x48xf32>
    tpu.vector_store %arg17[%c0_244, %c3_245], %216 {strides = array<i32>} : memref<18x54xf32, #tpu.memory_space<vmem>>, vector<1x48xf32>,
    %218 = vector.extract_strided_slice %214 {offsets = [14, 0], sizes = [1, 48], strides = [1, 1]} : vector<16x48xf32> to vector<1x48xf32>
    %c17_246 = arith.constant 17 : index
    %c3_247 = arith.constant 3 : index
    %219 = vector.load %arg17[%c17_246, %c3_247] : memref<18x54xf32, #tpu.memory_space<vmem>>, vector<1x48xf32>
    tpu.vector_store %arg17[%c17_246, %c3_247], %218 {strides = array<i32>} : memref<18x54xf32, #tpu.memory_space<vmem>>, vector<1x48xf32>,
    %c0_248 = arith.constant 0 : index
    %c6_249 = arith.constant 6 : index
    %220 = vector.load %arg17[%c0_248, %c6_249] : memref<18x54xf32, #tpu.memory_space<vmem>>, vector<18x3xf32>
    %c0_250 = arith.constant 0 : index
    %c0_251 = arith.constant 0 : index
    %221 = vector.load %arg17[%c0_250, %c0_251] : memref<18x54xf32, #tpu.memory_space<vmem>>, vector<18x3xf32>
    tpu.vector_store %arg17[%c0_250, %c0_251], %220 {strides = array<i32>} : memref<18x54xf32, #tpu.memory_space<vmem>>, vector<18x3xf32>,
    %c0_252 = arith.constant 0 : index
    %c45_253 = arith.constant 45 : index
    %222 = vector.load %arg17[%c0_252, %c45_253] : memref<18x54xf32, #tpu.memory_space<vmem>>, vector<18x3xf32>
    %c0_254 = arith.constant 0 : index
    %c51_255 = arith.constant 51 : index
    %223 = vector.load %arg17[%c0_254, %c51_255] : memref<18x54xf32, #tpu.memory_space<vmem>>, vector<18x3xf32>
    tpu.vector_store %arg17[%c0_254, %c51_255], %222 {strides = array<i32>} : memref<18x54xf32, #tpu.memory_space<vmem>>, vector<18x3xf32>,
    %c0_256 = arith.constant 0 : index
    %c0_257 = arith.constant 0 : index
    %224 = vector.load %arg17[%c0_256, %c0_257] : memref<18x54xf32, #tpu.memory_space<vmem>>, vector<16x54xf32>
    %c0_258 = arith.constant 0 : index
    %c0_259 = arith.constant 0 : index
    %c0_260 = arith.constant 0 : index
    %225 = vector.load %arg10[%c0_258, %c0_259, %c0_260] : memref<3x54x48xf32, #tpu.memory_space<vmem>>, vector<1x54x48xf32>
    %226 = vector.shape_cast %225 : vector<1x54x48xf32> to vector<54x48xf32>
    %cst_261 = arith.constant dense<0.000000e+00> : vector<16x48xf32>
    %227 = tpu.matmul %224, %226, %cst_261 {dimension_numbers = #tpu.dot_dimension_numbers<[1], [0], [0], [1], [0, 0, 1, 1], [], []>} : vector<16x54xf32>, vector<54x48xf32>, vector<16x48xf32> -> vector<16x48xf32>
    %c1_262 = arith.constant 1 : index
    %c0_263 = arith.constant 0 : index
    %228 = vector.load %arg17[%c1_262, %c0_263] : memref<18x54xf32, #tpu.memory_space<vmem>>, vector<16x54xf32>
    %c1_264 = arith.constant 1 : index
    %c0_265 = arith.constant 0 : index
    %c0_266 = arith.constant 0 : index
    %229 = vector.load %arg10[%c1_264, %c0_265, %c0_266] : memref<3x54x48xf32, #tpu.memory_space<vmem>>, vector<1x54x48xf32>
    %230 = vector.shape_cast %229 : vector<1x54x48xf32> to vector<54x48xf32>
    %cst_267 = arith.constant dense<0.000000e+00> : vector<16x48xf32>
    %231 = tpu.matmul %228, %230, %cst_267 {dimension_numbers = #tpu.dot_dimension_numbers<[1], [0], [0], [1], [0, 0, 1, 1], [], []>} : vector<16x54xf32>, vector<54x48xf32>, vector<16x48xf32> -> vector<16x48xf32>
    %232 = arith.addf %227, %231 : vector<16x48xf32>
    %c2_268 = arith.constant 2 : index
    %c0_269 = arith.constant 0 : index
    %233 = vector.load %arg17[%c2_268, %c0_269] : memref<18x54xf32, #tpu.memory_space<vmem>>, vector<16x54xf32>
    %c2_270 = arith.constant 2 : index
    %c0_271 = arith.constant 0 : index
    %c0_272 = arith.constant 0 : index
    %234 = vector.load %arg10[%c2_270, %c0_271, %c0_272] : memref<3x54x48xf32, #tpu.memory_space<vmem>>, vector<1x54x48xf32>
    %235 = vector.shape_cast %234 : vector<1x54x48xf32> to vector<54x48xf32>
    %cst_273 = arith.constant dense<0.000000e+00> : vector<16x48xf32>
    %236 = tpu.matmul %233, %235, %cst_273 {dimension_numbers = #tpu.dot_dimension_numbers<[1], [0], [0], [1], [0, 0, 1, 1], [], []>} : vector<16x54xf32>, vector<54x48xf32>, vector<16x48xf32> -> vector<16x48xf32>
    %237 = arith.addf %232, %236 : vector<16x48xf32>
    %c0_274 = arith.constant 0 : index
    %c0_275 = arith.constant 0 : index
    %238 = vector.load %arg11[%c0_274, %c0_275] : memref<1x48xf32, #tpu.memory_space<vmem>>, vector<1x48xf32>
    %239 = vector.broadcast %238 : vector<1x48xf32> to vector<16x48xf32>
    %240 = arith.addf %237, %239 : vector<16x48xf32>
    %cst_276 = arith.constant 0.000000e+00 : f32
    %cst_277 = arith.constant 1.000000e+00 : f32
    %241 = vector.broadcast %cst_276 : f32 to vector<16x48xf32>
    %242 = arith.maximumf %241, %240 : vector<16x48xf32>
    %243 = vector.broadcast %cst_277 : f32 to vector<16x48xf32>
    %244 = arith.minimumf %243, %242 : vector<16x48xf32>
    %c0_278 = arith.constant 0 : index
    %c0_279 = arith.constant 0 : index
    %c0_280 = arith.constant 0 : index
    %245 = vector.load %arg12[%c0_278, %c0_279, %c0_280] : memref<1x16x48xf32, #tpu.memory_space<vmem>>, vector<1x16x48xf32>
    %246 = vector.shape_cast %245 : vector<1x16x48xf32> to vector<16x48xf32>
    %247 = vector.shape_cast %244 : vector<16x48xf32> to vector<1x16x48xf32>
    tpu.vector_store %arg12[%c0_278, %c0_279, %c0_280], %247 {strides = array<i32>} : memref<1x16x48xf32, #tpu.memory_space<vmem>>, vector<1x16x48xf32>,
    return
  }
  func.func @transform_0(%arg0: i32) -> (i32, i32, i32) {
    %c0_i32 = arith.constant 0 : i32
    %c0_i32_0 = arith.constant 0 : i32
    %c0_i32_1 = arith.constant 0 : i32
    return %arg0, %c0_i32, %c0_i32_0 : i32, i32, i32
  }
  func.func @transform_1(%arg0: i32) -> (i32, i32, i32) {
    %c0_i32 = arith.constant 0 : i32
    %c0_i32_0 = arith.constant 0 : i32
    %c0_i32_1 = arith.constant 0 : i32
    %c0_i32_2 = arith.constant 0 : i32
    return %c0_i32, %c0_i32_0, %c0_i32_1 : i32, i32, i32
  }
  func.func @transform_2(%arg0: i32) -> (i32, i32) {
    %c0_i32 = arith.constant 0 : i32
    %c0_i32_0 = arith.constant 0 : i32
    %c0_i32_1 = arith.constant 0 : i32
    return %c0_i32, %c0_i32_0 : i32, i32
  }
  func.func @transform_3(%arg0: i32) -> (i32, i32, i32) {
    %c0_i32 = arith.constant 0 : i32
    %c0_i32_0 = arith.constant 0 : i32
    %c0_i32_1 = arith.constant 0 : i32
    %c0_i32_2 = arith.constant 0 : i32
    return %c0_i32, %c0_i32_0, %c0_i32_1 : i32, i32, i32
  }
  func.func @transform_4(%arg0: i32) -> (i32, i32) {
    %c0_i32 = arith.constant 0 : i32
    %c0_i32_0 = arith.constant 0 : i32
    %c0_i32_1 = arith.constant 0 : i32
    return %c0_i32, %c0_i32_0 : i32, i32
  }
  func.func @transform_5(%arg0: i32) -> (i32, i32, i32) {
    %c0_i32 = arith.constant 0 : i32
    %c0_i32_0 = arith.constant 0 : i32
    %c0_i32_1 = arith.constant 0 : i32
    %c0_i32_2 = arith.constant 0 : i32
    return %c0_i32, %c0_i32_0, %c0_i32_1 : i32, i32, i32
  }
  func.func @transform_6(%arg0: i32) -> (i32, i32) {
    %c0_i32 = arith.constant 0 : i32
    %c0_i32_0 = arith.constant 0 : i32
    %c0_i32_1 = arith.constant 0 : i32
    return %c0_i32, %c0_i32_0 : i32, i32
  }
  func.func @transform_7(%arg0: i32) -> (i32, i32, i32) {
    %c0_i32 = arith.constant 0 : i32
    %c0_i32_0 = arith.constant 0 : i32
    %c0_i32_1 = arith.constant 0 : i32
    %c0_i32_2 = arith.constant 0 : i32
    return %c0_i32, %c0_i32_0, %c0_i32_1 : i32, i32, i32
  }
  func.func @transform_8(%arg0: i32) -> (i32, i32) {
    %c0_i32 = arith.constant 0 : i32
    %c0_i32_0 = arith.constant 0 : i32
    %c0_i32_1 = arith.constant 0 : i32
    return %c0_i32, %c0_i32_0 : i32, i32
  }
  func.func @transform_9(%arg0: i32) -> (i32, i32, i32) {
    %c0_i32 = arith.constant 0 : i32
    %c0_i32_0 = arith.constant 0 : i32
    %c0_i32_1 = arith.constant 0 : i32
    %c0_i32_2 = arith.constant 0 : i32
    return %c0_i32, %c0_i32_0, %c0_i32_1 : i32, i32, i32
  }
  func.func @transform_10(%arg0: i32) -> (i32, i32) {
    %c0_i32 = arith.constant 0 : i32
    %c0_i32_0 = arith.constant 0 : i32
    %c0_i32_1 = arith.constant 0 : i32
    return %c0_i32, %c0_i32_0 : i32, i32
  }
  func.func @transform_11(%arg0: i32) -> (i32, i32, i32) {
    %c0_i32 = arith.constant 0 : i32
    %c0_i32_0 = arith.constant 0 : i32
    %c0_i32_1 = arith.constant 0 : i32
    return %arg0, %c0_i32, %c0_i32_0 : i32, i32, i32
  }
}

</mosaic_0001>

<bundles_post_ra>
// kernel: pop2_forward.1
= control target key start
LH: loop header
LB: loop body
LE: loop exit
PB: predicated region body
PF: predicated region fallthrough
CT: control target
= control target key end

     0   :  { %16 = vsyncpa [#allocation8], 0  ;;  %s6177_s17 = smov 0   ;;  %s7999_s0 = inlined_call_operand.vmem [shape: f32[2,16,48], index: 0, kind: input, shape index: {}]   ;;  %s8000_s1 = inlined_call_operand.hbm [shape: f32[9,72,96], index: 1, kind: input, shape index: {}]   ;;  %s8001_s2 = inlined_call_operand.vmem [shape: f32[1,96], index: 2, kind: input, shape index: {}]   ;;  %s8002_s3 = inlined_call_operand.vmem [shape: f32[7,132,192], index: 3, kind: input, shape index: {}]   ;;  %s8003_s4 = inlined_call_operand.vmem [shape: f32[1,192], index: 4, kind: input, shape index: {}]   ;;  %s8004_s5 = inlined_call_operand.vmem [shape: f32[5,240,96], index: 5, kind: input, shape index: {}]   ;;  %s8005_s6 = inlined_call_operand.vmem [shape: f32[1,96], index: 6, kind: input, shape index: {}]   ;;  %s8006_s7 = inlined_call_operand.vmem [shape: f32[3,108,48], index: 7, kind: input, shape index: {}]   ;;  %s8007_s8 = inlined_call_operand.vmem [shape: f32[1,48], index: 8, kind: input, shape index: {}]   ;;  %s8008_s9 = inlined_call_operand.vmem [shape: f32[3,54,48], index: 9, kind: input, shape index: {}]   ;;  %s8009_s10 = inlined_call_operand.vmem [shape: f32[1,48], index: 10, kind: input, shape index: {}]   ;;  %s8010_s11 = inlined_call_operand.vmem [shape: f32[2,16,48], index: 11, kind: output, shape index: {}]  }
   0x1 LB: > { %s6183_s18 = sadd.s32 4294967295, %s6096_s17   ;;  %p4287_p0 = scmp.ge.s32.totalorder %s6096_s17, 1  ;;  %s6096_s17 = sphi %s6177_s17, %s22_s17  }
   0x2   : > { %p289_p1 = scmp.lt.s32.totalorder %s6096_s17, 3  ;;  %s6098_s19 = smov [#allocation7]  }
   0x3   : > { %s301_s20 = sshll.u32 %s6098_s19, 4  ;;  %p8011_p3 = scmp.eq.s32.totalorder %s6183_s18, 0  ;;  %s302_s20 = int_to_ptr.vmem [resolvable:$true] %s301_s20 }
   0x4   : > { %p6187_p2 = pnand %p4287_p0, %p289_p1  ;;  %s6058_s25 = scalar_lea.hbm %s8000_s1, 10368 }
   0x5   : > { %p6059_p6 = scmp.ne.s32.totalorder %s8000_s1, %s6058_s25  ;;  %p6065_p10 = scmp.lt.u32.totalorder %s6058_s25, %s8000_s1 }
   0x6   : > { %s8018_s21 = scalar_select %p6187_p2, 1, 0 }
   0x7   : > { %p6022_p4 = pneg %p6187_p2 }
   0x9   : > { %p6196_p5 = pnand %p8011_p3, %p6022_p4 }
   0xb   : > { %p6060_p7 = pneg %p6196_p5 }
   0xd   : > { %p6061_p8 = pnand %p6060_p7, %p6059_p6 }
   0xf   : > { %p6062_p9 = pneg %p6061_p8 }
  0x11   : > { %p6067_p11 = pnand %p6065_p10, %p6062_p9 }
  0x13   : > { %6070 = shalt.err (!%p6067_p11)
}
  0x14   : > { %s6071_s30 = scalar_lea.vmem %s302_s20, 10368  ;;  %p6079_p1 = scmp.lt.s32.totalorder %s302_s20, %s302_s20 }
  0x15   : > { %p6072_p12 = scmp.ne.s32.totalorder %s302_s20, %s6071_s30  ;;  %p6080_p4 = scmp.lt.s32.totalorder %s6071_s30, %s6071_s30 }
  0x17   : > { %p6074_p13 = pnand %p6072_p12, %p6060_p7  ;;  %p6081_p3 = por %p6080_p4, %p6079_p1 }
  0x19   : > { %p6075_p0 = pneg %p6074_p13 }
  0x1b   : > { %p6082_p2 = pnand %p6081_p3, %p6075_p0 }
  0x1d   : > { %6085 = shalt.err (!%p6082_p2)
}
  0x1e   : > { %s6099_s12 = smov 128   ;;  %s6100_s13 = smov 8  }
  0x1f   : > { %6025 = dma.hbm_to_vmem [thread:$0]  (!%p6196_p5), %s8000_s1, 10368, %s302_s20, [#allocation8], %s6099_s12, %s6099_s12, %s6100_s13  }
  0x20   : > { %p8020_p6 = scmp.ne.s32.totalorder %s8018_s21, 0 }
  0x21   : > { %p8021_p8 = scmp.eq.s32.totalorder (!%p8020_p6), %s6183_s18, 0 }
  0x22   : > { %352 = sbr.rel (%p8020_p6) target bundleno = 4800 (0x12c0), region = 64 }
  0x29   : > { %6091 = dma.done.wait (%p8021_p8), [#allocation8], 10368   ;;  %p8022_p7 = pmov %p8021_p8 }
  0x2a   : > { %p392_p2 = scmp.lt.s32.totalorder %s6183_s18, 1  ;;  %s8016_s22 = smov 12   ;;  %vm412_vm0 = vcmask 490592   ;;  %vm415_vm1 = vcmask 484449   ;;  %vm419_vm2 = vcmask 485474   ;;  %vm423_vm3 = vcmask 486499  }
  0x2b   : > { %6093 = vsyncadd (%p8022_p7), [#allocation8], 4294956928  ;;  %vm425_vm4 = vcmask 487524   ;;  %vm417_vm5 = vcmask 489574   ;;  %vm421_vm6 = vcmask 488549   ;;  %s8014_s23 = smov 122  }
  0x2c   : > { %s8031_s18 = smov (!%p392_p2, %s6183_s18), 1  ;;  %vm444_vm7 = vcmask 97352   ;;  %s6103_s24 = smov 6   ;;  %vm463_vm8 = vcmask 515552   ;;  %vm482_vm9 = vcmask 72752   ;;  %vm501_vm10 = vcmask 540152  }
  0x2d   : > { %s8013_s16 = sshll.u32 %s8031_s18, 4  ;;  %s6104_s25 = smov 116   ;;  %vm520_vm11 = vcmask 48152   ;;  %vm539_vm12 = vcmask 564752   ;;  %v583_v41 = vld [vmem:[#allocation7] sm:$0xff]  ;;  %v584_v42 = vld [vmem:[#allocation7 + $0x8] sm:$0xff] }
  0x2e   : > { %s6232_s21 = scalar_lea.vmem %s7999_s0, %s8013_s16  ;;  %s6105_s26 = smov 110   ;;  %v5267_v43 = vpack.c.bf16 %v584_v42, %v583_v41  ;;  %v595_v44 = vld [vmem:[#allocation7 + $0x48] sm:$0xff]  ;;  %v596_v45 = vld [vmem:[#allocation7 + $0x50] sm:$0xff]  ;;  %v586_v48 = vld [vmem:[#allocation7 + $0x18] sm:$0xff]  ;;  %vm558_vm13 = vcmask 23552   ;;  %vm577_vm14 = vcmask 589352  }
  0x2f   : > { %v402_v0 = vld [vmem:[%s6232_s21] sm:$0xff]  ;;  %v403_v1 = vld [vmem:[%s6232_s21 + $0x8] sm:$0xff]  ;;  %s6106_s27 = smov 18   ;;  %s6107_s28 = smov 104   ;;  %v585_v46 = vld [vmem:[#allocation7 + $0x10] sm:$0xff]  ;;  %v5251_v47 = vpack.c.bf16 %v596_v45, %v595_v44  ;;  %vm604_vm15 = vcmask 588800  }
  0x30   : > { %406 = vrot.lane.b32.xlu0 %v402_v0, %s8016_s22  ;;  %v597_v49 = vld [vmem:[#allocation7 + $0x58] sm:$0xff]  ;;  %v598_v50 = vld [vmem:[#allocation7 + $0x60] sm:$0xff]  ;;  %5268 = vmatprep.subr.bf16.mxu0 %v5267_v43  ;;  %v5271_v51 = vpack.c.bf16 %v586_v48, %v585_v46  ;;  %v588_v56 = vld [vmem:[#allocation7 + $0x28] sm:$0xff]  ;;  %s6108_s29 = smov 24   ;;  %s6109_s13 = smov 92  }
  0x31   : > { %v5255_v52 = vpack.c.bf16 %v598_v50, %v597_v49  ;;  %5270 = vmatpush3.bf16.msra.mxu0 %v5267_v43  ;;  %5252 = vmatprep.subr.bf16.mxu1 %v5251_v47  ;;  %v587_v55 = vld [vmem:[#allocation7 + $0x20] sm:$0xff]  ;;  %v599_v58 = vld [vmem:[#allocation7 + $0x68] sm:$0xff]  ;;  %v600_v59 = vld [vmem:[#allocation7 + $0x70] sm:$0xff]  ;;  %s6110_s19 = smov 36   ;;  %s6113_s30 = smov 48  }
  0x32   : > { %5254 = vmatpush3.bf16.msra.mxu1 %v5251_v47  ;;  %5272 = vmatprep.subr.bf16.mxu0 %v5271_v51  ;;  %v5275_v57 = vpack.c.bf16 %v588_v56, %v587_v55  ;;  %v5259_v60 = vpack.c.bf16 %v600_v59, %v599_v58  ;;  %v589_v61 = vld [vmem:[#allocation7 + $0x30] sm:$0xff]  ;;  %v590_v62 = vld [vmem:[#allocation7 + $0x38] sm:$0xff]  ;;  %v871_v43 = vld [vmem:[#allocation7 + $0x108] sm:$0xff]  ;;  %s6114_s14 = smov 80   ;;  %s8027_s20 = smov 12  }
  0x33   : > { %5256 = vmatprep.subr.bf16.mxu1 %v5255_v52  ;;  %v5279_v63 = vpack.c.bf16 %v590_v62, %v589_v61  ;;  %v872_v44 = vld [vmem:[#allocation7 + $0x110] sm:$0xff]  ;;  %v873_v46 = vld [vmem:[#allocation7 + $0x118] sm:$0xff]  ;;  %v960_v47 = vld [vmem:[#allocation7 + $0x120] sm:$0xff]  ;;  %s6116_s12 = smov 3  }
  0x34   : > { %408 = vrot.lane.b32.xlu0 %v403_v1, %s8016_s22  ;;  %v601_v1 = vld [vmem:[#allocation7 + $0x78] sm:$0xff]  ;;  %v5311_v45 = vpack.c.bf16 %v872_v44, %v871_v43  ;;  %v961_v48 = vld [vmem:[#allocation7 + $0x128] sm:$0xff]  ;;  %v962_v49 = vld [vmem:[#allocation7 + $0x130] sm:$0xff] }
  0x35   : > { %5274 = vmatpush3.bf16.msra.mxu0 %v5271_v51  ;;  %v963_v50 = vld [vmem:[#allocation7 + $0x138] sm:$0xff]  ;;  %v5315_v51 = vpack.c.bf16 %v961_v48, %v960_v47  ;;  %v965_v55 = vld [vmem:[#allocation7 + $0x148] sm:$0xff]  ;;  %v966_v58 = vld [vmem:[#allocation7 + $0x150] sm:$0xff] }
  0x36   : > { %5258 = vmatpush3.bf16.msra.mxu1 %v5255_v52  ;;  %5276 = vmatprep.subr.bf16.mxu0 %v5275_v57  ;;  %v5319_v52 = vpack.c.bf16 %v963_v50, %v962_v49  ;;  %v967_v59 = vld [vmem:[#allocation7 + $0x158] sm:$0xff]  ;;  %v968_v61 = vld [vmem:[#allocation7 + $0x160] sm:$0xff]  ;;  %v1055_v62 = vld [vmem:[#allocation7 + $0x168] sm:$0xff] }
  0x37   : > { %5260 = vmatprep.subr.bf16.mxu1 %v5259_v60  ;;  %v1253_v43 = vld [vmem:[#allocation7 + $0x238] sm:$0xff]  ;;  %v1340_v44 = vld [vmem:[#allocation7 + $0x240] sm:$0xff] }
  0x38   : > { %v1343_v47 = vld [vmem:[#allocation7 + $0x258] sm:$0xff] }
  0x39   : > { %5278 = vmatpush3.bf16.msra.mxu0 %v5275_v57 }
  0x3a   : > { %5262 = vmatpush3.bf16.msra.mxu1 %v5259_v60  ;;  %5280 = vmatprep.subr.bf16.mxu0 %v5279_v63  ;;  %v5327_v60 = vpack.c.bf16 %v967_v59, %v966_v58 }
  0x3d   : > { %5282 = vmatpush3.bf16.msra.mxu0 %v5279_v63  ;;  %v1056_v63 = vld [vmem:[#allocation7 + $0x170] sm:$0xff] }
  0xa2   : > { %v407_v2 = vpop.permute.xlu0 %406 }
  0xa3   : > { %413 = vst.msk [vmem:[#allocation2 + $0x4] sm:$0xff] %vm412_vm0, %v407_v2 }
  0xa4   : > { %416 = vst.msk [vmem:[#allocation2 + $0x2] sm:$0x2] %vm415_vm1, %v407_v2  ;;  %vm1456_vm1 = vcmask 933011  }
  0xa5   : > { %420 = vst.msk [vmem:[#allocation2] sm:$0x4] %vm419_vm2, %v407_v2  ;;  %vm1458_vm2 = vcmask 933008  }
  0xa6   : > { %424 = vst.msk [vmem:[#allocation2 - $0x2] sm:$0x8] %vm423_vm3, %v407_v2  ;;  %v409_v3 = vpop.permute.xlu0 %408 }
  0xa7   : > { %427 = vst.msk [vmem:[#allocation2 - $0x4] sm:$0x10] %vm425_vm4, %v407_v2  ;;  %426 = vst.msk [vmem:[#allocation2 + $0x12] sm:$0x10] %vm425_vm4, %v409_v3  ;;  %v602_v2 = vld [vmem:[#allocation7 + $0x80] sm:$0xff]  ;;  %vm1460_vm4 = vcmask 927888  }
  0xa8   : > { %414 = vst.msk [vmem:[#allocation2 + $0xc] sm:$0xff] %vm412_vm0, %v409_v3  ;;  %vm1443_vm0 = vcmask 1042432  }
  0xa9   : > { %418 = vst.msk [vmem:[#allocation2 + $0xe] sm:$0x40] %vm417_vm5, %v409_v3  ;;  %vm1504_vm5 = vcmask 146528  }
  0xaa   : > { %422 = vst.msk [vmem:[#allocation2 + $0x10] sm:$0x20] %vm421_vm6, %v409_v3  ;;  %vm1507_vm6 = vcmask 144480  }
  0xab   : > { %428 = vst.msk [vmem:[#allocation2 + $0x14] sm:$0x8] %vm423_vm3, %v409_v3  ;;  %v5263_v3 = vpack.c.bf16 %v602_v2, %v601_v1  ;;  %v1058_v1 = vld [vmem:[#allocation7 + $0x180] sm:$0xff]  ;;  %v5331_v2 = vpack.c.bf16 %v1056_v63, %v1055_v62  ;;  %vm1466_vm3 = vcmask 925840  }
  0xad   : > { %5264 = vmatprep.subr.bf16.mxu1 %v5263_v3 }
  0xae   : > { %v429_v4 = vld [vmem:[#allocation2] sm:$0xff]  ;;  %5266 = vmatpush3.bf16.msra.mxu1 %v5263_v3 }
  0xaf   : > { %435 = vrot.lane.b32.xlu1 %v429_v4, %s8014_s23  ;;  %v430_v6 = vld [vmem:[#allocation2 + $0x8] sm:$0xff] }
  0xb2   : > { %v431_v5 = vld [vmem:[#allocation2 + $0x10] sm:$0xff] }
  0xb3   : > { %439 = vrot.lane.b32.xlu0 %v431_v5, %s8014_s23  ;;  %437 = vrot.lane.b32.xlu1 %v430_v6, %s8014_s23  ;;  %v591_v6 = vld [vmem:[#allocation7 + $0x40] sm:$0xff] }
  0xb4   : > { %4955 = vmatprep.subr.mxu0 %v591_v6 }
  0xb5   : > { %4956 = vmatpush3.msra.mxu0 %v591_v6  ;;  %v1060_v6 = vld [vmem:[#allocation7 + $0x190] sm:$0xff] }
 0x121   : > { %v436_v7 = vpop.permute.xlu1 %435 }
 0x122   : > { %445 = vst.msk [vmem:[#allocation2] sm:$0xff] %vm444_vm7, %v436_v7  ;;  %v603_v7 = vld [vmem:[#allocation7 + $0x88] sm:$0xff] }
 0x123   : > { %4934 = vmatprep.subr.mxu1 %v603_v7 }
 0x124   : > { %4935 = vmatpush3.msra.mxu1 %v603_v7 }
 0x125   : > { %v440_v8 = vpop.permute.xlu0 %439  ;;  %v438_v9 = vpop.permute.xlu1 %437 }
 0x126   : > { %446 = vst.msk [vmem:[#allocation2 + $0x8] sm:$0xff] %vm444_vm7, %v438_v9  ;;  %447 = vst.msk [vmem:[#allocation2 + $0x10] sm:$0xff] %vm444_vm7, %v440_v8  ;;  %v770_v8 = vld [vmem:[#allocation7 + $0x90] sm:$0xff]  ;;  %v771_v9 = vld [vmem:[#allocation7 + $0x98] sm:$0xff]  ;;  %vm1524_vm7 = vcmask 982928  }
 0x129   : > { %v448_v10 = vld [vmem:[#allocation2] sm:$0xff] }
 0x12a   : > { %454 = vrot.lane.b32.xlu1 %v448_v10, %s6103_s24  ;;  %v5283_v10 = vpack.c.bf16 %v771_v9, %v770_v8  ;;  %v1061_v9 = vld [vmem:[#allocation7 + $0x198] sm:$0xff] }
 0x12c   : > { %5284 = vmatprep.subr.bf16.mxu0 %v5283_v10 }
 0x12d   : > { %v450_v11 = vld [vmem:[#allocation2 + $0x10] sm:$0xff]  ;;  %v449_v12 = vld [vmem:[#allocation2 + $0x8] sm:$0xff] }
 0x12e   : > { %458 = vrot.lane.b32.xlu1 %v450_v11, %s6103_s24  ;;  %456 = vrot.lane.b32.xlu0 %v449_v12, %s6103_s24 }
 0x19c   : > { %v455_v13 = vpop.permute.xlu1 %454 }
 0x19d   : > { %464 = vst.msk [vmem:[#allocation2] sm:$0xff] %vm463_vm8, %v455_v13 }
 0x1a0   : > { %v457_v14 = vpop.permute.xlu0 %456  ;;  %v459_v15 = vpop.permute.xlu1 %458 }
 0x1a1   : > { %465 = vst.msk [vmem:[#allocation2 + $0x8] sm:$0xff] %vm463_vm8, %v457_v14  ;;  %466 = vst.msk [vmem:[#allocation2 + $0x10] sm:$0xff] %vm463_vm8, %v459_v15  ;;  %vm1527_vm8 = vcmask 980880  }
 0x1a4   : > { %v467_v16 = vld [vmem:[#allocation2] sm:$0xff] }
 0x1a5   : > { %473 = vrot.lane.b32.xlu0 %v467_v16, %s6104_s25 }
 0x1a8   : > { %v468_v17 = vld [vmem:[#allocation2 + $0x8] sm:$0xff]  ;;  %v469_v18 = vld [vmem:[#allocation2 + $0x10] sm:$0xff] }
 0x1a9   : > { %475 = vrot.lane.b32.xlu1 %v468_v17, %s6104_s25  ;;  %477 = vrot.lane.b32.xlu0 %v469_v18, %s6104_s25  ;;  %v772_v18 = vld [vmem:[#allocation7 + $0xa0] sm:$0xff] }
 0x217   : > { %v474_v19 = vpop.permute.xlu0 %473 }
 0x218   : > { %483 = vst.msk [vmem:[#allocation2] sm:$0xff] %vm482_vm9, %v474_v19  ;;  %v773_v19 = vld [vmem:[#allocation7 + $0xa8] sm:$0xff] }
 0x21b   : > { %v478_v20 = vpop.permute.xlu0 %477  ;;  %v476_v21 = vpop.permute.xlu1 %475 }
 0x21c   : > { %485 = vst.msk [vmem:[#allocation2 + $0x10] sm:$0xff] %vm482_vm9, %v478_v20  ;;  %484 = vst.msk [vmem:[#allocation2 + $0x8] sm:$0xff] %vm482_vm9, %v476_v21  ;;  %v5287_v20 = vpack.c.bf16 %v773_v19, %v772_v18  ;;  %v774_v21 = vld [vmem:[#allocation7 + $0xb0] sm:$0xff]  ;;  %vm1544_vm9 = vcmask 97328  }
 0x21f   : > { %v486_v22 = vld [vmem:[#allocation2] sm:$0xff] }
 0x220   : > { %492 = vrot.lane.b32.xlu1 %v486_v22, %s8016_s22  ;;  %v775_v22 = vld [vmem:[#allocation7 + $0xb8] sm:$0xff] }
 0x223   : > { %v488_v23 = vld [vmem:[#allocation2 + $0x10] sm:$0xff]  ;;  %v487_v24 = vld [vmem:[#allocation2 + $0x8] sm:$0xff] }
 0x224   : > { %496 = vrot.lane.b32.xlu1 %v488_v23, %s8016_s22  ;;  %494 = vrot.lane.b32.xlu0 %v487_v24, %s8016_s22 }
 0x292   : > { %v493_v25 = vpop.permute.xlu1 %492 }
 0x293   : > { %502 = vst.msk [vmem:[#allocation2] sm:$0xff] %vm501_vm10, %v493_v25 }
 0x296   : > { %v495_v26 = vpop.permute.xlu0 %494  ;;  %v497_v27 = vpop.permute.xlu1 %496 }
 0x297   : > { %503 = vst.msk [vmem:[#allocation2 + $0x8] sm:$0xff] %vm501_vm10, %v495_v26  ;;  %504 = vst.msk [vmem:[#allocation2 + $0x10] sm:$0xff] %vm501_vm10, %v497_v27  ;;  %v5291_v27 = vpack.c.bf16 %v775_v22, %v774_v21  ;;  %v1155_v21 = vld [vmem:[#allocation7 + $0x1d8] sm:$0xff]  ;;  %vm1547_vm10 = vcmask 95280  }
 0x29a   : > { %v505_v28 = vld [vmem:[#allocation2] sm:$0xff] }
 0x29b   : > { %511 = vrot.lane.b32.xlu0 %v505_v28, %s6105_s26  ;;  %v776_v28 = vld [vmem:[#allocation7 + $0xc0] sm:$0xff] }
 0x29e   : > { %v506_v29 = vld [vmem:[#allocation2 + $0x8] sm:$0xff]  ;;  %v507_v30 = vld [vmem:[#allocation2 + $0x10] sm:$0xff] }
 0x29f   : > { %513 = vrot.lane.b32.xlu1 %v506_v29, %s6105_s26  ;;  %515 = vrot.lane.b32.xlu0 %v507_v30, %s6105_s26  ;;  %v777_v29 = vld [vmem:[#allocation7 + $0xc8] sm:$0xff] }
 0x2a0   : > { %v5295_v30 = vpack.c.bf16 %v777_v29, %v776_v28  ;;  %v1158_v28 = vld [vmem:[#allocation7 + $0x1f0] sm:$0xff]  ;;  %v1245_v29 = vld [vmem:[#allocation7 + $0x1f8] sm:$0xff] }
 0x30d   : > { %v512_v31 = vpop.permute.xlu0 %511 }
 0x30e   : > { %521 = vst.msk [vmem:[#allocation2] sm:$0xff] %vm520_vm11, %v512_v31  ;;  %v778_v31 = vld [vmem:[#allocation7 + $0xd0] sm:$0xff] }
 0x311   : > { %v516_v32 = vpop.permute.xlu0 %515  ;;  %v514_v33 = vpop.permute.xlu1 %513 }
 0x312   : > { %523 = vst.msk [vmem:[#allocation2 + $0x10] sm:$0xff] %vm520_vm11, %v516_v32  ;;  %522 = vst.msk [vmem:[#allocation2 + $0x8] sm:$0xff] %vm520_vm11, %v514_v33  ;;  %v865_v32 = vld [vmem:[#allocation7 + $0xd8] sm:$0xff]  ;;  %v866_v33 = vld [vmem:[#allocation7 + $0xe0] sm:$0xff]  ;;  %vm1564_vm11 = vcmask 1032128  }
 0x315   : > { %v524_v34 = vld [vmem:[#allocation2] sm:$0xff] }
 0x316   : > { %530 = vrot.lane.b32.xlu1 %v524_v34, %s6106_s27  ;;  %v867_v34 = vld [vmem:[#allocation7 + $0xe8] sm:$0xff] }
 0x319   : > { %v526_v35 = vld [vmem:[#allocation2 + $0x10] sm:$0xff]  ;;  %v525_v36 = vld [vmem:[#allocation2 + $0x8] sm:$0xff] }
 0x31a   : > { %534 = vrot.lane.b32.xlu1 %v526_v35, %s6106_s27  ;;  %532 = vrot.lane.b32.xlu0 %v525_v36, %s6106_s27  ;;  %v868_v35 = vld [vmem:[#allocation7 + $0xf0] sm:$0xff]  ;;  %v5299_v36 = vpack.c.bf16 %v866_v33, %v865_v32 }
 0x31b   : > { %v1248_v32 = vld [vmem:[#allocation7 + $0x210] sm:$0xff] }
 0x388   : > { %v531_v37 = vpop.permute.xlu1 %530 }
 0x389   : > { %540 = vst.msk [vmem:[#allocation2] sm:$0xff] %vm539_vm12, %v531_v37  ;;  %v5303_v37 = vpack.c.bf16 %v868_v35, %v867_v34 }
 0x38c   : > { %v533_v38 = vpop.permute.xlu0 %532  ;;  %v535_v39 = vpop.permute.xlu1 %534 }
 0x38d   : > { %541 = vst.msk [vmem:[#allocation2 + $0x8] sm:$0xff] %vm539_vm12, %v533_v38  ;;  %542 = vst.msk [vmem:[#allocation2 + $0x10] sm:$0xff] %vm539_vm12, %v535_v39  ;;  %v869_v39 = vld [vmem:[#allocation7 + $0xf8] sm:$0xff]  ;;  %vm1567_vm12 = vcmask 1030080  }
 0x390   : > { %v543_v40 = vld [vmem:[#allocation2] sm:$0xff] }
 0x391   : > { %549 = vrot.lane.b32.xlu0 %v543_v40, %s6107_s28  ;;  %v870_v40 = vld [vmem:[#allocation7 + $0x100] sm:$0xff] }
 0x392   : > { %v5307_v42 = vpack.c.bf16 %v870_v40, %v869_v39  ;;  %v1251_v40 = vld [vmem:[#allocation7 + $0x228] sm:$0xff] }
 0x394   : > { %v544_v53 = vld [vmem:[#allocation2 + $0x8] sm:$0xff]  ;;  %v545_v54 = vld [vmem:[#allocation2 + $0x10] sm:$0xff] }
 0x395   : > { %551 = vrot.lane.b32.xlu1 %v544_v53, %s6107_s28  ;;  %553 = vrot.lane.b32.xlu0 %v545_v54, %s6107_s28  ;;  %v964_v54 = vld [vmem:[#allocation7 + $0x140] sm:$0xff] }
 0x396   : > { %v5323_v57 = vpack.c.bf16 %v965_v55, %v964_v54  ;;  %v1346_v54 = vld [vmem:[#allocation7 + $0x270] sm:$0xff]  ;;  %v1347_v55 = vld [vmem:[#allocation7 + $0x278] sm:$0xff] }
 0x403   : > { %v550_v0 = vpop.permute.xlu0 %549 }
 0x404   : > { %559 = vst.msk [vmem:[#allocation2] sm:$0xff] %vm558_vm13, %v550_v0  ;;  %v1057_v0 = vld [vmem:[#allocation7 + $0x178] sm:$0xff] }
 0x405   : > { %v5335_v3 = vpack.c.bf16 %v1058_v1, %v1057_v0 }
 0x407   : > { %v554_v4 = vpop.permute.xlu0 %553  ;;  %v552_v5 = vpop.permute.xlu1 %551 }
 0x408   : > { %561 = vst.msk [vmem:[#allocation2 + $0x10] sm:$0xff] %vm558_vm13, %v554_v4  ;;  %560 = vst.msk [vmem:[#allocation2 + $0x8] sm:$0xff] %vm558_vm13, %v552_v5  ;;  %v1059_v5 = vld [vmem:[#allocation7 + $0x188] sm:$0xff] }
 0x409   : > { %v5339_v8 = vpack.c.bf16 %v1060_v6, %v1059_v5 }
 0x40b   : > { %v562_v11 = vld [vmem:[#allocation2] sm:$0xff] }
 0x40c   : > { %568 = vrot.lane.b32.xlu1 %v562_v11, %s6108_s29 }
 0x40f   : > { %v564_v12 = vld [vmem:[#allocation2 + $0x10] sm:$0xff]  ;;  %v563_v13 = vld [vmem:[#allocation2 + $0x8] sm:$0xff] }
 0x410   : > { %572 = vrot.lane.b32.xlu1 %v564_v12, %s6108_s29  ;;  %570 = vrot.lane.b32.xlu0 %v563_v13, %s6108_s29  ;;  %v1063_v12 = vld [vmem:[#allocation7 + $0x1a8] sm:$0xff]  ;;  %v1150_v13 = vld [vmem:[#allocation7 + $0x1b0] sm:$0xff] }
 0x47e   : > { %v569_v14 = vpop.permute.xlu1 %568 }
 0x47f   : > { %578 = vst.msk [vmem:[#allocation2] sm:$0xff] %vm577_vm14, %v569_v14  ;;  %v1151_v14 = vld [vmem:[#allocation7 + $0x1b8] sm:$0xff] }
 0x482   : > { %v571_v15 = vpop.permute.xlu0 %570  ;;  %v573_v16 = vpop.permute.xlu1 %572 }
 0x483   : > { %579 = vst.msk [vmem:[#allocation2 + $0x8] sm:$0xff] %vm577_vm14, %v571_v15  ;;  %580 = vst.msk [vmem:[#allocation2 + $0x10] sm:$0xff] %vm577_vm14, %v573_v16  ;;  %v1152_v15 = vld [vmem:[#allocation7 + $0x1c0] sm:$0xff]  ;;  %v1153_v16 = vld [vmem:[#allocation7 + $0x1c8] sm:$0xff]  ;;  %vm1584_vm14 = vcmask 48128  }
 0x484   : > { %v5351_v18 = vpack.c.bf16 %v1153_v16, %v1152_v15 }
 0x486   : > { %v581_v17 = vld [vmem:[#allocation2] sm:$0xff] }
 0x487   : > { %4957 = vmatprep.mubr.msk.f32.mxu0 %vm604_vm15, %v581_v17  ;;  %v5347_v17 = vpack.c.bf16 %v1151_v14, %v1150_v13 }
 0x48a   : > { %v592_v23 = vld [vmem:[#allocation2 + $0x1] sm:$0xff]  ;;  %v593_v25 = vld [vmem:[#allocation2 + $0x9] sm:$0xff] }
 0x48b   : > { %v6263_v24 = vld [vmem:[#allocation2 + $0x8] sm:$0xff]  ;;  %4936 = vmatprep.mubr.msk.f32.mxu1 %vm604_vm15, %v592_v23  ;;  %v1338_v58 = vld [vmem:[#allocation2 + $0x10] sm:$0xff] }
 0x48c   : > { %4958 = vmatmul.mubr.msk.f32.vlgmr.msra.gmra.mrb[0].mxu0 %vm604_vm15, %v6263_v24  ;;  %v767_v26 = vld [vmem:[#allocation2 + $0x2] sm:$0xff]  ;;  %4937 = vmatmul.mubr.msk.f32.vlgmr.msra.gmra.mrb[0].mxu1 %vm604_vm15, %v593_v25  ;;  %v768_v38 = vld [vmem:[#allocation2 + $0xa] sm:$0xff] }
 0x48d   : > { %5286 = vmatpush3.bf16.msra.mxu0 %v5283_v10  ;;  %4978 = vmatprep.mubr.msk.f32.mxu0 %vm604_vm15, %v767_v26  ;;  %v862_v41 = vld [vmem:[#allocation2 + $0x3] sm:$0xff]  ;;  %v863_v53 = vld [vmem:[#allocation2 + $0xb] sm:$0xff] }
 0x48e   : > { %5288 = vmatprep.subr.bf16.mxu0 %v5287_v20  ;;  %v957_v56 = vld [vmem:[#allocation2 + $0x4] sm:$0xff]  ;;  %v958_v4 = vld [vmem:[#allocation2 + $0xc] sm:$0xff] }
 0x48f   : > { %v1052_v7 = vld [vmem:[#allocation2 + $0x5] sm:$0xff]  ;;  %v1053_v19 = vld [vmem:[#allocation2 + $0xd] sm:$0xff] }
 0x490   : > { %v1062_v10 = vld [vmem:[#allocation7 + $0x1a0] sm:$0xff]  ;;  %v1157_v26 = vld [vmem:[#allocation7 + $0x1e8] sm:$0xff] }
 0x491   : > { %5290 = vmatpush3.bf16.msra.mxu0 %v5287_v20  ;;  %v5343_v11 = vpack.c.bf16 %v1062_v10, %v1061_v9  ;;  %v1154_v20 = vld [vmem:[#allocation7 + $0x1d0] sm:$0xff]  ;;  %v1147_v22 = vld [vmem:[#allocation2 + $0x6] sm:$0xff]  ;;  %v1148_v35 = vld [vmem:[#allocation2 + $0xe] sm:$0xff] }
 0x492   : > { %5292 = vmatprep.subr.bf16.mxu0 %v5291_v27  ;;  %v5355_v23 = vpack.c.bf16 %v1155_v21, %v1154_v20  ;;  %v1156_v25 = vld [vmem:[#allocation7 + $0x1e0] sm:$0xff] }
 0x493   : > { %v1243_v50 = vld [vmem:[#allocation2 + $0xf] sm:$0xff] }
 0x495   : > { %5294 = vmatpush3.bf16.msra.mxu0 %v5291_v27  ;;  %v5359_v27 = vpack.c.bf16 %v1157_v26, %v1156_v25 }
 0x496   : > { %5296 = vmatprep.subr.bf16.mxu0 %v5295_v30 }
 0x499   : > { %5298 = vmatpush3.bf16.msra.mxu0 %v5295_v30  ;;  %v1246_v30 = vld [vmem:[#allocation7 + $0x200] sm:$0xff] }
 0x49a   : > { %4976 = vmatprep.subr.mxu0 %v778_v31  ;;  %v5363_v33 = vpack.c.bf16 %v1246_v30, %v1245_v29 }
 0x49d   : > { %4977 = vmatpush3.msra.mxu0 %v778_v31  ;;  %v1247_v31 = vld [vmem:[#allocation7 + $0x208] sm:$0xff] }
 0x49e   : > { %4979 = vmatmul.mubr.msk.f32.vlgmr.msra.gmra.mrb[0].mxu0 %vm604_vm15, %v768_v38  ;;  %5300 = vmatprep.subr.bf16.mxu0 %v5299_v36  ;;  %v5367_v34 = vpack.c.bf16 %v1248_v32, %v1247_v31  ;;  %v1242_v38 = vld [vmem:[#allocation2 + $0x7] sm:$0xff] }
 0x49f   : > { %5302 = vmatpush3.bf16.msra.mxu0 %v5299_v36  ;;  %4999 = vmatprep.mubr.msk.f32.mxu0 %vm604_vm15, %v862_v41  ;;  %v1249_v36 = vld [vmem:[#allocation7 + $0x218] sm:$0xff]  ;;  %v1252_v41 = vld [vmem:[#allocation7 + $0x230] sm:$0xff] }
 0x4a0   : > { %5304 = vmatprep.subr.bf16.mxu0 %v5303_v37 }
 0x4a3   : > { %5306 = vmatpush3.bf16.msra.mxu0 %v5303_v37  ;;  %v1250_v37 = vld [vmem:[#allocation7 + $0x220] sm:$0xff] }
 0x4a4   : > { %5308 = vmatprep.subr.bf16.mxu0 %v5307_v42  ;;  %v5371_v39 = vpack.c.bf16 %v1250_v37, %v1249_v36 }
 0x4a7   : > { %5310 = vmatpush3.bf16.msra.mxu0 %v5307_v42  ;;  %v5375_v42 = vpack.c.bf16 %v1252_v41, %v1251_v40 }
 0x4a8   : > { %5312 = vmatprep.subr.bf16.mxu0 %v5311_v45 }
 0x4ab   : > { %5314 = vmatpush3.bf16.msra.mxu0 %v5311_v45  ;;  %v1341_v45 = vld [vmem:[#allocation7 + $0x248] sm:$0xff] }
 0x4ac   : > { %4997 = vmatprep.subr.mxu0 %v873_v46  ;;  %v5379_v48 = vpack.c.bf16 %v1341_v45, %v1340_v44 }
 0x4af   : > { %4998 = vmatpush3.msra.mxu0 %v873_v46  ;;  %v1342_v46 = vld [vmem:[#allocation7 + $0x250] sm:$0xff] }
 0x4b0   : > { %5000 = vmatmul.mubr.msk.f32.vlgmr.msra.gmra.mrb[0].mxu0 %vm604_vm15, %v863_v53  ;;  %5316 = vmatprep.subr.bf16.mxu0 %v5315_v51  ;;  %v5383_v49 = vpack.c.bf16 %v1343_v47, %v1342_v46  ;;  %v4316_v46 = vld [vmem:[%s8002_s3 + $0x118] sm:$0xff]  ;;  %v4318_v47 = vld [vmem:[%s8002_s3 + $0x128] sm:$0xff] }
 0x4b1   : > { %5318 = vmatpush3.bf16.msra.mxu0 %v5315_v51  ;;  %5020 = vmatprep.mubr.msk.f32.mxu0 %vm604_vm15, %v957_v56  ;;  %v1344_v51 = vld [vmem:[#allocation7 + $0x260] sm:$0xff]  ;;  %v5391_v56 = vpack.c.bf16 %v1347_v55, %v1346_v54  ;;  %v4319_v55 = vld [vmem:[%s8002_s3 + $0x130] sm:$0xff] }
 0x4b2   : > { %5320 = vmatprep.subr.bf16.mxu0 %v5319_v52 }
 0x4b5   : > { %5322 = vmatpush3.bf16.msra.mxu0 %v5319_v52  ;;  %v1345_v52 = vld [vmem:[#allocation7 + $0x268] sm:$0xff] }
 0x4b6   : > { %5324 = vmatprep.subr.bf16.mxu0 %v5323_v57  ;;  %v5387_v53 = vpack.c.bf16 %v1345_v52, %v1344_v51  ;;  %v4320_v51 = vld [vmem:[%s8002_s3 + $0x138] sm:$0xff]  ;;  %v4322_v52 = vld [vmem:[%s8002_s3 + $0x148] sm:$0xff] }
 0x4b7   : > { %v5399_v54 = vpack.c.bf16 %v4322_v52, %v4320_v51  ;;  %v1625_v52 = vld [vmem:[%s8002_s3 + $0x38] sm:$0xff] }
 0x4b9   : > { %5326 = vmatpush3.bf16.msra.mxu0 %v5323_v57  ;;  %v1348_v57 = vld [vmem:[#allocation7 + $0x280] sm:$0xff] }
 0x4ba   : > { %5328 = vmatprep.subr.bf16.mxu0 %v5327_v60 }
 0x4bd   : > { %5330 = vmatpush3.bf16.msra.mxu0 %v5327_v60 }
 0x4be   : > { %5018 = vmatprep.subr.mxu0 %v968_v61 }
 0x4c1   : > { %5019 = vmatpush3.msra.mxu0 %v968_v61 }
 0x4c2   : > { %5021 = vmatmul.mubr.msk.f32.vlgmr.msra.gmra.mrb[0].mxu0 %vm604_vm15, %v958_v4  ;;  %5332 = vmatprep.subr.bf16.mxu0 %v5331_v2 }
 0x4c3   : > { %5334 = vmatpush3.bf16.msra.mxu0 %v5331_v2  ;;  %5041 = vmatprep.mubr.msk.f32.mxu0 %vm604_vm15, %v1052_v7 }
 0x4c4   : > { %5336 = vmatprep.subr.bf16.mxu0 %v5335_v3 }
 0x4c7   : > { %5338 = vmatpush3.bf16.msra.mxu0 %v5335_v3 }
 0x4c8   : > { %5340 = vmatprep.subr.bf16.mxu0 %v5339_v8 }
 0x4cb   : > { %5342 = vmatpush3.bf16.msra.mxu0 %v5339_v8 }
 0x4cc   : > { %5344 = vmatprep.subr.bf16.mxu0 %v5343_v11 }
 0x4cf   : > { %5346 = vmatpush3.bf16.msra.mxu0 %v5343_v11 }
 0x4d0   : > { %5039 = vmatprep.subr.mxu0 %v1063_v12 }
 0x4d3   : > { %5040 = vmatpush3.msra.mxu0 %v1063_v12 }
 0x4d4   : > { %5042 = vmatmul.mubr.msk.f32.vlgmr.msra.gmra.mrb[0].mxu0 %vm604_vm15, %v1053_v19  ;;  %5348 = vmatprep.subr.bf16.mxu0 %v5347_v17 }
 0x4d5   : > { %5350 = vmatpush3.bf16.msra.mxu0 %v5347_v17  ;;  %5062 = vmatprep.mubr.msk.f32.mxu0 %vm604_vm15, %v1147_v22 }
 0x4d6   : > { %5352 = vmatprep.subr.bf16.mxu0 %v5351_v18 }
 0x4d9   : > { %5354 = vmatpush3.bf16.msra.mxu0 %v5351_v18 }
 0x4da   : > { %5356 = vmatprep.subr.bf16.mxu0 %v5355_v23 }
 0x4dd   : > { %5358 = vmatpush3.bf16.msra.mxu0 %v5355_v23 }
 0x4de   : > { %5360 = vmatprep.subr.bf16.mxu0 %v5359_v27 }
 0x4e1   : > { %5362 = vmatpush3.bf16.msra.mxu0 %v5359_v27 }
 0x4e2   : > { %5060 = vmatprep.subr.mxu0 %v1158_v28 }
 0x4e5   : > { %5061 = vmatpush3.msra.mxu0 %v1158_v28 }
 0x4e6   : > { %5063 = vmatmul.mubr.msk.f32.vlgmr.msra.gmra.mrb[0].mxu0 %vm604_vm15, %v1148_v35  ;;  %5364 = vmatprep.subr.bf16.mxu0 %v5363_v33 }
 0x4e7   : > { %5366 = vmatpush3.bf16.msra.mxu0 %v5363_v33  ;;  %5083 = vmatprep.mubr.msk.f32.mxu0 %vm604_vm15, %v1242_v38 }
 0x4e8   : > { %5368 = vmatprep.subr.bf16.mxu0 %v5367_v34 }
 0x4eb   : > { %5370 = vmatpush3.bf16.msra.mxu0 %v5367_v34 }
 0x4ec   : > { %5372 = vmatprep.subr.bf16.mxu0 %v5371_v39 }
 0x4ef   : > { %5374 = vmatpush3.bf16.msra.mxu0 %v5371_v39 }
 0x4f0   : > { %5376 = vmatprep.subr.bf16.mxu0 %v5375_v42 }
 0x4f3   : > { %5378 = vmatpush3.bf16.msra.mxu0 %v5375_v42 }
 0x4f4   : > { %5081 = vmatprep.subr.mxu0 %v1253_v43 }
 0x4f7   : > { %5082 = vmatpush3.msra.mxu0 %v1253_v43 }
 0x4f8   : > { %5084 = vmatmul.mubr.msk.f32.vlgmr.msra.gmra.mrb[0].mxu0 %vm604_vm15, %v1243_v50  ;;  %5380 = vmatprep.subr.bf16.mxu0 %v5379_v48  ;;  %v4317_v50 = vld [vmem:[%s8002_s3 + $0x120] sm:$0xff] }
 0x4f9   : > { %5382 = vmatpush3.bf16.msra.mxu0 %v5379_v48  ;;  %5104 = vmatprep.mubr.msk.f32.mxu0 %vm604_vm15, %v6263_v24  ;;  %v4314_v24 = vld [vmem:[%s8001_s2] ss:$0 sm:$0xff]  ;;  %v4315_v48 = vld [vmem:[%s8002_s3 + $0x110] sm:$0xff] }
 0x4fa   : > { %5384 = vmatprep.subr.bf16.mxu0 %v5383_v49 }
 0x4fd   : > { %5386 = vmatpush3.bf16.msra.mxu0 %v5383_v49  ;;  %v5395_v49 = vpack.c.bf16 %v4318_v47, %v4316_v46  ;;  %v1618_v47 = vld [vmem:[%s8002_s3] sm:$0xff] }
 0x4fe   : > { %5388 = vmatprep.subr.bf16.mxu0 %v5387_v53 }
 0x4ff   : > { %5396 = vmatprep.subr.bf16.mxu1 %v5395_v49  ;;  %v1623_v49 = vld [vmem:[%s8002_s3 + $0x28] sm:$0xff] }
 0x501   : > { %5390 = vmatpush3.bf16.msra.mxu0 %v5387_v53  ;;  %v5397_v53 = vpack.c.bf16 %v4317_v50, %v4315_v48  ;;  %v1620_v48 = vld [vmem:[%s8002_s3 + $0x10] sm:$0xff] }
 0x502   : > { %5392 = vmatprep.subr.bf16.mxu0 %v5391_v56 }
 0x503   : > { %5398 = vmatpush1.bf16.msra.mxu1 %v5397_v53 }
 0x504   : > { %5400 = vmatprep.subr.bf16.mxu1 %v5399_v54 }
 0x505   : > { %5394 = vmatpush3.bf16.msra.mxu0 %v5391_v56  ;;  %v4321_v56 = vld [vmem:[%s8002_s3 + $0x140] sm:$0xff] }
 0x506   : > { %5102 = vmatprep.subr.mxu0 %v1348_v57 }
 0x509   : > { %5103 = vmatpush3.msra.mxu0 %v1348_v57  ;;  %v4324_v57 = vld [vmem:[%s8002_s3 + $0x158] sm:$0xff] }
 0x50a   : > { %5105 = vmatmul.mubr.msk.f32.vlgmr.msra.gmra.mrb[0].mxu0 %vm604_vm15, %v1338_v58  ;;  %v4326_v58 = vld [vmem:[%s8002_s3 + $0x168] sm:$0xff]  ;;  %vm1587_vm15 = vcmask 46080  }
 0x55f   : > { %v4938_v59 = vpop.f32.mrb[0].mxu1 }
 0x560   : > { %v677_v60 = vpop.f32.mrb[1].mxu1 }
 0x5dd   : > { %v5106_v61 = vpop.f32.mrb[0].mxu0 }
 0x5de   : > { %v5970_v62 = vadd.f32 %v5106_v61, %v4938_v59  ;;  %v1421_v63 = vpop.f32.mrb[1].mxu0  ;;  %v5403_v61 = vpack.c.bf16 %v4326_v58, %v4324_v57  ;;  %v5429_v57 = vpack.c.bf16 %v1620_v48, %v1618_v47  ;;  %v4360_v47 = vld [vmem:[%s8002_s3 + $0x238] sm:$0xff]  ;;  %v4357_v48 = vld [vmem:[%s8002_s3 + $0x220] sm:$0xff] }
 0x5df   : > { %v5971_v0 = vadd.f32 %v1421_v63, %v677_v60  ;;  %v5401_v60 = vpack.c.bf16 %v4321_v56, %v4319_v55  ;;  %v4328_v63 = vld [vmem:[%s8002_s3 + $0x178] sm:$0xff] }
 0x5e0   : > { %v1440_v1 = vadd.f32 %v5970_v62, %v4314_v24  ;;  %v4325_v62 = vld [vmem:[%s8002_s3 + $0x160] sm:$0xff] }
 0x5e1   : > { %v1439_v2 = vadd.f32 %v5971_v0, %v4314_v24  ;;  %v4323_v24 = vld [vmem:[%s8002_s3 + $0x150] sm:$0xff]  ;;  %v4330_v0 = vld [vmem:[%s8002_s3 + $0x188] sm:$0xff]  ;;  %5402 = vmatpush1.bf16.msra.mxu1 %v5401_v60  ;;  %v5431_v60 = vpack.c.bf16 %v1625_v52, %v1623_v49  ;;  %v1650_v52 = vld [vmem:[%s8002_s3 + $0x100] sm:$0xf] }
 0x5e2   : > { %v1445_v3 = vrot.slane %v1440_v1, 5  ;;  %v1468_v9 = vrot.slane %v1440_v1, 6  ;;  %v1484_v10 = vrot.slane %v1440_v1, 4  ;;  %v5405_v1 = vpack.c.bf16 %v4325_v62, %v4323_v24  ;;  %5404 = vmatprep.subr.bf16.mxu1 %v5403_v61  ;;  %v1622_v61 = vld [vmem:[%s8002_s3 + $0x20] sm:$0xff]  ;;  %v1624_v24 = vld [vmem:[%s8002_s3 + $0x30] sm:$0xff]  ;;  %v1627_v62 = vld [vmem:[%s8002_s3 + $0x48] sm:$0xff] }
 0x5e3   : > { %v1444_v4 = vrot.slane %v1439_v2, 5  ;;  %v1462_v6 = vrot.slane %v1439_v2, 1  ;;  %v1473_v7 = vrot.slane %v1439_v2, 2  ;;  %v1479_v8 = vrot.slane %v1439_v2, 3  ;;  %v4359_v49 = vld [vmem:[%s8002_s3 + $0x230] sm:$0xff] }
 0x5e4   : > { %v5407_v2 = vpack.c.bf16 %v4330_v0, %v4328_v63  ;;  %v1629_v63 = vld [vmem:[%s8002_s3 + $0x58] sm:$0xff] }
 0x5e5   : > { %1447 = vrot.lane.b32.xlu0 %v1444_v4, %s6106_s27  ;;  %v1446_v5 = vsel %vm1443_vm0, %v1444_v4, %v1445_v3  ;;  %v4329_v4 = vld [vmem:[%s8002_s3 + $0x180] sm:$0xff]  ;;  %5406 = vmatpush1.bf16.msra.mxu1 %v5405_v1 }
 0x5e6   : > { %1449 = vrot.lane.b32.xlu1 %v1446_v5, %s6106_s27  ;;  %5408 = vmatprep.subr.bf16.mxu1 %v5407_v2 }
 0x5e9   : > { %1463 = vrot.lane.b32.xlu0 %v1462_v6, %s6106_s27  ;;  %v4332_v6 = vld [vmem:[%s8002_s3 + $0x198] sm:$0xff] }
 0x5ea   : > { %1474 = vrot.lane.b32.xlu1 %v1473_v7, %s6106_s27  ;;  %v4334_v7 = vld [vmem:[%s8002_s3 + $0x1a8] sm:$0xff] }
 0x5ed   : > { %1480 = vrot.lane.b32.xlu0 %v1479_v8, %s6106_s27  ;;  %v4331_v8 = vld [vmem:[%s8002_s3 + $0x190] sm:$0xff] }
 0x5ee   : > { %1451 = vrot.lane.b32.xlu1 %v1445_v3, %s6106_s27  ;;  %v4327_v3 = vld [vmem:[%s8002_s3 + $0x170] sm:$0xff] }
 0x5ef   : > { %v5409_v5 = vpack.c.bf16 %v4329_v4, %v4327_v3  ;;  %v5433_v3 = vpack.c.bf16 %v1624_v24, %v1622_v61  ;;  %v4368_v61 = vld [vmem:[%s8002_s3 + $0x278] sm:$0xff] }
 0x5f1   : > { %1469 = vrot.lane.b32.xlu0 %v1468_v9, %s6106_s27  ;;  %5410 = vmatpush1.bf16.msra.mxu1 %v5409_v5  ;;  %v5411_v9 = vpack.c.bf16 %v4334_v7, %v4332_v6  ;;  %v5435_v5 = vpack.c.bf16 %v1629_v63, %v1627_v62  ;;  %v1626_v6 = vld [vmem:[%s8002_s3 + $0x40] sm:$0xff]  ;;  %v1628_v7 = vld [vmem:[%s8002_s3 + $0x50] sm:$0xff] }
 0x5f2   : > { %1485 = vrot.lane.b32.xlu1 %v1484_v10, %s6106_s27  ;;  %v4333_v10 = vld [vmem:[%s8002_s3 + $0x1a0] sm:$0xff] }
 0x5f3   : > { %5412 = vmatprep.subr.bf16.mxu1 %v5411_v9 }
 0x657   : > { %v1448_v11 = vpop.permute.xlu0 %1447 }
 0x658   : > { %1457 = vst.msk [vmem:[#allocation3] sm:$0xf8] %vm1456_vm1, %v1448_v11  ;;  %v1450_v12 = vpop.permute.xlu1 %1449  ;;  %v4336_v11 = vld [vmem:[%s8002_s3 + $0x1b8] sm:$0xff]  ;;  %vm1714_vm1 = vcmask 1043456  }
 0x659   : > { %1459 = vst.msk [vmem:[#allocation3 + $0x10] sm:$0xff] %vm1458_vm2, %v1450_v12  ;;  %v4338_v12 = vld [vmem:[%s8002_s3 + $0x1c8] sm:$0xff]  ;;  %vm1604_vm2 = vcmask 1048560  }
 0x65b   : > { %v1464_v13 = vpop.permute.xlu0 %1463 }
 0x65c   : > { %1467 = vst.msk [vmem:[#allocation3 + $0x2] sm:$0x1] %vm1466_vm3, %v1464_v13  ;;  %v1475_v14 = vpop.permute.xlu1 %1474  ;;  %v5413_v13 = vpack.c.bf16 %v4333_v10, %v4331_v8  ;;  %v1631_v10 = vld [vmem:[%s8002_s3 + $0x68] sm:$0xff] }
 0x65d   : > { %1477 = vst.msk [vmem:[#allocation3 + $0x1] sm:$0x1] %vm1466_vm3, %v1475_v14  ;;  %v5415_v14 = vpack.c.bf16 %v4338_v12, %v4336_v11  ;;  %v1633_v11 = vld [vmem:[%s8002_s3 + $0x78] sm:$0xff]  ;;  %v5437_v12 = vpack.c.bf16 %v1628_v7, %v1626_v6 }
 0x65e   : > { %5414 = vmatpush1.bf16.msra.mxu1 %v5413_v13 }
 0x65f   : > { %v1481_v15 = vpop.permute.xlu0 %1480  ;;  %5416 = vmatprep.subr.bf16.mxu1 %v5415_v14  ;;  %v5439_v14 = vpack.c.bf16 %v1633_v11, %v1631_v10  ;;  %v4374_v10 = vld [vmem:[%s8002_s3 + $0x2a8] sm:$0xff]  ;;  %v4376_v11 = vld [vmem:[%s8002_s3 + $0x2b8] sm:$0xff] }
 0x660   : > { %1483 = vst.msk [vmem:[#allocation3] sm:$0x1] %vm1466_vm3, %v1481_v15  ;;  %v1452_v16 = vpop.permute.xlu1 %1451  ;;  %v1490_v17 = vld [vmem:[#allocation3 + $0x10] sm:$0xff]  ;;  %v4335_v15 = vld [vmem:[%s8002_s3 + $0x1b0] sm:$0xff] }
 0x661   : > { %1461 = vst.msk [vmem:[#allocation3 + $0x20] sm:$0x7] %vm1460_vm4, %v1452_v16  ;;  %1497 = vrot.lane.b32.xlu1 %v1490_v17, %s6104_s25  ;;  %vm1610_vm4 = vcmask 1046512  }
 0x662   : > { %1478 = vst.msk [vmem:[#allocation3 + $0x24] sm:$0x1] %vm1466_vm3, %v1452_v16  ;;  %v4337_v16 = vld [vmem:[%s8002_s3 + $0x1c0] sm:$0xff] }
 0x663   : > { %v1470_v18 = vpop.permute.xlu0 %1469 }
 0x664   : > { %1472 = vst.msk [vmem:[#allocation3 + $0x23] sm:$0x1] %vm1466_vm3, %v1470_v18  ;;  %v1486_v19 = vpop.permute.xlu1 %1485  ;;  %v5417_v18 = vpack.c.bf16 %v4337_v16, %v4335_v15  ;;  %v1630_v15 = vld [vmem:[%s8002_s3 + $0x60] sm:$0xff]  ;;  %v1632_v16 = vld [vmem:[%s8002_s3 + $0x70] sm:$0xff] }
 0x665   : > { %1488 = vst.msk [vmem:[#allocation3 + $0x25] sm:$0x1] %vm1466_vm3, %v1486_v19  ;;  %v4340_v19 = vld [vmem:[%s8002_s3 + $0x1d8] sm:$0xff]  ;;  %vm1606_vm3 = vcmask 31744  }
 0x666   : > { %5418 = vmatpush1.bf16.msra.mxu1 %v5417_v18  ;;  %v1637_v18 = vld [vmem:[%s8002_s3 + $0x98] sm:$0xff] }
 0x667   : > { %v1489_v20 = vld [vmem:[#allocation3] sm:$0xff] }
 0x668   : > { %1495 = vrot.lane.b32.xlu0 %v1489_v20, %s6104_s25  ;;  %v4342_v20 = vld [vmem:[%s8002_s3 + $0x1e8] sm:$0xff] }
 0x66c   : > { %v1491_v21 = vld [vmem:[#allocation3 + $0x20] sm:$0x3f] }
 0x66d   : > { %1499 = vrot.lane.b32.xlu0 %v1491_v21, %s6104_s25  ;;  %v4339_v21 = vld [vmem:[%s8002_s3 + $0x1d0] sm:$0xff] }
 0x6d3   : > { %v1498_v22 = vpop.permute.xlu1 %1497 }
 0x6d4   : > { %1506 = vst.msk [vmem:[#allocation3 + $0x10] sm:$0xff] %vm1504_vm5, %v1498_v22  ;;  %v5419_v22 = vpack.c.bf16 %v4342_v20, %v4340_v19  ;;  %v5441_v19 = vpack.c.bf16 %v1632_v16, %v1630_v15  ;;  %v4375_v15 = vld [vmem:[%s8002_s3 + $0x2b0] sm:$0xff]  ;;  %v4378_v16 = vld [vmem:[%s8002_s3 + $0x2c8] sm:$0xff] }
 0x6d6   : > { %5420 = vmatprep.subr.bf16.mxu1 %v5419_v22  ;;  %v1636_v22 = vld [vmem:[%s8002_s3 + $0x90] sm:$0xff] }
 0x6da   : > { %v1496_v23 = vpop.permute.xlu0 %1495 }
 0x6db   : > { %1505 = vst.msk [vmem:[#allocation3] sm:$0xff] %vm1504_vm5, %v1496_v23  ;;  %v1510_v25 = vld [vmem:[#allocation3 + $0x10] sm:$0xff]  ;;  %v4341_v23 = vld [vmem:[%s8002_s3 + $0x1e0] sm:$0xff]  ;;  %vm1612_vm5 = vcmask 29696  }
 0x6dc   : > { %1517 = vrot.lane.b32.xlu0 %v1510_v25, %s8016_s22  ;;  %v5421_v25 = vpack.c.bf16 %v4341_v23, %v4339_v21  ;;  %v1634_v21 = vld [vmem:[%s8002_s3 + $0x80] sm:$0xff]  ;;  %v1639_v23 = vld [vmem:[%s8002_s3 + $0xa8] sm:$0xff] }
 0x6de   : > { %5422 = vmatpush1.bf16.msra.mxu1 %v5421_v25  ;;  %v1641_v25 = vld [vmem:[%s8002_s3 + $0xb8] sm:$0xff] }
 0x6df   : > { %v1500_v26 = vpop.permute.xlu0 %1499 }
 0x6e0   : > { %1508 = vst.msk [vmem:[#allocation3 + $0x20] sm:$0x3f] %vm1507_vm6, %v1500_v26  ;;  %vm1697_vm6 = vcmask 1046528  }
 0x6e2   : > { %v1509_v27 = vld [vmem:[#allocation3] sm:$0xff] }
 0x6e3   : > { %1515 = vrot.lane.b32.xlu1 %v1509_v27, %s8016_s22 }
 0x6e7   : > { %v1511_v28 = vld [vmem:[#allocation3 + $0x20] sm:$0x3f] }
 0x6e8   : > { %1519 = vrot.lane.b32.xlu1 %v1511_v28, %s8016_s22  ;;  %v4344_v28 = vld [vmem:[%s8002_s3 + $0x1f8] sm:$0xff] }
 0x74e   : > { %v1518_v29 = vpop.permute.xlu0 %1517 }
 0x74f   : > { %1526 = vst.msk [vmem:[#allocation3 + $0x10] sm:$0xff] %vm1524_vm7, %v1518_v29  ;;  %v4346_v29 = vld [vmem:[%s8002_s3 + $0x208] sm:$0xff] }
 0x755   : > { %v1516_v30 = vpop.permute.xlu1 %1515 }
 0x756   : > { %1525 = vst.msk [vmem:[#allocation3] sm:$0xff] %vm1524_vm7, %v1516_v30  ;;  %v1530_v31 = vld [vmem:[#allocation3 + $0x10] sm:$0xff]  ;;  %v5423_v30 = vpack.c.bf16 %v4346_v29, %v4344_v28  ;;  %v1638_v28 = vld [vmem:[%s8002_s3 + $0xa0] sm:$0xff]  ;;  %v1640_v29 = vld [vmem:[%s8002_s3 + $0xb0] sm:$0xff]  ;;  %vm1929_vm7 = vcmask 1045504  }
 0x757   : > { %1537 = vrot.lane.b32.xlu1 %v1530_v31, %s6107_s28  ;;  %v4343_v31 = vld [vmem:[%s8002_s3 + $0x1f0] sm:$0xff] }
 0x758   : > { %5424 = vmatprep.subr.bf16.mxu1 %v5423_v30  ;;  %v1643_v30 = vld [vmem:[%s8002_s3 + $0xc8] sm:$0xff] }
 0x75a   : > { %v1520_v32 = vpop.permute.xlu1 %1519 }
 0x75b   : > { %1528 = vst.msk [vmem:[#allocation3 + $0x20] sm:$0x3f] %vm1527_vm8, %v1520_v32  ;;  %v4345_v32 = vld [vmem:[%s8002_s3 + $0x200] sm:$0xff]  ;;  %vm2076_vm8 = vcmask 1044480  }
 0x75d   : > { %v1529_v33 = vld [vmem:[#allocation3] sm:$0xff] }
 0x75e   : > { %1535 = vrot.lane.b32.xlu0 %v1529_v33, %s6107_s28  ;;  %v5425_v33 = vpack.c.bf16 %v4345_v32, %v4343_v31  ;;  %v1645_v31 = vld [vmem:[%s8002_s3 + $0xd8] sm:$0xff]  ;;  %v5449_v32 = vpack.c.bf16 %v1640_v29, %v1638_v28  ;;  %v4383_v28 = vld [vmem:[%s8002_s3 + $0x2f0] sm:$0xff]  ;;  %v4386_v29 = vld [vmem:[%s8002_s3 + $0x308] sm:$0xff] }
 0x760   : > { %5426 = vmatpush1.bf16.msra.mxu1 %v5425_v33  ;;  %v5451_v33 = vpack.c.bf16 %v1645_v31, %v1643_v30  ;;  %v4388_v30 = vld [vmem:[%s8002_s3 + $0x318] sm:$0xff] }
 0x762   : > { %v1531_v34 = vld [vmem:[#allocation3 + $0x20] sm:$0x3f] }
 0x763   : > { %1539 = vrot.lane.b32.xlu0 %v1531_v34, %s6107_s28  ;;  %v4348_v34 = vld [vmem:[%s8002_s3 + $0x218] sm:$0xf] }
 0x764   : > { %4349 = vmatprep.subr.msk.mxu1 %vm1714_vm1, %v4348_v34  ;;  %v1642_v34 = vld [vmem:[%s8002_s3 + $0xc0] sm:$0xff] }
 0x7c9   : > { %v1538_v35 = vpop.permute.xlu1 %1537 }
 0x7ca   : > { %1546 = vst.msk [vmem:[#allocation3 + $0x10] sm:$0xff] %vm1544_vm9, %v1538_v35 }
 0x7d0   : > { %v1536_v36 = vpop.permute.xlu0 %1535 }
 0x7d1   : > { %1545 = vst.msk [vmem:[#allocation3] sm:$0xff] %vm1544_vm9, %v1536_v36  ;;  %v1550_v37 = vld [vmem:[#allocation3 + $0x10] sm:$0xff]  ;;  %v4347_v36 = vld [vmem:[%s8002_s3 + $0x210] sm:$0xf]  ;;  %vm2515_vm9 = vcmask 1041408  }
 0x7d2   : > { %1557 = vrot.lane.b32.xlu0 %v1550_v37, %s6108_s29  ;;  %v1619_v37 = vld [vmem:[%s8002_s3 + $0x8] sm:$0xff]  ;;  %4350 = vmatpush1.msk.msra.mxu1 %vm1714_vm1, %v4347_v36 }
 0x7d3   : > { %v1647_v36 = vld [vmem:[%s8002_s3 + $0xe8] sm:$0xff] }
 0x7d5   : > { %v1540_v38 = vpop.permute.xlu0 %1539 }
 0x7d6   : > { %1548 = vst.msk [vmem:[#allocation3 + $0x20] sm:$0x3f] %vm1547_vm10, %v1540_v38  ;;  %v1621_v38 = vld [vmem:[%s8002_s3 + $0x18] sm:$0xff]  ;;  %vm2657_vm10 = vcmask 195584  }
 0x7d8   : > { %v1549_v39 = vld [vmem:[#allocation3] sm:$0xff] }
 0x7d9   : > { %1555 = vrot.lane.b32.xlu1 %v1549_v39, %s6108_s29 }
 0x7dd   : > { %v1551_v40 = vld [vmem:[#allocation3 + $0x20] sm:$0x3f] }
 0x7de   : > { %1559 = vrot.lane.b32.xlu1 %v1551_v40, %s6108_s29  ;;  %v5427_v40 = vpack.c.bf16 %v1621_v38, %v1619_v37  ;;  %v1649_v37 = vld [vmem:[%s8002_s3 + $0xf8] sm:$0xff] }
 0x7e0   : > { %5428 = vmatprep.subr.bf16.mxu1 %v5427_v40  ;;  %v1646_v40 = vld [vmem:[%s8002_s3 + $0xe0] sm:$0xff] }
 0x844   : > { %v1558_v41 = vpop.permute.xlu0 %1557 }
 0x845   : > { %1566 = vst.msk [vmem:[#allocation3 + $0x10] sm:$0xff] %vm1564_vm11, %v1558_v41 }
 0x84b   : > { %v1556_v42 = vpop.permute.xlu1 %1555 }
 0x84c   : > { %1565 = vst.msk [vmem:[#allocation3] sm:$0xff] %vm1564_vm11, %v1556_v42  ;;  %v1570_v43 = vld [vmem:[#allocation3 + $0x10] sm:$0xff]  ;;  %vm2669_vm11 = vcmask 719874  }
 0x84d   : > { %1577 = vrot.lane.b32.xlu1 %v1570_v43, %s6109_s13 }
 0x850   : > { %v1560_v44 = vpop.permute.xlu1 %1559 }
 0x851   : > { %1568 = vst.msk [vmem:[#allocation3 + $0x20] sm:$0x3f] %vm1567_vm12, %v1560_v44 }
 0x853   : > { %v1569_v45 = vld [vmem:[#allocation3] sm:$0xff] }
 0x854   : > { %1575 = vrot.lane.b32.xlu0 %v1569_v45, %s6109_s13 }
 0x858   : > { %v1571_v59 = vld [vmem:[#allocation3 + $0x20] sm:$0x3f] }
 0x859   : > { %1579 = vrot.lane.b32.xlu0 %v1571_v59, %s6109_s13 }
 0x8bf   : > { %v1578_v17 = vpop.permute.xlu1 %1577 }
 0x8c0   : > { %1586 = vst.msk [vmem:[#allocation3 + $0x10] sm:$0xff] %vm1584_vm14, %v1578_v17  ;;  %v1635_v17 = vld [vmem:[%s8002_s3 + $0x88] sm:$0xff] }
 0x8c1   : > { %v5443_v20 = vpack.c.bf16 %v1637_v18, %v1635_v17  ;;  %v4380_v17 = vld [vmem:[%s8002_s3 + $0x2d8] sm:$0xff] }
 0x8c6   : > { %v1576_v26 = vpop.permute.xlu0 %1575 }
 0x8c7   : > { %1585 = vst.msk [vmem:[#allocation3] sm:$0xff] %vm1584_vm14, %v1576_v26  ;;  %v1590_v27 = vld [vmem:[#allocation3 + $0x10] sm:$0xff]  ;;  %v5445_v26 = vpack.c.bf16 %v1636_v22, %v1634_v21  ;;  %v4379_v21 = vld [vmem:[%s8002_s3 + $0x2d0] sm:$0xff] }
 0x8c8   : > { %1597 = vrot.lane.b32.xlu0 %v1590_v27, %s6110_s19  ;;  %v5447_v27 = vpack.c.bf16 %v1641_v25, %v1639_v23  ;;  %v4382_v22 = vld [vmem:[%s8002_s3 + $0x2e8] sm:$0xff]  ;;  %v4384_v23 = vld [vmem:[%s8002_s3 + $0x2f8] sm:$0xff] }
 0x8cb   : > { %v1580_v35 = vpop.permute.xlu0 %1579 }
 0x8cc   : > { %1588 = vst.msk [vmem:[#allocation3 + $0x20] sm:$0x3f] %vm1587_vm15, %v1580_v35  ;;  %v1644_v35 = vld [vmem:[%s8002_s3 + $0xd0] sm:$0xff] }
 0x8cd   : > { %v5453_v38 = vpack.c.bf16 %v1644_v35, %v1642_v34  ;;  %v4387_v34 = vld [vmem:[%s8002_s3 + $0x310] sm:$0xff] }
 0x8ce   : > { %v1589_v39 = vld [vmem:[#allocation3] sm:$0xff] }
 0x8cf   : > { %1595 = vrot.lane.b32.xlu1 %v1589_v39, %s6110_s19  ;;  %v5455_v39 = vpack.c.bf16 %v1649_v37, %v1647_v36  ;;  %v4390_v36 = vld [vmem:[%s8002_s3 + $0x328] sm:$0xf] }
 0x8d3   : > { %v1591_v41 = vld [vmem:[#allocation3 + $0x20] sm:$0x3f] }
 0x8d4   : > { %1599 = vrot.lane.b32.xlu1 %v1591_v41, %s6110_s19  ;;  %v1648_v41 = vld [vmem:[%s8002_s3 + $0xf0] sm:$0xff] }
 0x93a   : > { %v1598_v42 = vpop.permute.xlu0 %1597 }
 0x93b   : > { %1608 = vst.msk [vmem:[#allocation3 + $0x10] sm:$0xff] %vm1604_vm2, %v1598_v42 }
 0x93c   : > { %1609 = vst.msk [vmem:[#allocation3 + $0x18] sm:$0xff] %vm1606_vm3, %v1598_v42  ;;  %v5457_v42 = vpack.c.bf16 %v1648_v41, %v1646_v40  ;;  %v4395_v41 = vld [vmem:[%s8002_s3 + $0x330] sm:$0xff] }
 0x941   : > { %v1596_v43 = vpop.permute.xlu1 %1595 }
 0x942   : > { %1605 = vst.msk [vmem:[#allocation3] sm:$0xff] %vm1604_vm2, %v1596_v43  ;;  %v6430_v46 = vld [vmem:[#allocation3 + $0x10] sm:$0xff] }
 0x943   : > { %1607 = vst.msk [vmem:[#allocation3 + $0x8] sm:$0xff] %vm1606_vm3, %v1596_v43  ;;  %v6428_v45 = vld [vmem:[#allocation3 + $0x18] sm:$0xff]  ;;  %v1699_v56 = vrot.slane %v6430_v46, 1  ;;  %v1651_v43 = vld [vmem:[%s8002_s3 + $0x108] sm:$0xf] }
 0x944   : > { %v1702_v54 = vrot.slane %v6428_v45, 1  ;;  %v1934_v63 = vrot.slane %v6428_v45, 2 }
 0x946   : > { %v1600_v44 = vpop.permute.xlu1 %1599 }
 0x947   : > { %1611 = vst.msk [vmem:[#allocation3 + $0x20] sm:$0x3f] %vm1610_vm4, %v1600_v44  ;;  %vm2673_vm4 = vcmask 719872  }
 0x948   : > { %1613 = vst.msk [vmem:[#allocation3 + $0x28] sm:$0x3f] %vm1612_vm5, %v1600_v44  ;;  %v4358_v44 = vld [vmem:[%s8002_s3 + $0x228] sm:$0xff]  ;;  %vm2675_vm5 = vcmask 1041600  }
 0x949   : > { %v1652_v51 = vld [vmem:[#allocation3] sm:$0xfe] }
 0x94a   : > { %v1653_v50 = vld [vmem:[#allocation3 + $0x8] sm:$0xfe]  ;;  %v1698_v55 = vrot.slane %v1652_v51, 1  ;;  %v4364_v51 = vld [vmem:[%s8002_s3 + $0x258] sm:$0xff] }
 0x94b   : > { %v1701_v53 = vrot.slane %v1653_v50, 1  ;;  %v1615_v13 = vld [vmem:[#allocation3 + $0x8] sm:$0xff]  ;;  %v4362_v50 = vld [vmem:[%s8002_s3 + $0x248] sm:$0xff]  ;;  %v1886_v37 = vld [vmem:[#allocation3] sm:$0xfc] }
 0x94c   : > { %v1700_v59 = vsel %vm1697_vm6, %v1698_v55, %v1699_v56  ;;  %v1887_v55 = vld [vmem:[#allocation3 + $0x8] sm:$0xfc] }
 0x94d   : > { %v1703_v58 = vsel %vm1697_vm6, %v1701_v53, %v1702_v54  ;;  %v5459_v53 = vpack.c.bf16 %v4360_v47, %v4358_v44  ;;  %v1933_v24 = vrot.slane %v1887_v55, 2  ;;  %v4400_v44 = vld [vmem:[%s8002_s3 + $0x358] sm:$0xff]  ;;  %v4402_v47 = vld [vmem:[%s8002_s3 + $0x368] sm:$0xff] }
 0x94e   : > { %4351 = vmatprep.mubr.msk.f32.mxu1 %vm1606_vm3, %v1703_v58  ;;  %v1654_v1 = vld [vmem:[#allocation3 + $0x20] sm:$0x1]  ;;  %v4363_v58 = vld [vmem:[%s8002_s3 + $0x250] sm:$0xff]  ;;  %v5495_v55 = vpack.c.bf16 %v4402_v47, %v4400_v44 }
 0x94f   : > { %1786 = vmatmul.mubr.f32.vlgmr.msra.gmra.mrb[2].mxu1 %v1700_v59  ;;  %v1655_v0 = vld [vmem:[#allocation3 + $0x28] sm:$0x1]  ;;  %v1704_v4 = vrot.slane %v1654_v1, 1  ;;  %v1614_v59 = vld [vmem:[#allocation3] sm:$0xff]  ;;  %v4435_v44 = vld [vmem:[%s8002_s3 + $0x450] sm:$0xff] }
 0x950   : > { %5430 = vmatpush1.bf16.msra.mxu1 %v5429_v57  ;;  %v1706_v2 = vrot.slane %v1655_v0, 1  ;;  %v4361_v57 = vld [vmem:[%s8002_s3 + $0x240] sm:$0xff] }
 0x951   : > { %5432 = vmatprep.subr.bf16.mxu1 %v5431_v60  ;;  %v1705_v9 = vsel %vm1697_vm6, %v1699_v56, %v1704_v4  ;;  %v5463_v56 = vpack.c.bf16 %v4364_v51, %v4362_v50  ;;  %v4366_v60 = vld [vmem:[%s8002_s3 + $0x268] sm:$0xff]  ;;  %v5465_v62 = vpack.c.bf16 %v4363_v58, %v4361_v57  ;;  %v4365_v1 = vld [vmem:[%s8002_s3 + $0x260] sm:$0xff]  ;;  %v4372_v4 = vld [vmem:[%s8002_s3 + $0x298] sm:$0xff] }
 0x952   : > { %v1707_v8 = vsel %vm1697_vm6, %v1702_v54, %v1706_v2  ;;  %v5461_v54 = vpack.c.bf16 %v4359_v49, %v4357_v48  ;;  %v5467_v0 = vpack.c.bf16 %v4368_v61, %v4366_v60  ;;  %v4367_v2 = vld [vmem:[%s8002_s3 + $0x270] sm:$0xff]  ;;  %v1889_v40 = vld [vmem:[#allocation3 + $0x28] sm:$0x3]  ;;  %v1888_v51 = vld [vmem:[#allocation3 + $0x20] sm:$0x3] }
 0x953   : > { %4352 = vmatprep.mubr.msk.f32.mxu1 %vm1606_vm3, %v1707_v8  ;;  %v5469_v6 = vpack.c.bf16 %v4367_v2, %v4365_v1  ;;  %v4369_v8 = vld [vmem:[%s8002_s3 + $0x280] sm:$0xff]  ;;  %v1938_v50 = vrot.slane %v1889_v40, 2  ;;  %v4404_v60 = vld [vmem:[%s8002_s3 + $0x378] sm:$0xff]  ;;  %v4406_v61 = vld [vmem:[%s8002_s3 + $0x388] sm:$0xff]  ;;  %v2081_v1 = vrot.slane %v6428_v45, 3 }
 0x954   : > { %5434 = vmatpush1.bf16.msra.mxu1 %v5433_v3  ;;  %v4370_v3 = vld [vmem:[%s8002_s3 + $0x288] sm:$0xff]  ;;  %v4389_v48 = vld [vmem:[%s8002_s3 + $0x320] sm:$0xf]  ;;  %v5499_v2 = vpack.c.bf16 %v4406_v61, %v4404_v60 }
 0x955   : > { %1792 = vmatmul.mubr.f32.gmra.mrb[4].mxu1 %v1705_v9  ;;  %5436 = vmatprep.subr.bf16.mxu1 %v5435_v5  ;;  %v1935_v5 = vsel %vm1929_vm7, %v1933_v24, %v1934_v63  ;;  %v5471_v7 = vpack.c.bf16 %v4372_v4, %v4370_v3  ;;  %v4371_v9 = vld [vmem:[%s8002_s3 + $0x290] sm:$0xff]  ;;  %v4401_v57 = vld [vmem:[%s8002_s3 + $0x360] sm:$0xff]  ;;  %v1939_v24 = vsel %vm1929_vm7, %v1934_v63, %v1938_v50  ;;  %v4434_v40 = vld [vmem:[%s8002_s3 + $0x448] sm:$0xff] }
 0x956   : > { %4355 = vmatprep.mubr.msk.f32.mxu1 %vm1606_vm3, %v1615_v13  ;;  %v5475_v13 = vpack.c.bf16 %v4376_v11, %v4374_v10  ;;  %v4403_v3 = vld [vmem:[%s8002_s3 + $0x370] sm:$0xff]  ;;  %v4405_v4 = vld [vmem:[%s8002_s3 + $0x380] sm:$0xff] }
 0x957   : > { %v4407_v10 = vld [vmem:[%s8002_s3 + $0x390] sm:$0xff]  ;;  %v4409_v11 = vld [vmem:[%s8002_s3 + $0x3a0] sm:$0xff] }
 0x958   : > { %5438 = vmatpush1.bf16.msra.mxu1 %v5437_v12  ;;  %v5473_v12 = vpack.c.bf16 %v4371_v9, %v4369_v8  ;;  %v5501_v8 = vpack.c.bf16 %v4405_v4, %v4403_v3  ;;  %v4427_v50 = vld [vmem:[%s8002_s3 + $0x430] sm:$0xf]  ;;  %v2227_v4 = vrot.slane %v6428_v45, 4 }
 0x959   : > { %5440 = vmatprep.subr.bf16.mxu1 %v5439_v14  ;;  %v4373_v14 = vld [vmem:[%s8002_s3 + $0x2a0] sm:$0xff] }
 0x95a   : > { %v5477_v18 = vpack.c.bf16 %v4375_v15, %v4373_v14  ;;  %v5505_v14 = vpack.c.bf16 %v4409_v11, %v4407_v10 }
 0x95c   : > { %5442 = vmatpush1.bf16.msra.mxu1 %v5441_v19  ;;  %v5479_v19 = vpack.c.bf16 %v4380_v17, %v4378_v16  ;;  %v4411_v16 = vld [vmem:[%s8002_s3 + $0x3b0] sm:$0xff]  ;;  %v4413_v17 = vld [vmem:[%s8002_s3 + $0x3c0] sm:$0xff] }
 0x95d   : > { %5444 = vmatprep.subr.bf16.mxu1 %v5443_v20  ;;  %v4377_v20 = vld [vmem:[%s8002_s3 + $0x2c0] sm:$0xff] }
 0x95e   : > { %v5481_v25 = vpack.c.bf16 %v4379_v21, %v4377_v20  ;;  %v5509_v20 = vpack.c.bf16 %v4413_v17, %v4411_v16 }
 0x960   : > { %5446 = vmatpush1.bf16.msra.mxu1 %v5445_v26  ;;  %v5483_v26 = vpack.c.bf16 %v4384_v23, %v4382_v22  ;;  %v4415_v22 = vld [vmem:[%s8002_s3 + $0x3d0] sm:$0xff]  ;;  %v4417_v23 = vld [vmem:[%s8002_s3 + $0x3e0] sm:$0xff] }
 0x961   : > { %5448 = vmatprep.subr.bf16.mxu1 %v5447_v27  ;;  %v4381_v27 = vld [vmem:[%s8002_s3 + $0x2e0] sm:$0xff] }
 0x962   : > { %v5485_v31 = vpack.c.bf16 %v4383_v28, %v4381_v27  ;;  %v5513_v27 = vpack.c.bf16 %v4417_v23, %v4415_v22 }
 0x964   : > { %5450 = vmatpush1.bf16.msra.mxu1 %v5449_v32  ;;  %v5487_v32 = vpack.c.bf16 %v4388_v30, %v4386_v29  ;;  %v4419_v29 = vld [vmem:[%s8002_s3 + $0x3f0] sm:$0xff]  ;;  %v4421_v30 = vld [vmem:[%s8002_s3 + $0x400] sm:$0xff] }
 0x965   : > { %5452 = vmatprep.subr.bf16.mxu1 %v5451_v33  ;;  %v4385_v33 = vld [vmem:[%s8002_s3 + $0x300] sm:$0xff] }
 0x966   : > { %v5489_v35 = vpack.c.bf16 %v4387_v34, %v4385_v33  ;;  %v5517_v33 = vpack.c.bf16 %v4421_v30, %v4419_v29 }
 0x968   : > { %5454 = vmatpush1.bf16.msra.mxu1 %v5453_v38  ;;  %v4396_v38 = vld [vmem:[%s8002_s3 + $0x338] sm:$0xff] }
 0x969   : > { %5456 = vmatprep.subr.bf16.mxu1 %v5455_v39  ;;  %v4398_v39 = vld [vmem:[%s8002_s3 + $0x348] sm:$0xff] }
 0x96a   : > { %v5491_v49 = vpack.c.bf16 %v4398_v39, %v4396_v38  ;;  %v4428_v38 = vld [vmem:[%s8002_s3 + $0x438] sm:$0xf] }
 0x96b   : > { %v2033_v39 = vld [vmem:[#allocation3] sm:$0xf8] }
 0x96c   : > { %5458 = vmatpush1.bf16.msra.mxu1 %v5457_v42  ;;  %v4397_v42 = vld [vmem:[%s8002_s3 + $0x340] sm:$0xff]  ;;  %v2077_v47 = vrot.slane %v2033_v39, 3 }
 0x96d   : > { %4353 = vmatprep.subr.msk.mxu1 %vm1714_vm1, %v1651_v43  ;;  %v1930_v43 = vrot.slane %v1886_v37, 2 }
 0x970   : > { %4354 = vmatpush1.msk.msra.mxu1 %vm1714_vm1, %v1650_v52  ;;  %v1931_v52 = vrot.slane %v6430_v46, 2 }
 0x971   : > { %1874 = vmatmul.mubr.f32.vlgmr.msra.gmra.mrb[2].mxu1 %v1614_v59  ;;  %5460 = vmatprep.subr.bf16.mxu1 %v5459_v53  ;;  %v5493_v53 = vpack.c.bf16 %v4397_v42, %v4395_v41  ;;  %v1936_v59 = vrot.slane %v1888_v51, 2  ;;  %v4436_v41 = vld [vmem:[%s8002_s3 + $0x458] sm:$0xff]  ;;  %v2036_v42 = vld [vmem:[#allocation3 + $0x28] sm:$0x7] }
 0x972   : > { %4356 = vmatprep.mubr.msk.f32.mxu1 %vm1606_vm3, %v6428_v45  ;;  %5462 = vmatpush1.bf16.msra.mxu1 %v5461_v54  ;;  %v2034_v54 = vld [vmem:[#allocation3 + $0x8] sm:$0xf8]  ;;  %v1932_v58 = vsel %vm1929_vm7, %v1930_v43, %v1931_v52  ;;  %v5523_v51 = vpack.c.bf16 %v4436_v41, %v4434_v40  ;;  %v4466_v40 = vld [vmem:[%s8002_s3 + $0x548] sm:$0xf]  ;;  %v2180_v41 = vld [vmem:[#allocation3] sm:$0xf0] }
 0x973   : > { %5464 = vmatprep.subr.bf16.mxu1 %v5463_v56  ;;  %v4399_v56 = vld [vmem:[%s8002_s3 + $0x350] sm:$0xff]  ;;  %v1937_v63 = vsel %vm1929_vm7, %v1931_v52, %v1936_v59  ;;  %v4433_v43 = vld [vmem:[%s8002_s3 + $0x440] sm:$0xff]  ;;  %v2085_v52 = vrot.slane %v2036_v42, 3  ;;  %v4472_v42 = vld [vmem:[%s8002_s3 + $0x558] sm:$0xff] }
 0x974   : > { %v4439_v59 = vld [vmem:[%s8002_s3 + $0x470] sm:$0xff] }
 0x975   : > { %1880 = vmatmul.mubr.f32.gmra.mrb[4].mxu1 %v6430_v46 }
 0x976   : > { %5466 = vmatpush1.bf16.msra.mxu1 %v5465_v62  ;;  %4393 = vmatprep.mubr.msk.f32.mxu1 %vm1606_vm3, %v1935_v5  ;;  %v2080_v62 = vrot.slane %v2034_v54, 3  ;;  %v4408_v5 = vld [vmem:[%s8002_s3 + $0x398] sm:$0xff]  ;;  %v2078_v54 = vrot.slane %v6430_v46, 3 }
 0x977   : > { %5468 = vmatprep.subr.bf16.mxu1 %v5467_v0  ;;  %v5497_v0 = vpack.c.bf16 %v4401_v57, %v4399_v56  ;;  %v2181_v56 = vld [vmem:[#allocation3 + $0x8] sm:$0xf0] }
 0x978   : > { %v2079_v60 = vsel %vm2076_vm8, %v2077_v47, %v2078_v54  ;;  %v4471_v47 = vld [vmem:[%s8002_s3 + $0x550] sm:$0xff] }
 0x97a   : > { %5470 = vmatpush1.bf16.msra.mxu1 %v5469_v6  ;;  %v4410_v6 = vld [vmem:[%s8002_s3 + $0x3a8] sm:$0xff] }
 0x97b   : > { %5472 = vmatprep.subr.bf16.mxu1 %v5471_v7  ;;  %v2082_v7 = vsel %vm2076_vm8, %v2080_v62, %v2081_v1  ;;  %v5503_v9 = vpack.c.bf16 %v4410_v6, %v4408_v5  ;;  %v4444_v62 = vld [vmem:[%s8002_s3 + $0x498] sm:$0xff]  ;;  %v4441_v5 = vld [vmem:[%s8002_s3 + $0x480] sm:$0xff]  ;;  %v4443_v6 = vld [vmem:[%s8002_s3 + $0x490] sm:$0xff] }
 0x97c   : > { %v5533_v10 = vpack.c.bf16 %v4443_v6, %v4441_v5  ;;  %v2373_v6 = vrot.slane %v6428_v45, 5 }
 0x97e   : > { %5474 = vmatpush1.bf16.msra.mxu1 %v5473_v12  ;;  %v4412_v12 = vld [vmem:[%s8002_s3 + $0x3b8] sm:$0xff] }
 0x97f   : > { %5476 = vmatprep.subr.bf16.mxu1 %v5475_v13  ;;  %v4414_v13 = vld [vmem:[%s8002_s3 + $0x3c8] sm:$0xff] }
 0x980   : > { %v5507_v15 = vpack.c.bf16 %v4414_v13, %v4412_v12  ;;  %v4445_v12 = vld [vmem:[%s8002_s3 + $0x4a0] sm:$0xff]  ;;  %v4447_v13 = vld [vmem:[%s8002_s3 + $0x4b0] sm:$0xff] }
 0x981   : > { %v5537_v16 = vpack.c.bf16 %v4447_v13, %v4445_v12 }
 0x982   : > { %5478 = vmatpush1.bf16.msra.mxu1 %v5477_v18  ;;  %v4416_v18 = vld [vmem:[%s8002_s3 + $0x3d8] sm:$0xff] }
 0x983   : > { %5480 = vmatprep.subr.bf16.mxu1 %v5479_v19  ;;  %v4418_v19 = vld [vmem:[%s8002_s3 + $0x3e8] sm:$0xff] }
 0x984   : > { %v5511_v21 = vpack.c.bf16 %v4418_v19, %v4416_v18  ;;  %v4449_v18 = vld [vmem:[%s8002_s3 + $0x4c0] sm:$0xff]  ;;  %v4451_v19 = vld [vmem:[%s8002_s3 + $0x4d0] sm:$0xff] }
 0x985   : > { %v5541_v22 = vpack.c.bf16 %v4451_v19, %v4449_v18 }
 0x986   : > { %5482 = vmatpush1.bf16.msra.mxu1 %v5481_v25  ;;  %v4420_v25 = vld [vmem:[%s8002_s3 + $0x3f8] sm:$0xff] }
 0x987   : > { %5484 = vmatprep.subr.bf16.mxu1 %v5483_v26  ;;  %v4422_v26 = vld [vmem:[%s8002_s3 + $0x408] sm:$0xff] }
 0x988   : > { %v5515_v28 = vpack.c.bf16 %v4422_v26, %v4420_v25  ;;  %v4453_v25 = vld [vmem:[%s8002_s3 + $0x4e0] sm:$0xff]  ;;  %v4455_v26 = vld [vmem:[%s8002_s3 + $0x4f0] sm:$0xff] }
 0x989   : > { %v5545_v29 = vpack.c.bf16 %v4455_v26, %v4453_v25 }
 0x98a   : > { %5486 = vmatpush1.bf16.msra.mxu1 %v5485_v31  ;;  %v4424_v31 = vld [vmem:[%s8002_s3 + $0x418] sm:$0xff] }
 0x98b   : > { %5488 = vmatprep.subr.bf16.mxu1 %v5487_v32  ;;  %v4426_v32 = vld [vmem:[%s8002_s3 + $0x428] sm:$0xff] }
 0x98c   : > { %v5519_v34 = vpack.c.bf16 %v4426_v32, %v4424_v31  ;;  %v4457_v31 = vld [vmem:[%s8002_s3 + $0x500] sm:$0xff]  ;;  %v4459_v32 = vld [vmem:[%s8002_s3 + $0x510] sm:$0xff] }
 0x98e   : > { %5490 = vmatpush1.bf16.msra.mxu1 %v5489_v35  ;;  %v4423_v35 = vld [vmem:[%s8002_s3 + $0x410] sm:$0xff] }
 0x98f   : > { %4391 = vmatprep.subr.msk.mxu1 %vm1714_vm1, %v4390_v36  ;;  %v4425_v36 = vld [vmem:[%s8002_s3 + $0x420] sm:$0xff] }
 0x990   : > { %v5521_v37 = vpack.c.bf16 %v4425_v36, %v4423_v35  ;;  %v5549_v35 = vpack.c.bf16 %v4459_v32, %v4457_v31 }
 0x992   : > { %4392 = vmatpush1.msk.msra.mxu1 %vm1714_vm1, %v4389_v48  ;;  %v4438_v48 = vld [vmem:[%s8002_s3 + $0x468] sm:$0xff] }
 0x993   : > { %2017 = vmatmul.mubr.f32.vlgmr.msra.gmra.mrb[2].mxu1 %v1932_v58  ;;  %5492 = vmatprep.subr.bf16.mxu1 %v5491_v49  ;;  %v4440_v49 = vld [vmem:[%s8002_s3 + $0x478] sm:$0xff]  ;;  %v4437_v58 = vld [vmem:[%s8002_s3 + $0x460] sm:$0xff] }
 0x994   : > { %4394 = vmatprep.mubr.msk.f32.mxu1 %vm1606_vm3, %v1939_v24  ;;  %5494 = vmatpush1.bf16.msra.mxu1 %v5493_v53  ;;  %v2035_v53 = vld [vmem:[#allocation3 + $0x20] sm:$0x7]  ;;  %v5527_v57 = vpack.c.bf16 %v4440_v49, %v4438_v48  ;;  %v4442_v24 = vld [vmem:[%s8002_s3 + $0x488] sm:$0xff]  ;;  %v5529_v3 = vpack.c.bf16 %v4439_v59, %v4437_v58  ;;  %v4473_v48 = vld [vmem:[%s8002_s3 + $0x560] sm:$0xff]  ;;  %v2223_v49 = vrot.slane %v2180_v41, 4 }
 0x995   : > { %5496 = vmatprep.subr.bf16.mxu1 %v5495_v55  ;;  %v5525_v55 = vpack.c.bf16 %v4435_v44, %v4433_v43  ;;  %v2083_v61 = vrot.slane %v2035_v53, 3  ;;  %v4474_v43 = vld [vmem:[%s8002_s3 + $0x568] sm:$0xff]  ;;  %v2183_v44 = vld [vmem:[#allocation3 + $0x28] sm:$0xf]  ;;  %v2327_v58 = vld [vmem:[#allocation3 + $0x8] sm:$0xe0] }
 0x996   : > { %v5555_v53 = vpack.c.bf16 %v4474_v43, %v4472_v42  ;;  %v2326_v42 = vld [vmem:[#allocation3] sm:$0xe0]  ;;  %v2329_v43 = vld [vmem:[#allocation3 + $0x28] sm:$0x1f] }
 0x997   : > { %2023 = vmatmul.mubr.f32.gmra.mrb[4].mxu1 %v1937_v63  ;;  %v5531_v63 = vpack.c.bf16 %v4444_v62, %v4442_v24 }
 0x998   : > { %5498 = vmatpush1.bf16.msra.mxu1 %v5497_v0  ;;  %4431 = vmatprep.mubr.msk.f32.mxu1 %vm1606_vm3, %v2082_v7  ;;  %v2086_v0 = vsel %vm2076_vm8, %v2081_v1, %v2085_v52  ;;  %v2084_v7 = vsel %vm2076_vm8, %v2078_v54, %v2083_v61  ;;  %v4446_v1 = vld [vmem:[%s8002_s3 + $0x4a8] sm:$0xff]  ;;  %v4465_v52 = vld [vmem:[%s8002_s3 + $0x540] sm:$0xf]  ;;  %v2231_v54 = vrot.slane %v2183_v44, 4  ;;  %v4504_v44 = vld [vmem:[%s8002_s3 + $0x658] sm:$0xf] }
 0x999   : > { %5500 = vmatprep.subr.bf16.mxu1 %v5499_v2  ;;  %v2226_v2 = vrot.slane %v2181_v56, 4  ;;  %v2224_v56 = vrot.slane %v6430_v46, 4  ;;  %v4477_v61 = vld [vmem:[%s8002_s3 + $0x580] sm:$0xff] }
 0x99b   : > { %v2225_v24 = vsel %vm1714_vm1, %v2223_v49, %v2224_v56  ;;  %v4509_v49 = vld [vmem:[%s8002_s3 + $0x660] sm:$0xff] }
 0x99c   : > { %5502 = vmatpush1.bf16.msra.mxu1 %v5501_v8  ;;  %v4448_v8 = vld [vmem:[%s8002_s3 + $0x4b8] sm:$0xff] }
 0x99d   : > { %5504 = vmatprep.subr.bf16.mxu1 %v5503_v9  ;;  %v2228_v9 = vsel %vm1714_vm1, %v2226_v2, %v2227_v4  ;;  %v5535_v11 = vpack.c.bf16 %v4448_v8, %v4446_v1  ;;  %v4482_v2 = vld [vmem:[%s8002_s3 + $0x5a8] sm:$0xff]  ;;  %v4479_v1 = vld [vmem:[%s8002_s3 + $0x590] sm:$0xff]  ;;  %v4481_v8 = vld [vmem:[%s8002_s3 + $0x5a0] sm:$0xff] }
 0x99e   : > { %v5565_v12 = vpack.c.bf16 %v4481_v8, %v4479_v1  ;;  %v2520_v1 = vrot.slane %v6428_v45, 6 }
 0x9a0   : > { %5506 = vmatpush1.bf16.msra.mxu1 %v5505_v14  ;;  %v4450_v14 = vld [vmem:[%s8002_s3 + $0x4c8] sm:$0xff] }
 0x9a1   : > { %5508 = vmatprep.subr.bf16.mxu1 %v5507_v15  ;;  %v4452_v15 = vld [vmem:[%s8002_s3 + $0x4d8] sm:$0xff] }
 0x9a2   : > { %v5539_v17 = vpack.c.bf16 %v4452_v15, %v4450_v14  ;;  %v4483_v14 = vld [vmem:[%s8002_s3 + $0x5b0] sm:$0xff]  ;;  %v4485_v15 = vld [vmem:[%s8002_s3 + $0x5c0] sm:$0xff] }
 0x9a3   : > { %v5569_v18 = vpack.c.bf16 %v4485_v15, %v4483_v14  ;;  %v4521_v15 = vld [vmem:[%s8002_s3 + $0x6c0] sm:$0xff] }
 0x9a4   : > { %5510 = vmatpush1.bf16.msra.mxu1 %v5509_v20  ;;  %v4454_v20 = vld [vmem:[%s8002_s3 + $0x4e8] sm:$0xff] }
 0x9a5   : > { %5512 = vmatprep.subr.bf16.mxu1 %v5511_v21  ;;  %v4456_v21 = vld [vmem:[%s8002_s3 + $0x4f8] sm:$0xff] }
 0x9a6   : > { %v5543_v23 = vpack.c.bf16 %v4456_v21, %v4454_v20  ;;  %v4487_v20 = vld [vmem:[%s8002_s3 + $0x5d0] sm:$0xff]  ;;  %v4489_v21 = vld [vmem:[%s8002_s3 + $0x5e0] sm:$0xff] }
 0x9a7   : > { %v5573_v25 = vpack.c.bf16 %v4489_v21, %v4487_v20  ;;  %v4525_v21 = vld [vmem:[%s8002_s3 + $0x6e0] sm:$0xff] }
 0x9a8   : > { %5514 = vmatpush1.bf16.msra.mxu1 %v5513_v27  ;;  %v4458_v27 = vld [vmem:[%s8002_s3 + $0x508] sm:$0xff] }
 0x9a9   : > { %5516 = vmatprep.subr.bf16.mxu1 %v5515_v28  ;;  %v4460_v28 = vld [vmem:[%s8002_s3 + $0x518] sm:$0xff] }
 0x9aa   : > { %v5547_v30 = vpack.c.bf16 %v4460_v28, %v4458_v27  ;;  %v4491_v27 = vld [vmem:[%s8002_s3 + $0x5f0] sm:$0xff]  ;;  %v4493_v28 = vld [vmem:[%s8002_s3 + $0x600] sm:$0xff] }
 0x9ab   : > { %v5577_v31 = vpack.c.bf16 %v4493_v28, %v4491_v27  ;;  %v4529_v28 = vld [vmem:[%s8002_s3 + $0x700] sm:$0xff] }
 0x9ac   : > { %5518 = vmatpush1.bf16.msra.mxu1 %v5517_v33  ;;  %v4462_v33 = vld [vmem:[%s8002_s3 + $0x528] sm:$0xff] }
 0x9ad   : > { %5520 = vmatprep.subr.bf16.mxu1 %v5519_v34  ;;  %v4464_v34 = vld [vmem:[%s8002_s3 + $0x538] sm:$0xff] }
 0x9ae   : > { %v5551_v36 = vpack.c.bf16 %v4464_v34, %v4462_v33  ;;  %v4495_v33 = vld [vmem:[%s8002_s3 + $0x610] sm:$0xff]  ;;  %v4497_v34 = vld [vmem:[%s8002_s3 + $0x620] sm:$0xff] }
 0x9b0   : > { %5522 = vmatpush1.bf16.msra.mxu1 %v5521_v37  ;;  %v4461_v37 = vld [vmem:[%s8002_s3 + $0x520] sm:$0xff] }
 0x9b1   : > { %4429 = vmatprep.subr.msk.mxu1 %vm1714_vm1, %v4428_v38  ;;  %v4463_v38 = vld [vmem:[%s8002_s3 + $0x530] sm:$0xff] }
 0x9b2   : > { %v5553_v39 = vpack.c.bf16 %v4463_v38, %v4461_v37  ;;  %v5581_v37 = vpack.c.bf16 %v4497_v34, %v4495_v33  ;;  %v4533_v34 = vld [vmem:[%s8002_s3 + $0x720] sm:$0xff] }
 0x9b4   : > { %4430 = vmatpush1.msk.msra.mxu1 %vm1714_vm1, %v4427_v50  ;;  %v4476_v50 = vld [vmem:[%s8002_s3 + $0x578] sm:$0xff] }
 0x9b5   : > { %2164 = vmatmul.mubr.f32.vlgmr.msra.gmra.mrb[2].mxu1 %v2079_v60  ;;  %5524 = vmatprep.subr.bf16.mxu1 %v5523_v51  ;;  %v4478_v51 = vld [vmem:[%s8002_s3 + $0x588] sm:$0xff]  ;;  %v4475_v60 = vld [vmem:[%s8002_s3 + $0x570] sm:$0xff] }
 0x9b6   : > { %4432 = vmatprep.mubr.msk.f32.mxu1 %vm1606_vm3, %v2086_v0  ;;  %5526 = vmatpush1.bf16.msra.mxu1 %v5525_v55  ;;  %v2182_v55 = vld [vmem:[#allocation3 + $0x20] sm:$0xf]  ;;  %v5559_v59 = vpack.c.bf16 %v4478_v51, %v4476_v50  ;;  %v5561_v5 = vpack.c.bf16 %v4477_v61, %v4475_v60  ;;  %v4511_v50 = vld [vmem:[%s8002_s3 + $0x670] sm:$0xff]  ;;  %v2369_v51 = vrot.slane %v2326_v42, 5  ;;  %v2473_v60 = vld [vmem:[#allocation3 + $0x8] sm:$0xc0] }
 0x9b7   : > { %5528 = vmatprep.subr.bf16.mxu1 %v5527_v57  ;;  %v5557_v57 = vpack.c.bf16 %v4473_v48, %v4471_v47  ;;  %v2229_v62 = vrot.slane %v2182_v55, 4  ;;  %v4480_v0 = vld [vmem:[%s8002_s3 + $0x598] sm:$0xff]  ;;  %v4510_v47 = vld [vmem:[%s8002_s3 + $0x668] sm:$0xff] }
 0x9b8   : > { %v4512_v48 = vld [vmem:[%s8002_s3 + $0x678] sm:$0xff] }
 0x9b9   : > { %2170 = vmatmul.mubr.f32.gmra.mrb[4].mxu1 %v2084_v7  ;;  %v5563_v7 = vpack.c.bf16 %v4482_v2, %v4480_v0  ;;  %v5587_v55 = vpack.c.bf16 %v4512_v48, %v4510_v47  ;;  %v2475_v47 = vld [vmem:[#allocation3 + $0x28] sm:$0x3f] }
 0x9ba   : > { %5530 = vmatpush1.bf16.msra.mxu1 %v5529_v3  ;;  %4469 = vmatprep.mubr.msk.f32.mxu1 %vm1606_vm3, %v2228_v9  ;;  %v2232_v3 = vsel %vm1714_vm1, %v2227_v4, %v2231_v54  ;;  %v2230_v9 = vsel %vm1714_vm1, %v2224_v56, %v2229_v62  ;;  %v4484_v4 = vld [vmem:[%s8002_s3 + $0x5b8] sm:$0xff]  ;;  %v4503_v54 = vld [vmem:[%s8002_s3 + $0x650] sm:$0xf]  ;;  %v2377_v56 = vrot.slane %v2329_v43, 5 }
 0x9bb   : > { %5532 = vmatprep.subr.bf16.mxu1 %v5531_v63  ;;  %v2372_v63 = vrot.slane %v2327_v58, 5  ;;  %v2370_v58 = vrot.slane %v6430_v46, 5  ;;  %v4515_v62 = vld [vmem:[%s8002_s3 + $0x690] sm:$0xff]  ;;  %v4518_v46 = vld [vmem:[%s8002_s3 + $0x6a8] sm:$0xff]  ;;  %v2472_v43 = vld [vmem:[#allocation3] sm:$0xc0] }
 0x9bc   : > { %v2516_v48 = vrot.slane %v2472_v43, 6 }
 0x9bd   : > { %v2371_v0 = vsel %vm1443_vm0, %v2369_v51, %v2370_v58  ;;  %v2474_v51 = vld [vmem:[#allocation3 + $0x20] sm:$0x3f] }
 0x9be   : > { %5534 = vmatpush1.bf16.msra.mxu1 %v5533_v10  ;;  %v4486_v10 = vld [vmem:[%s8002_s3 + $0x5c8] sm:$0xff] }
 0x9bf   : > { %5536 = vmatprep.subr.bf16.mxu1 %v5535_v11  ;;  %v2374_v11 = vsel %vm1443_vm0, %v2372_v63, %v2373_v6  ;;  %v5567_v13 = vpack.c.bf16 %v4486_v10, %v4484_v4  ;;  %v2378_v63 = vsel %vm1443_vm0, %v2373_v6, %v2377_v56  ;;  %v4519_v4 = vld [vmem:[%s8002_s3 + $0x6b0] sm:$0xff]  ;;  %v4522_v10 = vld [vmem:[%s8002_s3 + $0x6c8] sm:$0xff] }
 0x9c2   : > { %5538 = vmatpush1.bf16.msra.mxu1 %v5537_v16  ;;  %v4488_v16 = vld [vmem:[%s8002_s3 + $0x5d8] sm:$0xff] }
 0x9c3   : > { %5540 = vmatprep.subr.bf16.mxu1 %v5539_v17  ;;  %v4490_v17 = vld [vmem:[%s8002_s3 + $0x5e8] sm:$0xff] }
 0x9c4   : > { %v5571_v19 = vpack.c.bf16 %v4490_v17, %v4488_v16  ;;  %v4523_v16 = vld [vmem:[%s8002_s3 + $0x6d0] sm:$0xff]  ;;  %v4526_v17 = vld [vmem:[%s8002_s3 + $0x6e8] sm:$0xff] }
 0x9c6   : > { %5542 = vmatpush1.bf16.msra.mxu1 %v5541_v22  ;;  %v4492_v22 = vld [vmem:[%s8002_s3 + $0x5f8] sm:$0xff] }
 0x9c7   : > { %5544 = vmatprep.subr.bf16.mxu1 %v5543_v23  ;;  %v4494_v23 = vld [vmem:[%s8002_s3 + $0x608] sm:$0xff] }
 0x9c8   : > { %v5575_v26 = vpack.c.bf16 %v4494_v23, %v4492_v22  ;;  %v4527_v22 = vld [vmem:[%s8002_s3 + $0x6f0] sm:$0xff]  ;;  %v4530_v23 = vld [vmem:[%s8002_s3 + $0x708] sm:$0xff] }
 0x9ca   : > { %5546 = vmatpush1.bf16.msra.mxu1 %v5545_v29  ;;  %v4496_v29 = vld [vmem:[%s8002_s3 + $0x618] sm:$0xff] }
 0x9cb   : > { %5548 = vmatprep.subr.bf16.mxu1 %v5547_v30  ;;  %v4498_v30 = vld [vmem:[%s8002_s3 + $0x628] sm:$0xff] }
 0x9cc   : > { %v5579_v32 = vpack.c.bf16 %v4498_v30, %v4496_v29  ;;  %v4531_v29 = vld [vmem:[%s8002_s3 + $0x710] sm:$0xff]  ;;  %v4534_v30 = vld [vmem:[%s8002_s3 + $0x728] sm:$0xff] }
 0x9ce   : > { %5550 = vmatpush1.bf16.msra.mxu1 %v5549_v35  ;;  %v4500_v35 = vld [vmem:[%s8002_s3 + $0x638] sm:$0xff] }
 0x9cf   : > { %5552 = vmatprep.subr.bf16.mxu1 %v5551_v36  ;;  %v4502_v36 = vld [vmem:[%s8002_s3 + $0x648] sm:$0xff] }
 0x9d0   : > { %v5583_v38 = vpack.c.bf16 %v4502_v36, %v4500_v35  ;;  %v4535_v35 = vld [vmem:[%s8002_s3 + $0x730] sm:$0xff]  ;;  %v4538_v36 = vld [vmem:[%s8002_s3 + $0x748] sm:$0xff] }
 0x9d2   : > { %5554 = vmatpush1.bf16.msra.mxu1 %v5553_v39  ;;  %v4499_v39 = vld [vmem:[%s8002_s3 + $0x630] sm:$0xff] }
 0x9d3   : > { %4467 = vmatprep.subr.msk.mxu1 %vm1714_vm1, %v4466_v40  ;;  %v4501_v40 = vld [vmem:[%s8002_s3 + $0x640] sm:$0xff] }
 0x9d4   : > { %v5585_v41 = vpack.c.bf16 %v4501_v40, %v4499_v39  ;;  %v4537_v40 = vld [vmem:[%s8002_s3 + $0x740] sm:$0xff] }
 0x9d6   : > { %4468 = vmatpush1.msk.msra.mxu1 %vm1714_vm1, %v4465_v52  ;;  %v4514_v52 = vld [vmem:[%s8002_s3 + $0x688] sm:$0xff] }
 0x9d7   : > { %2310 = vmatmul.mubr.f32.vlgmr.msra.gmra.mrb[2].mxu1 %v2225_v24  ;;  %5556 = vmatprep.subr.bf16.mxu1 %v5555_v53  ;;  %v4516_v53 = vld [vmem:[%s8002_s3 + $0x698] sm:$0xff]  ;;  %v4513_v24 = vld [vmem:[%s8002_s3 + $0x680] sm:$0xff] }
 0x9d8   : > { %4470 = vmatprep.mubr.msk.f32.mxu1 %vm1606_vm3, %v2232_v3  ;;  %5558 = vmatpush1.bf16.msra.mxu1 %v5557_v57  ;;  %v2328_v57 = vld [vmem:[#allocation3 + $0x20] sm:$0x1f]  ;;  %v5591_v61 = vpack.c.bf16 %v4516_v53, %v4514_v52  ;;  %v6055_v52 = vld [vmem:[#allocation3 + $0x10] sm:$0xff] }
 0x9d9   : > { %5560 = vmatprep.subr.bf16.mxu1 %v5559_v59  ;;  %v5589_v59 = vpack.c.bf16 %v4511_v50, %v4509_v49  ;;  %v2375_v2 = vrot.slane %v2328_v57, 5  ;;  %v4520_v3 = vld [vmem:[%s8002_s3 + $0x6b8] sm:$0xff]  ;;  %v4541_v49 = vld [vmem:[%s8002_s3 + $0x760] sm:$0xf]  ;;  %v2524_v50 = vrot.slane %v2475_v47, 6  ;;  %v2517_v53 = vrot.slane %v6055_v52, 6 }
 0x9da   : > { %v5595_v8 = vpack.c.bf16 %v4520_v3, %v4518_v46 }
 0x9db   : > { %2316 = vmatmul.mubr.f32.gmra.mrb[4].mxu1 %v2230_v9  ;;  %v4517_v9 = vld [vmem:[%s8002_s3 + $0x6a0] sm:$0xff]  ;;  %v2376_v6 = vsel %vm1443_vm0, %v2370_v58, %v2375_v2  ;;  %v2525_v56 = vsel %vm2515_vm9, %v2520_v1, %v2524_v50  ;;  %v2621_v58 = vlaneseq  ;;  %vm2667_vm0 = vcmask 1047746  }
 0x9dc   : > { %5562 = vmatpush1.bf16.msra.mxu1 %v5561_v5  ;;  %4507 = vmatprep.mubr.msk.f32.mxu1 %vm1606_vm3, %v2374_v11  ;;  %v2519_v5 = vrot.slane %v2473_v60, 6  ;;  %v4524_v11 = vld [vmem:[%s8002_s3 + $0x6d8] sm:$0xff] }
 0x9dd   : > { %5564 = vmatprep.subr.bf16.mxu1 %v5563_v7  ;;  %v5593_v7 = vpack.c.bf16 %v4515_v62, %v4513_v24  ;;  %v5599_v14 = vpack.c.bf16 %v4524_v11, %v4522_v10  ;;  %v6111_v24 = vmov 1966171168   ;;  %vm2701_vm12 = vcmp.ge.s32.totalorder %v2621_v58, 24 }
 0x9de   : > { %v2681_v62 = vunpack.c.l.s4 %v6111_v24  ;;  %vm2702_vm15 = vcmp.lt.s32.totalorder %v2621_v58, 216  ;;  %v4582_v24 = vld [vmem:[%s8004_s5 + $0x1e8] sm:$0xff] }
 0x9df   : > { %vm7137_vm2 = vmand %vm2701_vm12, %vm2702_vm15  ;;  %vm2780_vm12 = vcmask 191584   ;;  %vm2837_vm15 = vcmask 917280  }
 0x9e0   : > { %5566 = vmatpush1.bf16.msra.mxu1 %v5565_v12  ;;  %v2521_v12 = vsel %vm2515_vm9, %v2519_v5, %v2520_v1  ;;  %v2682_v46 = vunpack.c.0.s8 %v2681_v62  ;;  %v4549_v62 = vld [vmem:[%s8004_s5 + $0x100] sm:$0xff] }
 0x9e1   : > { %5568 = vmatprep.subr.bf16.mxu1 %v5567_v13  ;;  %v5597_v13 = vpack.c.bf16 %v4519_v4, %v4517_v9 }
 0x9e4   : > { %5570 = vmatpush1.bf16.msra.mxu1 %v5569_v18  ;;  %v4528_v18 = vld [vmem:[%s8002_s3 + $0x6f8] sm:$0xff] }
 0x9e5   : > { %5572 = vmatprep.subr.bf16.mxu1 %v5571_v19  ;;  %v5601_v19 = vpack.c.bf16 %v4523_v16, %v4521_v15  ;;  %v5603_v20 = vpack.c.bf16 %v4528_v18, %v4526_v17 }
 0x9e8   : > { %5574 = vmatpush1.bf16.msra.mxu1 %v5573_v25  ;;  %v4532_v25 = vld [vmem:[%s8002_s3 + $0x718] sm:$0xff] }
 0x9e9   : > { %5576 = vmatprep.subr.bf16.mxu1 %v5575_v26  ;;  %v5605_v26 = vpack.c.bf16 %v4527_v22, %v4525_v21  ;;  %v5607_v27 = vpack.c.bf16 %v4532_v25, %v4530_v23 }
 0x9ec   : > { %5578 = vmatpush1.bf16.msra.mxu1 %v5577_v31  ;;  %v4536_v31 = vld [vmem:[%s8002_s3 + $0x738] sm:$0xff] }
 0x9ed   : > { %5580 = vmatprep.subr.bf16.mxu1 %v5579_v32  ;;  %v5609_v32 = vpack.c.bf16 %v4531_v29, %v4529_v28  ;;  %v5611_v33 = vpack.c.bf16 %v4536_v31, %v4534_v30 }
 0x9f0   : > { %5582 = vmatpush1.bf16.msra.mxu1 %v5581_v37  ;;  %v4540_v37 = vld [vmem:[%s8002_s3 + $0x758] sm:$0xff] }
 0x9f1   : > { %5584 = vmatprep.subr.bf16.mxu1 %v5583_v38  ;;  %v5613_v38 = vpack.c.bf16 %v4535_v35, %v4533_v34  ;;  %v5615_v39 = vpack.c.bf16 %v4540_v37, %v4538_v36 }
 0x9f4   : > { %5586 = vmatpush1.bf16.msra.mxu1 %v5585_v41  ;;  %v4539_v41 = vld [vmem:[%s8002_s3 + $0x750] sm:$0xff] }
 0x9f5   : > { %4505 = vmatprep.subr.msk.mxu1 %vm1714_vm1, %v4504_v44  ;;  %v5617_v42 = vpack.c.bf16 %v4539_v41, %v4537_v40  ;;  %v4542_v44 = vld [vmem:[%s8002_s3 + $0x768] sm:$0xf] }
 0x9f8   : > { %4506 = vmatpush1.msk.msra.mxu1 %vm1714_vm1, %v4503_v54  ;;  %v2518_v54 = vsel %vm2515_vm9, %v2516_v48, %v2517_v53 }
 0x9f9   : > { %2456 = vmatmul.mubr.f32.vlgmr.msra.gmra.mrb[2].mxu1 %v2371_v0  ;;  %5588 = vmatprep.subr.bf16.mxu1 %v5587_v55  ;;  %v2522_v55 = vrot.slane %v2474_v51, 6 }
 0x9fa   : > { %4508 = vmatprep.mubr.msk.f32.mxu1 %vm1606_vm3, %v2378_v63  ;;  %5590 = vmatpush1.bf16.msra.mxu1 %v5589_v59  ;;  %v2622_v59 = vshrl.u32 %v2621_v58, 7  ;;  %v4548_v58 = vld [vmem:[%s8004_s5 + $0xf8] sm:$0xff] }
 0x9fb   : > { %5592 = vmatprep.subr.bf16.mxu1 %v5591_v61  ;;  %v2523_v57 = vsel %vm2515_vm9, %v2517_v53, %v2522_v55  ;;  %v2619_v61 = vld [vmem:[%s8003_s4] sm:$0x3] }
 0x9fc   : > { %v2623_v60 = vsub.s32 0, %v2622_v59  ;;  %v2627_v0 = vsub.s32 1, %v2622_v59 }
 0x9fd   : > { %2462 = vmatmul.mubr.f32.gmra.mrb[4].mxu1 %v2376_v6 }
 0x9fe   : > { %5594 = vmatpush1.bf16.msra.mxu1 %v5593_v7  ;;  %4545 = vmatprep.mubr.msk.f32.mxu1 %vm1606_vm3, %v2521_v12  ;;  %v2624_v2 = vrot.slane %v2619_v61, %v2623_v60  ;;  %v2628_v45 = vrot.slane %v2619_v61, %v2627_v0  ;;  %v2685_v7 = vsub.s32 %v2682_v46, %v2622_v59  ;;  %v4581_v59 = vld [vmem:[%s8004_s5 + $0x1e0] sm:$0xff]  ;;  %v6112_v60 = vmov 0.0|0.0   ;;  %v4550_v0 = vld [vmem:[%s8004_s5 + $0x108] sm:$0xff]  ;;  %v4583_v46 = vld [vmem:[%s8004_s5 + $0x1f0] sm:$0xff] }
 0x9ff   : > { %5596 = vmatprep.subr.bf16.mxu1 %v5595_v8  ;;  %5619 = vmatprep.subr.bf16.mxu0 %v6112_v60 }
 0xa02   : > { %5598 = vmatpush1.bf16.msra.mxu1 %v5597_v13 }
 0xa03   : > { %5600 = vmatprep.subr.bf16.mxu1 %v5599_v14 }
 0xa06   : > { %5602 = vmatpush1.bf16.msra.mxu1 %v5601_v19 }
 0xa07   : > { %5604 = vmatprep.subr.bf16.mxu1 %v5603_v20 }
 0xa0a   : > { %5606 = vmatpush1.bf16.msra.mxu1 %v5605_v26 }
 0xa0b   : > { %5608 = vmatprep.subr.bf16.mxu1 %v5607_v27 }
 0xa0e   : > { %5610 = vmatpush1.bf16.msra.mxu1 %v5609_v32 }
 0xa0f   : > { %5612 = vmatprep.subr.bf16.mxu1 %v5611_v33 }
 0xa12   : > { %5614 = vmatpush1.bf16.msra.mxu1 %v5613_v38 }
 0xa13   : > { %5616 = vmatprep.subr.bf16.mxu1 %v5615_v39 }
 0xa16   : > { %5618 = vmatpush1.bf16.msra.mxu1 %v5617_v42 }
 0xa17   : > { %4543 = vmatprep.subr.msk.mxu1 %vm1714_vm1, %v4542_v44 }
 0xa1a   : > { %4544 = vmatpush1.msk.msra.mxu1 %vm1714_vm1, %v4541_v49 }
 0xa1b   : > { %2603 = vmatmul.mubr.f32.vlgmr.msra.gmra.mrb[2].mxu1 %v2518_v54  ;;  %5709 = vmatprep.subr.bf16.mxu1 %v6112_v60 }
 0xa1c   : > { %4546 = vmatprep.mubr.msk.f32.mxu1 %vm1606_vm3, %v2525_v56  ;;  %vm2671_vm3 = vcmask 1047744  }
 0xa1f   : > { %2609 = vmatmul.mubr.f32.gmra.mrb[4].mxu1 %v2523_v57  ;;  %v4547_v57 = vld [vmem:[%s8004_s5 + $0xf0] sm:$0xff] }
 0xa20   : > { %v5620_v61 = vpack.c.bf16 %v4548_v58, %v4547_v57  ;;  %v4568_v57 = vld [vmem:[%s8004_s5 + $0x198] sm:$0xff]  ;;  %v4601_v58 = vld [vmem:[%s8004_s5 + $0x280] sm:$0xff] }
 0xa22   : > { %5621 = vmatpush1.bf16.msra.mxu0 %v5620_v61 }
 0xa23   : > { %5622 = vmatprep.subr.bf16.mxu0 %v6112_v60 }
 0xaee   : > { %v2604_v3 = vpop.f32.mrb[2].mxu1 }
 0xaef   : > { %v2631_v63 = vadd.f32 %v2624_v2, %v2604_v3  ;;  %v2606_v5 = vpop.f32.mrb[3].mxu1 }
 0xaf0   : > { %v2632_v1 = vadd.f32 %v2628_v45, %v2606_v5 }
 0xaf1   : > { %v2639_v8 = vrot.slane %v2631_v63, 6 }
 0xaf2   : > { %v2640_v9 = vrot.slane %v2632_v1, 6  ;;  %v2679_v4 = vcombine.low %v2631_v63, %v2632_v1  ;;  %v2610_v6 = vpop.f32.mrb[4].mxu1  ;;  %v5623_v63 = vpack.c.bf16 %v4550_v0, %v4549_v62  ;;  %v4551_v1 = vld [vmem:[%s8004_s5 + $0x110] sm:$0xff]  ;;  %v4569_v62 = vld [vmem:[%s8004_s5 + $0x1a0] sm:$0xff]  ;;  %v4570_v0 = vld [vmem:[%s8004_s5 + $0x1a8] sm:$0xff] }
 0xaf3   : > { %v2633_v10 = vadd.f32 %v2624_v2, %v2610_v6  ;;  %2645 = vrot.lane.b32.xlu0 %v2639_v8, %s6108_s29  ;;  %v2612_v11 = vpop.f32.mrb[5].mxu1  ;;  %v5710_v2 = vpack.c.bf16 %v4582_v24, %v4581_v59  ;;  %v4602_v59 = vld [vmem:[%s8004_s5 + $0x288] sm:$0xff] }
 0xaf4   : > { %v2686_v12 = vrot.slane %v2679_v4, %v2685_v7  ;;  %v2634_v13 = vadd.f32 %v2628_v45, %v2612_v11  ;;  %2647 = vrot.lane.b32.xlu1 %v2640_v9, %s6108_s29  ;;  %v4584_v45 = vld [vmem:[%s8004_s5 + $0x1f8] sm:$0xff]  ;;  %v4586_v4 = vld [vmem:[%s8004_s5 + $0x208] sm:$0xff]  ;;  %5624 = vmatpush1.bf16.msra.mxu0 %v5623_v63  ;;  %v4553_v11 = vld [vmem:[%s8004_s5 + $0x120] sm:$0xff]  ;;  %v5740_v24 = vpack.c.bf16 %v4602_v59, %v4601_v58 }
 0xaf5   : > { %v2641_v14 = vrot.slane %v2633_v10, 6  ;;  %5711 = vmatpush1.bf16.msra.mxu1 %v5710_v2  ;;  %5625 = vmatprep.subr.bf16.mxu0 %v6112_v60  ;;  %v4603_v2 = vld [vmem:[%s8004_s5 + $0x290] sm:$0xff] }
 0xaf6   : > { %v2643_v15 = vrot.slane %v2634_v13, 6  ;;  %v2707_v16 = vcombine.high %v2633_v10, %v2634_v13  ;;  %v2687_v17 = vcombine.high %v2686_v12, %v2686_v12  ;;  %v2737_v18 = vrot.slane %v2686_v12, %v2685_v7  ;;  %5712 = vmatprep.subr.bf16.mxu1 %v6112_v60  ;;  %v4554_v12 = vld [vmem:[%s8004_s5 + $0x128] sm:$0xff]  ;;  %v4587_v13 = vld [vmem:[%s8004_s5 + $0x210] sm:$0xff] }
 0xaf7   : > { %v2642_v19 = vsel %vm2515_vm9, %v2639_v8, %v2641_v14  ;;  %v4552_v8 = vld [vmem:[%s8004_s5 + $0x118] sm:$0xff] }
 0xaf8   : > { %v2714_v20 = vrot.slane %v2707_v16, %v2685_v7  ;;  %v2694_v21 = vrot.slane %v2687_v17, %v2685_v7  ;;  %v2738_v22 = vcombine.high %v2737_v18, %v2737_v18  ;;  %v2644_v23 = vsel %vm2515_vm9, %v2640_v9, %v2643_v15  ;;  %v4585_v9 = vld [vmem:[%s8004_s5 + $0x200] sm:$0xff]  ;;  %v4555_v17 = vld [vmem:[%s8004_s5 + $0x130] sm:$0xff]  ;;  %v4556_v18 = vld [vmem:[%s8004_s5 + $0x138] sm:$0xff] }
 0xaf9   : > { %vm2677_vm9 = vcmask 713728   ;;  %v5626_v6 = vpack.c.bf16 %v4552_v8, %v4551_v1  ;;  %v5716_v10 = vpack.c.bf16 %v4586_v4, %v4585_v9  ;;  %v4605_v1 = vld [vmem:[%s8004_s5 + $0x2a0] sm:$0xff]  ;;  %v4606_v9 = vld [vmem:[%s8004_s5 + $0x2a8] sm:$0xff] }
 0xafa   : > { %2695 = vrot.lane.b32.xlu0 %v2694_v21, %s6108_s29  ;;  %2739 = vrot.lane.b32.xlu1 %v2738_v22, %s6108_s29  ;;  %v2721_v25 = vrot.slane %v2714_v20, %v2685_v7  ;;  %v2746_v26 = vcombine.high %v2714_v20, %v2714_v20  ;;  %v4590_v20 = vld [vmem:[%s8004_s5 + $0x228] sm:$0xff]  ;;  %v5632_v21 = vpack.c.bf16 %v4556_v18, %v4555_v17  ;;  %v4575_v18 = vld [vmem:[%s8004_s5 + $0x1d0] sm:$0xff] }
 0xafb   : > { %5627 = vmatpush1.bf16.msra.mxu0 %v5626_v6  ;;  %v5746_v6 = vpack.c.bf16 %v4606_v9, %v4605_v1 }
 0xafc   : > { %v2722_v27 = vcombine.high %v2721_v25, %v2721_v25  ;;  %v2753_v28 = vrot.slane %v2746_v26, %v2685_v7  ;;  %v5713_v7 = vpack.c.bf16 %v4584_v45, %v4583_v46  ;;  %5628 = vmatprep.subr.bf16.mxu0 %v6112_v60  ;;  %v4558_v25 = vld [vmem:[%s8004_s5 + $0x148] sm:$0xff]  ;;  %v4591_v26 = vld [vmem:[%s8004_s5 + $0x230] sm:$0xff]  ;;  %v5653_v46 = vpack.c.bf16 %v4570_v0, %v4569_v62  ;;  %v4604_v45 = vld [vmem:[%s8004_s5 + $0x298] sm:$0xff] }
 0xafd   : > { %v2848_v0 = vld [vmem:[%s8004_s5 + $0x10] sm:$0xff] }
 0xafe   : > { %2649 = vrot.lane.b32.xlu0 %v2642_v19, %s6108_s29  ;;  %2651 = vrot.lane.b32.xlu1 %v2644_v23, %s6108_s29  ;;  %v4589_v19 = vld [vmem:[%s8004_s5 + $0x220] sm:$0xff] }
 0xaff   : > { %5714 = vmatpush1.bf16.msra.mxu1 %v5713_v7  ;;  %v5722_v22 = vpack.c.bf16 %v4590_v20, %v4589_v19  ;;  %v4557_v23 = vld [vmem:[%s8004_s5 + $0x140] sm:$0xff]  ;;  %v4572_v7 = vld [vmem:[%s8004_s5 + $0x1b8] sm:$0xff] }
 0xb00   : > { %5715 = vmatprep.subr.bf16.mxu1 %v6112_v60  ;;  %v4576_v19 = vld [vmem:[%s8004_s5 + $0x1d8] sm:$0xff] }
 0xb01   : > { %v5662_v20 = vpack.c.bf16 %v4576_v19, %v4575_v18  ;;  %v4650_v18 = vld [vmem:[%s8004_s5 + $0x3e8] sm:$0xff] }
 0xb02   : > { %2723 = vrot.lane.b32.xlu0 %v2722_v27, %s6108_s29  ;;  %2754 = vrot.lane.b32.xlu1 %v2753_v28, %s6108_s29  ;;  %v4592_v27 = vld [vmem:[%s8004_s5 + $0x238] sm:$0xff]  ;;  %v5635_v28 = vpack.c.bf16 %v4558_v25, %v4557_v23  ;;  %v4610_v23 = vld [vmem:[%s8004_s5 + $0x2c8] sm:$0xff] }
 0xb03   : > { %5717 = vmatpush1.bf16.msra.mxu1 %v5716_v10  ;;  %v4573_v10 = vld [vmem:[%s8004_s5 + $0x1c0] sm:$0xff] }
 0xb04   : > { %5718 = vmatprep.subr.bf16.mxu1 %v6112_v60 }
 0xb06   : > { %2653 = vrot.lane.b32.xlu0 %v2641_v14, %s6108_s29  ;;  %2655 = vrot.lane.b32.xlu1 %v2643_v15, %s6108_s29  ;;  %v4588_v14 = vld [vmem:[%s8004_s5 + $0x218] sm:$0xff]  ;;  %v5629_v15 = vpack.c.bf16 %v4554_v12, %v4553_v11  ;;  %v4574_v11 = vld [vmem:[%s8004_s5 + $0x1c8] sm:$0xff] }
 0xb07   : > { %v5719_v16 = vpack.c.bf16 %v4588_v14, %v4587_v13  ;;  %v4607_v12 = vld [vmem:[%s8004_s5 + $0x2b0] sm:$0xff]  ;;  %v5659_v13 = vpack.c.bf16 %v4574_v11, %v4573_v10  ;;  %v4608_v14 = vld [vmem:[%s8004_s5 + $0x2b8] sm:$0xff] }
 0xb08   : > { %5630 = vmatpush1.bf16.msra.mxu0 %v5629_v15 }
 0xb09   : > { %5720 = vmatpush1.bf16.msra.mxu1 %v5719_v16  ;;  %5631 = vmatprep.subr.bf16.mxu0 %v6112_v60  ;;  %v5749_v16 = vpack.c.bf16 %v4608_v14, %v4607_v12 }
 0xb0a   : > { %5721 = vmatprep.subr.bf16.mxu1 %v6112_v60 }
 0xb0c   : > { %5633 = vmatpush1.bf16.msra.mxu0 %v5632_v21 }
 0xb0d   : > { %5723 = vmatpush1.bf16.msra.mxu1 %v5722_v22  ;;  %5634 = vmatprep.subr.bf16.mxu0 %v6112_v60  ;;  %v4609_v22 = vld [vmem:[%s8004_s5 + $0x2c0] sm:$0xff] }
 0xb0e   : > { %5724 = vmatprep.subr.bf16.mxu1 %v6112_v60 }
 0xb10   : > { %5636 = vmatpush1.bf16.msra.mxu0 %v5635_v28  ;;  %v5752_v28 = vpack.c.bf16 %v4610_v23, %v4609_v22 }
 0xb11   : > { %5637 = vmatprep.subr.bf16.mxu0 %v6112_v60 }
 0xb65   : > { %v2646_v29 = vpop.permute.xlu0 %2645 }
 0xb66   : > { %2668 = vst.msk [vmem:[#allocation4] sm:$0xfc] %vm2667_vm0, %v2646_v29  ;;  %v2648_v30 = vpop.permute.xlu1 %2647  ;;  %vm2797_vm0 = vcmask 818880  }
 0xb67   : > { %v2658_v31 = vsel %vm2657_vm10, %v2646_v29, %v2648_v30  ;;  %v5725_v29 = vpack.c.bf16 %v4592_v27, %v4591_v26  ;;  %v4559_v30 = vld [vmem:[%s8004_s5 + $0x150] sm:$0xff] }
 0xb68   : > { %2670 = vst.msk [vmem:[#allocation4 + $0x8] sm:$0xfc] %vm2669_vm11, %v2658_v31  ;;  %v4560_v31 = vld [vmem:[%s8004_s5 + $0x158] sm:$0xff]  ;;  %vm2800_vm11 = vcmask 814784  }
 0xb69   : > { %v5638_v34 = vpack.c.bf16 %v4560_v31, %v4559_v30  ;;  %5726 = vmatpush1.bf16.msra.mxu1 %v5725_v29 }
 0xb6a   : > { %5727 = vmatprep.subr.bf16.mxu1 %v6112_v60 }
 0xb6b   : > { %5639 = vmatpush1.bf16.msra.mxu0 %v5638_v34 }
 0xb6c   : > { %v2696_v32 = vpop.permute.xlu0 %2695  ;;  %v2740_v33 = vpop.permute.xlu1 %2739  ;;  %5640 = vmatprep.subr.bf16.mxu0 %v6112_v60 }
 0xb6d   : > { %v2697_v35 = vrot.slane %v2696_v32, 7  ;;  %v2741_v36 = vrot.slane %v2740_v33, 7 }
 0xb6f   : > { %v2698_v37 = vsel %vm2657_vm10, %v2697_v35, %v2696_v32  ;;  %v2742_v38 = vsel %vm2657_vm10, %v2741_v36, %v2740_v33  ;;  %v4593_v32 = vld [vmem:[%s8004_s5 + $0x240] sm:$0xff]  ;;  %v4594_v33 = vld [vmem:[%s8004_s5 + $0x248] sm:$0xff] }
 0xb70   : > { %2705 = vst.msk [vmem:[#allocation4 + $0x1] ss:$8 sm:$0x3] %vm7137_vm2, %v2698_v37  ;;  %2744 = vst.msk [vmem:[#allocation4] ss:$8 sm:$0x3] %vm7137_vm2, %v2742_v38  ;;  %v2650_v39 = vpop.permute.xlu0 %2649  ;;  %v2652_v40 = vpop.permute.xlu1 %2651  ;;  %v5728_v35 = vpack.c.bf16 %v4594_v33, %v4593_v32 }
 0xb71   : > { %2672 = vst.msk [vmem:[#allocation4 + $0x10] sm:$0xff] %vm2671_vm3, %v2650_v39  ;;  %v2659_v41 = vsel %vm2657_vm10, %v2650_v39, %v2652_v40  ;;  %v4561_v36 = vld [vmem:[%s8004_s5 + $0x160] sm:$0xff]  ;;  %v4562_v37 = vld [vmem:[%s8004_s5 + $0x168] sm:$0xff]  ;;  %v4595_v38 = vld [vmem:[%s8004_s5 + $0x250] sm:$0xff]  ;;  %vm2840_vm3 = vcmask 913184  }
 0xb72   : > { %2674 = vst.msk [vmem:[#allocation4 + $0x18] sm:$0xff] %vm2673_vm4, %v2659_v41  ;;  %v4596_v39 = vld [vmem:[%s8004_s5 + $0x258] sm:$0xff]  ;;  %v5641_v40 = vpack.c.bf16 %v4562_v37, %v4561_v36  ;;  %5729 = vmatpush1.bf16.msra.mxu1 %v5728_v35  ;;  %vm2820_vm4 = vcmask 93184  }
 0xb73   : > { %v5731_v41 = vpack.c.bf16 %v4596_v39, %v4595_v38  ;;  %5730 = vmatprep.subr.bf16.mxu1 %v6112_v60 }
 0xb74   : > { %v2724_v42 = vpop.permute.xlu0 %2723  ;;  %v2755_v43 = vpop.permute.xlu1 %2754  ;;  %5642 = vmatpush1.bf16.msra.mxu0 %v5641_v40 }
 0xb75   : > { %v2725_v44 = vrot.slane %v2724_v42, 7  ;;  %v2756_v47 = vrot.slane %v2755_v43, 7  ;;  %5643 = vmatprep.subr.bf16.mxu0 %v6112_v60 }
 0xb76   : > { %5732 = vmatpush1.bf16.msra.mxu1 %v5731_v41 }
 0xb77   : > { %v2726_v48 = vsel %vm2657_vm10, %v2725_v44, %v2724_v42  ;;  %v2757_v49 = vsel %vm2657_vm10, %v2756_v47, %v2755_v43  ;;  %v2782_v50 = vld [vmem:[#allocation4 + $0x8] sm:$0xff]  ;;  %v2762_v55 = vld [vmem:[#allocation4] sm:$0xff]  ;;  %v4564_v43 = vld [vmem:[%s8004_s5 + $0x178] sm:$0xff]  ;;  %5733 = vmatprep.subr.bf16.mxu1 %v6112_v60 }
 0xb78   : > { %2729 = vst.msk [vmem:[#allocation4 + $0x22] ss:$8 sm:$0x3] %vm7137_vm2, %v2726_v48  ;;  %2760 = vst.msk [vmem:[#allocation4 + $0x23] ss:$8 sm:$0x3] %vm7137_vm2, %v2757_v49  ;;  %2788 = vrot.lane.b32.xlu0 %v2782_v50, %s6108_s29  ;;  %v2654_v51 = vpop.permute.xlu0 %2653  ;;  %v2656_v52 = vpop.permute.xlu1 %2655 }
 0xb79   : > { %2676 = vst.msk [vmem:[#allocation4 + $0x20] sm:$0x3] %vm2675_vm5, %v2654_v51  ;;  %v2660_v53 = vsel %vm2657_vm10, %v2654_v51, %v2656_v52  ;;  %v2783_v54 = vld [vmem:[#allocation4 + $0x18] sm:$0xff]  ;;  %v2763_v56 = vld [vmem:[#allocation4 + $0x10] sm:$0xff]  ;;  %v4563_v42 = vld [vmem:[%s8004_s5 + $0x170] sm:$0xff]  ;;  %vm2777_vm10 = vcmask 195680  }
 0xb7a   : > { %2678 = vst.msk [vmem:[#allocation4 + $0x28] sm:$0x3] %vm2677_vm9, %v2660_v53  ;;  %2790 = vrot.lane.b32.xlu1 %v2783_v54, %s6108_s29  ;;  %v4597_v44 = vld [vmem:[%s8004_s5 + $0x260] sm:$0xff]  ;;  %v4598_v47 = vld [vmem:[%s8004_s5 + $0x268] sm:$0xff]  ;;  %v5644_v48 = vpack.c.bf16 %v4564_v43, %v4563_v42  ;;  %v4599_v52 = vld [vmem:[%s8004_s5 + $0x270] sm:$0xff]  ;;  %vm2817_vm2 = vcmask 97280  }
 0xb7b   : > { %v5734_v49 = vpack.c.bf16 %v4598_v47, %v4597_v44  ;;  %v4565_v50 = vld [vmem:[%s8004_s5 + $0x180] sm:$0xff]  ;;  %v4566_v51 = vld [vmem:[%s8004_s5 + $0x188] sm:$0xff]  ;;  %v4600_v53 = vld [vmem:[%s8004_s5 + $0x278] sm:$0xff]  ;;  %vm2929_vm5 = vcmask 916480   ;;  %vm3507_vm9 = vcmask 833590  }
 0xb7c   : > { %2768 = vrot.lane.b32.xlu0 %v2762_v55, %s6107_s28  ;;  %5645 = vmatpush1.bf16.msra.mxu0 %v5644_v48  ;;  %v5647_v54 = vpack.c.bf16 %v4566_v51, %v4565_v50  ;;  %v5737_v55 = vpack.c.bf16 %v4600_v53, %v4599_v52  ;;  %v2846_v42 = vld [vmem:[%s8004_s5] sm:$0xff]  ;;  %v2847_v43 = vld [vmem:[%s8004_s5 + $0x8] sm:$0xff] }
 0xb7d   : > { %5735 = vmatpush1.bf16.msra.mxu1 %v5734_v49  ;;  %5646 = vmatprep.subr.bf16.mxu0 %v6112_v60  ;;  %v4645_v50 = vld [vmem:[%s8004_s5 + $0x3c0] sm:$0xff]  ;;  %v4646_v51 = vld [vmem:[%s8004_s5 + $0x3c8] sm:$0xff] }
 0xb7e   : > { %2770 = vrot.lane.b32.xlu1 %v2763_v56, %s6107_s28  ;;  %v4567_v56 = vld [vmem:[%s8004_s5 + $0x190] sm:$0xff]  ;;  %5736 = vmatprep.subr.bf16.mxu1 %v6112_v60  ;;  %v5800_v58 = vpack.c.bf16 %v4646_v51, %v4645_v50  ;;  %v2858_v50 = vld [vmem:[%s8004_s5 + $0x60] sm:$0xff]  ;;  %v2859_v51 = vld [vmem:[%s8004_s5 + $0x68] sm:$0xff] }
 0xb7f   : > { %v5650_v61 = vpack.c.bf16 %v4568_v57, %v4567_v56  ;;  %v5665_v57 = vpack.c.bf16 %v2847_v43, %v2846_v42  ;;  %v2856_v42 = vld [vmem:[%s8004_s5 + $0x50] sm:$0xff]  ;;  %v2857_v43 = vld [vmem:[%s8004_s5 + $0x58] sm:$0xff] }
 0xb80   : > { %v2764_v3 = vld [vmem:[#allocation4 + $0x20] sm:$0xf]  ;;  %5648 = vmatpush1.bf16.msra.mxu0 %v5647_v54 }
 0xb81   : > { %v2784_v5 = vld [vmem:[#allocation4 + $0x28] sm:$0xf]  ;;  %5738 = vmatpush1.bf16.msra.mxu1 %v5737_v55  ;;  %5649 = vmatprep.subr.bf16.mxu0 %v6112_v60 }
 0xb82   : > { %2772 = vrot.lane.b32.xlu1 %v2764_v3, %s6107_s28  ;;  %2792 = vrot.lane.b32.xlu0 %v2784_v5, %s6108_s29  ;;  %v5743_v3 = vpack.c.bf16 %v4604_v45, %v4603_v2  ;;  %v4571_v5 = vld [vmem:[%s8004_s5 + $0x1b0] sm:$0xff]  ;;  %v2849_v2 = vld [vmem:[%s8004_s5 + $0x18] sm:$0xff] }
 0xb83   : > { %5739 = vmatprep.subr.bf16.mxu1 %v6112_v60  ;;  %v5656_v8 = vpack.c.bf16 %v4572_v7, %v4571_v5  ;;  %v4648_v45 = vld [vmem:[%s8004_s5 + $0x3d8] sm:$0xff]  ;;  %v5668_v1 = vpack.c.bf16 %v2849_v2, %v2848_v0  ;;  %v2862_v0 = vld [vmem:[%s8004_s5 + $0x80] sm:$0xff]  ;;  %v2863_v2 = vld [vmem:[%s8004_s5 + $0x88] sm:$0xff] }
 0xb84   : > { %5651 = vmatpush1.bf16.msra.mxu0 %v5650_v61 }
 0xb85   : > { %5741 = vmatpush1.bf16.msra.mxu1 %v5740_v24  ;;  %5652 = vmatprep.subr.bf16.mxu0 %v6112_v60 }
 0xb86   : > { %5742 = vmatprep.subr.bf16.mxu1 %v6112_v60 }
 0xb88   : > { %5654 = vmatpush1.bf16.msra.mxu0 %v5653_v46  ;;  %v4647_v46 = vld [vmem:[%s8004_s5 + $0x3d0] sm:$0xff] }
 0xb89   : > { %5744 = vmatpush1.bf16.msra.mxu1 %v5743_v3  ;;  %5655 = vmatprep.subr.bf16.mxu0 %v6112_v60  ;;  %v5803_v10 = vpack.c.bf16 %v4648_v45, %v4647_v46  ;;  %v4661_v46 = vld [vmem:[%s8004_s5 + $0x440] sm:$0xff]  ;;  %v4662_v45 = vld [vmem:[%s8004_s5 + $0x448] sm:$0xff] }
 0xb8a   : > { %5745 = vmatprep.subr.bf16.mxu1 %v6112_v60 }
 0xb8c   : > { %5657 = vmatpush1.bf16.msra.mxu0 %v5656_v8 }
 0xb8d   : > { %5747 = vmatpush1.bf16.msra.mxu1 %v5746_v6  ;;  %5658 = vmatprep.subr.bf16.mxu0 %v6112_v60 }
 0xb8e   : > { %5748 = vmatprep.subr.bf16.mxu1 %v6112_v60 }
 0xb90   : > { %5660 = vmatpush1.bf16.msra.mxu0 %v5659_v13  ;;  %v2850_v13 = vld [vmem:[%s8004_s5 + $0x20] sm:$0xff] }
 0xb91   : > { %5750 = vmatpush1.bf16.msra.mxu1 %v5749_v16  ;;  %5661 = vmatprep.subr.bf16.mxu0 %v6112_v60  ;;  %v2851_v16 = vld [vmem:[%s8004_s5 + $0x28] sm:$0xff] }
 0xb92   : > { %5751 = vmatprep.subr.bf16.mxu1 %v6112_v60 }
 0xb94   : > { %5663 = vmatpush1.bf16.msra.mxu0 %v5662_v20 }
 0xb95   : > { %5753 = vmatpush1.bf16.msra.mxu1 %v5752_v28  ;;  %5664 = vmatprep.subr.bf16.mxu0 %v6112_v60  ;;  %v2853_v28 = vld [vmem:[%s8004_s5 + $0x38] sm:$0xff] }
 0xb96   : > { %5799 = vmatprep.subr.bf16.mxu1 %v6112_v60 }
 0xbea   : > { %v2789_v63 = vpop.permute.xlu0 %2788 }
 0xbeb   : > { %2798 = vst.msk [vmem:[#allocation4 + $0x8] sm:$0xff] %vm2797_vm0, %v2789_v63 }
 0xbec   : > { %v2791_v4 = vpop.permute.xlu1 %2790 }
 0xbed   : > { %2799 = vst.msk [vmem:[#allocation4 + $0x18] sm:$0xff] %vm2797_vm0, %v2791_v4  ;;  %vm3526_vm0 = vcmask 41984  }
 0xbee   : > { %v2769_v15 = vpop.permute.xlu0 %2768 }
 0xbef   : > { %2778 = vst.msk [vmem:[#allocation4] sm:$0xff] %vm2777_vm10, %v2769_v15 }
 0xbf0   : > { %v2771_v17 = vpop.permute.xlu1 %2770 }
 0xbf1   : > { %2779 = vst.msk [vmem:[#allocation4 + $0x10] sm:$0xff] %vm2777_vm10, %v2771_v17  ;;  %v4649_v17 = vld [vmem:[%s8004_s5 + $0x3e0] sm:$0xff]  ;;  %vm6115_vm10 = vmmov 1  }
 0xbf2   : > { %v2822_v21 = vld [vmem:[#allocation4 + $0x8] sm:$0xff] }
 0xbf3   : > { %2828 = vrot.lane.b32.xlu0 %v2822_v21, %s6113_s30 }
 0xbf4   : > { %v2793_v25 = vpop.permute.xlu0 %2792  ;;  %v2773_v26 = vpop.permute.xlu1 %2772  ;;  %v2823_v27 = vld [vmem:[#allocation4 + $0x18] sm:$0xff] }
 0xbf5   : > { %2801 = vst.msk [vmem:[#allocation4 + $0x28] sm:$0xf] %vm2800_vm11, %v2793_v25  ;;  %2830 = vrot.lane.b32.xlu1 %v2823_v27, %s6113_s30  ;;  %v5671_v25 = vpack.c.bf16 %v2851_v16, %v2850_v13  ;;  %v2852_v27 = vld [vmem:[%s8004_s5 + $0x30] sm:$0xff]  ;;  %vm7790_vm11 = vmpackc.low %vm1714_vm1, %vm6115_vm10 }
 0xbf6   : > { %2781 = vst.msk [vmem:[#allocation4 + $0x20] sm:$0xf] %vm2780_vm12, %v2773_v26  ;;  %v2802_v29 = vld [vmem:[#allocation4] sm:$0xff]  ;;  %v5806_v26 = vpack.c.bf16 %v4650_v18, %v4649_v17  ;;  %v2868_v16 = vld [vmem:[%s8004_s5 + $0xb0] sm:$0xff]  ;;  %v2869_v17 = vld [vmem:[%s8004_s5 + $0xb8] sm:$0xff]  ;;  %vm3581_vm12 = vcmask 883712  }
 0xbf7   : > { %2808 = vrot.lane.b32.xlu0 %v2802_v29, %s6114_s14  ;;  %v4667_v18 = vld [vmem:[%s8004_s5 + $0x470] sm:$0xff] }
 0xbf8   : > { %v2803_v30 = vld [vmem:[#allocation4 + $0x10] sm:$0xff] }
 0xbf9   : > { %2810 = vrot.lane.b32.xlu1 %v2803_v30, %s6114_s14 }
 0xbfc   : > { %v2824_v31 = vld [vmem:[#allocation4 + $0x28] sm:$0xf] }
 0xbfd   : > { %v2804_v32 = vld [vmem:[#allocation4 + $0x20] sm:$0xf]  ;;  %2832 = vrot.lane.b32.xlu0 %v2824_v31, %s6113_s30  ;;  %v4651_v31 = vld [vmem:[%s8004_s5 + $0x3f0] sm:$0xff]  ;;  %s8029_s30 = sshll.u32 %s8031_s18, 4 }
 0xbfe   : > { %2812 = vrot.lane.b32.xlu1 %v2804_v32, %s6114_s14  ;;  %v4652_v32 = vld [vmem:[%s8004_s5 + $0x3f8] sm:$0xff]  ;;  %s401_s22 = scalar_lea.vmem %s8010_s11, %s8029_s30 }
 0xc65   : > { %v2829_v33 = vpop.permute.xlu0 %2828 }
 0xc66   : > { %2838 = vst.msk [vmem:[#allocation4 + $0x8] sm:$0xff] %vm2837_vm15, %v2829_v33  ;;  %v5674_v33 = vpack.c.bf16 %v2853_v28, %v2852_v27 }
 0xc67   : > { %v2831_v34 = vpop.permute.xlu1 %2830 }
 0xc68   : > { %2839 = vst.msk [vmem:[#allocation4 + $0x18] sm:$0xff] %vm2837_vm15, %v2831_v34  ;;  %v5809_v34 = vpack.c.bf16 %v4652_v32, %v4651_v31  ;;  %v4671_v31 = vld [vmem:[%s8004_s5 + $0x490] sm:$0xff]  ;;  %v4672_v32 = vld [vmem:[%s8004_s5 + $0x498] sm:$0xff]  ;;  %vm3872_vm15 = vcmask 416792  }
 0xc69   : > { %v2809_v35 = vpop.permute.xlu0 %2808 }
 0xc6a   : > { %2818 = vst.msk [vmem:[#allocation4] sm:$0xff] %vm2817_vm2, %v2809_v35  ;;  %v2854_v35 = vld [vmem:[%s8004_s5 + $0x40] sm:$0xff] }
 0xc6b   : > { %v2811_v36 = vpop.permute.xlu1 %2810 }
 0xc6c   : > { %2819 = vst.msk [vmem:[#allocation4 + $0x10] sm:$0xff] %vm2817_vm2, %v2811_v36  ;;  %v2855_v36 = vld [vmem:[%s8004_s5 + $0x48] sm:$0xff]  ;;  %vm3877_vm2 = vcmask 415774  }
 0xc6d   : > { %v2877_v37 = vld [vmem:[#allocation4 + $0x8] sm:$0xfe] }
 0xc6e   : > { %v3090_v38 = vld [vmem:[#allocation4 + $0x8] sm:$0xfc]  ;;  %v2920_v44 = vrot.slane %v2877_v37, 1  ;;  %v4653_v37 = vld [vmem:[%s8004_s5 + $0x400] sm:$0xff] }
 0xc6f   : > { %v2833_v39 = vpop.permute.xlu0 %2832  ;;  %v7377_v41 = vld [vmem:[#allocation4 + $0x18] sm:$0xff]  ;;  %v3131_v48 = vrot.slane %v3090_v38, 2  ;;  %v3354_v5 = vld [vmem:[#allocation4 + $0x8] sm:$0xf0]  ;;  %v4654_v38 = vld [vmem:[%s8004_s5 + $0x408] sm:$0xff] }
 0xc70   : > { %v2813_v40 = vpop.permute.xlu1 %2812  ;;  %2841 = vst.msk [vmem:[#allocation4 + $0x28] sm:$0xf] %vm2840_vm3, %v2833_v39  ;;  %v2921_v47 = vrot.slane %v7377_v41, 1  ;;  %v3132_v49 = vrot.slane %v7377_v41, 2  ;;  %v3396_v15 = vrot.slane %v7377_v41, 4  ;;  %v3395_v23 = vrot.slane %v3354_v5, 4 }
 0xc71   : > { %2821 = vst.msk [vmem:[#allocation4 + $0x20] sm:$0xf] %vm2820_vm4, %v2813_v40  ;;  %v2876_v52 = vld [vmem:[#allocation4] sm:$0xfe]  ;;  %v2843_v29 = vld [vmem:[#allocation4 + $0x8] sm:$0xff]  ;;  %v5677_v39 = vpack.c.bf16 %v2855_v36, %v2854_v35  ;;  %v5812_v40 = vpack.c.bf16 %v4654_v38, %v4653_v37  ;;  %v2874_v35 = vld [vmem:[%s8004_s5 + $0xe0] sm:$0xff] }
 0xc72   : > { %v3089_v53 = vld [vmem:[#allocation4] sm:$0xfc]  ;;  %v2922_v54 = vsel %vm1697_vm6, %v2920_v44, %v2921_v47  ;;  %v3133_v55 = vsel %vm1929_vm7, %v3131_v48, %v3132_v49  ;;  %v2917_v59 = vrot.slane %v2876_v52, 1  ;;  %v3397_v30 = vsel %vm1714_vm1, %v3395_v23, %v3396_v15  ;;  %v4655_v44 = vld [vmem:[%s8004_s5 + $0x410] sm:$0xff]  ;;  %v4657_v52 = vld [vmem:[%s8004_s5 + $0x420] sm:$0xff] }
 0xc73   : > { %4577 = vmatprep.mubr.msk.f32.mxu0 %vm2929_vm5, %v2922_v54  ;;  %4611 = vmatprep.mubr.msk.f32.mxu1 %vm2929_vm5, %v3133_v55  ;;  %v7397_v56 = vld [vmem:[#allocation4 + $0x10] sm:$0xff]  ;;  %v3128_v24 = vrot.slane %v3089_v53, 2  ;;  %v5680_v48 = vpack.c.bf16 %v2857_v43, %v2856_v42  ;;  %v4658_v53 = vld [vmem:[%s8004_s5 + $0x428] sm:$0xff]  ;;  %v5683_v54 = vpack.c.bf16 %v2859_v51, %v2858_v50  ;;  %v2864_v5 = vld [vmem:[%s8004_s5 + $0x90] sm:$0xff]  ;;  %vm3875_vm3 = vcmask 410649  }
 0xc74   : > { %v2918_v61 = vrot.slane %v7397_v56, 1  ;;  %v3129_v62 = vrot.slane %v7397_v56, 2  ;;  %v5818_v55 = vpack.c.bf16 %v4658_v53, %v4657_v52  ;;  %v2871_v23 = vld [vmem:[%s8004_s5 + $0xc8] sm:$0xff]  ;;  %v4673_v37 = vld [vmem:[%s8004_s5 + $0x4a0] sm:$0xff]  ;;  %v4613_v42 = vld [vmem:[%s8004_s5 + $0x2d0] sm:$0xff]  ;;  %vm3896_vm4 = vcmask 17408  }
 0xc75   : > { %v2875_v36 = vld [vmem:[%s8004_s5 + $0xe8] sm:$0xff]  ;;  %v4615_v53 = vld [vmem:[%s8004_s5 + $0x2e0] sm:$0xff] }
 0xc76   : > { %v2919_v3 = vsel %vm1697_vm6, %v2917_v59, %v2918_v61  ;;  %v3130_v63 = vsel %vm1929_vm7, %v3128_v24, %v3129_v62  ;;  %v4659_v59 = vld [vmem:[%s8004_s5 + $0x430] sm:$0xff]  ;;  %v4674_v38 = vld [vmem:[%s8004_s5 + $0x4a8] sm:$0xff] }
 0xc77   : > { %2999 = vmatmul.mubr.f32.vlgmr.msra.gmra.mrb[2].mxu0 %v2919_v3  ;;  %3209 = vmatmul.mubr.f32.vlgmr.msra.gmra.mrb[6].mxu1 %v3130_v63  ;;  %v2879_v7 = vld [vmem:[#allocation4 + $0x28] sm:$0x1]  ;;  %v5689_v3 = vpack.c.bf16 %v2863_v2, %v2862_v0  ;;  %v5824_v63 = vpack.c.bf16 %v4662_v45, %v4661_v46  ;;  %v3353_v43 = vld [vmem:[#allocation4] sm:$0xf0]  ;;  %v4618_v46 = vld [vmem:[%s8004_s5 + $0x2f8] sm:$0xff] }
 0xc78   : > { %v3092_v8 = vld [vmem:[#allocation4 + $0x28] sm:$0x3]  ;;  %v2878_v9 = vld [vmem:[#allocation4 + $0x20] sm:$0x1]  ;;  %5666 = vmatpush1.bf16.msra.mxu0 %v5665_v57  ;;  %5801 = vmatpush1.bf16.msra.mxu1 %v5800_v58  ;;  %v2925_v4 = vrot.slane %v2879_v7, 1  ;;  %v2861_v58 = vld [vmem:[%s8004_s5 + $0x78] sm:$0xff] }
 0xc79   : > { %v3136_v6 = vrot.slane %v3092_v8, 2  ;;  %v2923_v11 = vrot.slane %v2878_v9, 1  ;;  %v3091_v12 = vld [vmem:[#allocation4 + $0x20] sm:$0x3]  ;;  %5667 = vmatprep.subr.bf16.mxu0 %v6112_v60  ;;  %5802 = vmatprep.subr.bf16.mxu1 %v6112_v60  ;;  %v2860_v57 = vld [vmem:[%s8004_s5 + $0x70] sm:$0xff]  ;;  %v2865_v7 = vld [vmem:[%s8004_s5 + $0x98] sm:$0xff] }
 0xc7a   : > { %v3134_v14 = vrot.slane %v3091_v12, 2  ;;  %v2926_v19 = vsel %vm1697_vm6, %v2921_v47, %v2925_v4  ;;  %v4656_v47 = vld [vmem:[%s8004_s5 + $0x418] sm:$0xff]  ;;  %v5686_v24 = vpack.c.bf16 %v2861_v58, %v2860_v57  ;;  %v5692_v9 = vpack.c.bf16 %v2865_v7, %v2864_v5  ;;  %v4666_v12 = vld [vmem:[%s8004_s5 + $0x468] sm:$0xff]  ;;  %v4617_v2 = vld [vmem:[%s8004_s5 + $0x2f0] sm:$0xff] }
 0xc7b   : > { %v3137_v20 = vsel %vm1929_vm7, %v3132_v49, %v3136_v6  ;;  %v2924_v21 = vsel %vm1697_vm6, %v2918_v61, %v2923_v11  ;;  %4578 = vmatprep.mubr.msk.f32.mxu0 %vm2929_vm5, %v2926_v19  ;;  %v5815_v49 = vpack.c.bf16 %v4656_v47, %v4655_v44  ;;  %v4660_v61 = vld [vmem:[%s8004_s5 + $0x438] sm:$0xff]  ;;  %v2866_v6 = vld [vmem:[%s8004_s5 + $0xa0] sm:$0xff]  ;;  %v3356_v47 = vld [vmem:[#allocation4 + $0x28] sm:$0xf]  ;;  %v3392_v50 = vrot.slane %v3353_v43, 4 }
 0xc7c   : > { %4612 = vmatprep.mubr.msk.f32.mxu1 %vm2929_vm5, %v3137_v20  ;;  %v3135_v22 = vsel %vm1929_vm7, %v3129_v62, %v3134_v14  ;;  %5669 = vmatpush1.bf16.msra.mxu0 %v5668_v1  ;;  %v5821_v62 = vpack.c.bf16 %v4660_v61, %v4659_v59  ;;  %v4663_v1 = vld [vmem:[%s8004_s5 + $0x450] sm:$0xff]  ;;  %v4664_v8 = vld [vmem:[%s8004_s5 + $0x458] sm:$0xff]  ;;  %v4665_v11 = vld [vmem:[%s8004_s5 + $0x460] sm:$0xff]  ;;  %v5698_v20 = vpack.c.bf16 %v2869_v17, %v2868_v16  ;;  %v3400_v52 = vrot.slane %v3356_v47, 4 }
 0xc7d   : > { %5804 = vmatpush1.bf16.msra.mxu1 %v5803_v10  ;;  %3004 = vmatmul.mubr.f32.gmra.mrb[4].mxu0 %v2924_v21  ;;  %v5827_v4 = vpack.c.bf16 %v4664_v8, %v4663_v1  ;;  %v2867_v10 = vld [vmem:[%s8004_s5 + $0xa8] sm:$0xff]  ;;  %v5830_v14 = vpack.c.bf16 %v4666_v12, %v4665_v11  ;;  %v4668_v19 = vld [vmem:[%s8004_s5 + $0x478] sm:$0xff]  ;;  %v3222_v59 = vld [vmem:[#allocation4 + $0x8] sm:$0xf8]  ;;  %v3264_v61 = vrot.slane %v7377_v41, 3  ;;  %v3261_v43 = vrot.slane %v7397_v56, 3 }
 0xc7e   : > { %3214 = vmatmul.mubr.f32.gmra.mrb[8].mxu1 %v3135_v22  ;;  %4579 = vmatprep.mubr.msk.f32.mxu0 %vm2929_vm5, %v2843_v29  ;;  %v5695_v13 = vpack.c.bf16 %v2867_v10, %v2866_v6  ;;  %v5833_v21 = vpack.c.bf16 %v4668_v19, %v4667_v18  ;;  %v2870_v22 = vld [vmem:[%s8004_s5 + $0xc0] sm:$0xff]  ;;  %v2872_v29 = vld [vmem:[%s8004_s5 + $0xd0] sm:$0xff]  ;;  %v4614_v44 = vld [vmem:[%s8004_s5 + $0x2d8] sm:$0xff]  ;;  %v3263_v0 = vrot.slane %v3222_v59, 3  ;;  %vm3502_vm6 = vcmask 834608  }
 0xc7f   : > { %4675 = vmatprep.mubr.msk.f32.mxu1 %vm2929_vm5, %v3397_v30  ;;  %5670 = vmatprep.subr.bf16.mxu0 %v6112_v60  ;;  %v5701_v27 = vpack.c.bf16 %v2871_v23, %v2870_v22  ;;  %v2873_v30 = vld [vmem:[%s8004_s5 + $0xd8] sm:$0xff]  ;;  %v5755_v51 = vpack.c.bf16 %v4614_v44, %v4613_v42  ;;  %v4620_v5 = vld [vmem:[%s8004_s5 + $0x308] sm:$0xff]  ;;  %v4621_v1 = vld [vmem:[%s8004_s5 + $0x310] sm:$0xff] }
 0xc80   : > { %5805 = vmatprep.subr.bf16.mxu1 %v6112_v60  ;;  %5672 = vmatpush1.bf16.msra.mxu0 %v5671_v25  ;;  %v4669_v25 = vld [vmem:[%s8004_s5 + $0x480] sm:$0xff]  ;;  %v4622_v8 = vld [vmem:[%s8004_s5 + $0x318] sm:$0xff]  ;;  %v4624_v6 = vld [vmem:[%s8004_s5 + $0x328] sm:$0xff] }
 0xc81   : > { %5807 = vmatpush1.bf16.msra.mxu1 %v5806_v26  ;;  %5673 = vmatprep.subr.bf16.mxu0 %v6112_v60  ;;  %v4670_v26 = vld [vmem:[%s8004_s5 + $0x488] sm:$0xff]  ;;  %v4625_v11 = vld [vmem:[%s8004_s5 + $0x330] sm:$0xff]  ;;  %v4626_v12 = vld [vmem:[%s8004_s5 + $0x338] sm:$0xff] }
 0xc82   : > { %5808 = vmatprep.subr.bf16.mxu1 %v6112_v60  ;;  %v5836_v28 = vpack.c.bf16 %v4670_v26, %v4669_v25  ;;  %v4628_v16 = vld [vmem:[%s8004_s5 + $0x348] sm:$0xff]  ;;  %v4629_v18 = vld [vmem:[%s8004_s5 + $0x350] sm:$0xff]  ;;  %v4630_v19 = vld [vmem:[%s8004_s5 + $0x358] sm:$0xff] }
 0xc83   : > { %v4632_v22 = vld [vmem:[%s8004_s5 + $0x368] sm:$0xff]  ;;  %v4633_v25 = vld [vmem:[%s8004_s5 + $0x370] sm:$0xff]  ;;  %v4634_v26 = vld [vmem:[%s8004_s5 + $0x378] sm:$0xff] }
 0xc84   : > { %5675 = vmatpush1.bf16.msra.mxu0 %v5674_v33  ;;  %v5704_v33 = vpack.c.bf16 %v2873_v30, %v2872_v29  ;;  %v4636_v29 = vld [vmem:[%s8004_s5 + $0x388] sm:$0xff] }
 0xc85   : > { %5810 = vmatpush1.bf16.msra.mxu1 %v5809_v34  ;;  %5676 = vmatprep.subr.bf16.mxu0 %v6112_v60  ;;  %v5839_v34 = vpack.c.bf16 %v4672_v32, %v4671_v31  ;;  %v4637_v31 = vld [vmem:[%s8004_s5 + $0x390] sm:$0xff]  ;;  %v4638_v32 = vld [vmem:[%s8004_s5 + $0x398] sm:$0xff]  ;;  %v3221_v42 = vld [vmem:[#allocation4] sm:$0xf8] }
 0xc86   : > { %5811 = vmatprep.subr.bf16.mxu1 %v6112_v60  ;;  %v3223_v47 = vld [vmem:[#allocation4 + $0x20] sm:$0x7] }
 0xc88   : > { %5678 = vmatpush1.bf16.msra.mxu0 %v5677_v39  ;;  %v5707_v39 = vpack.c.bf16 %v2875_v36, %v2874_v35  ;;  %v4640_v35 = vld [vmem:[%s8004_s5 + $0x3a8] sm:$0xff] }
 0xc89   : > { %5813 = vmatpush1.bf16.msra.mxu1 %v5812_v40  ;;  %5679 = vmatprep.subr.bf16.mxu0 %v6112_v60  ;;  %v5842_v40 = vpack.c.bf16 %v4674_v38, %v4673_v37  ;;  %v4641_v37 = vld [vmem:[%s8004_s5 + $0x3b0] sm:$0xff]  ;;  %v4642_v38 = vld [vmem:[%s8004_s5 + $0x3b8] sm:$0xff] }
 0xc8a   : > { %5814 = vmatprep.subr.bf16.mxu1 %v6112_v60 }
 0xc8c   : > { %5681 = vmatpush1.bf16.msra.mxu0 %v5680_v48  ;;  %v3393_v48 = vrot.slane %v7397_v56, 4 }
 0xc8d   : > { %5816 = vmatpush1.bf16.msra.mxu1 %v5815_v49  ;;  %5682 = vmatprep.subr.bf16.mxu0 %v6112_v60  ;;  %v3355_v49 = vld [vmem:[#allocation4 + $0x20] sm:$0xf] }
 0xc8e   : > { %5817 = vmatprep.subr.bf16.mxu1 %v6112_v60  ;;  %v3394_v57 = vsel %vm1714_vm1, %v3392_v50, %v3393_v48  ;;  %v3398_v58 = vrot.slane %v3355_v49, 4  ;;  %v3266_v50 = vrot.slane %v3223_v47, 3 }
 0xc90   : > { %5684 = vmatpush1.bf16.msra.mxu0 %v5683_v54  ;;  %v4616_v54 = vld [vmem:[%s8004_s5 + $0x2e8] sm:$0xff]  ;;  %v3399_v45 = vsel %vm1714_vm1, %v3393_v48, %v3398_v58  ;;  %v3260_v48 = vrot.slane %v3221_v42, 3 }
 0xc91   : > { %5819 = vmatpush1.bf16.msra.mxu1 %v5818_v55  ;;  %5685 = vmatprep.subr.bf16.mxu0 %v6112_v60  ;;  %v2842_v55 = vld [vmem:[#allocation4] sm:$0xff] }
 0xc92   : > { %5820 = vmatprep.subr.bf16.mxu1 %v6112_v60  ;;  %v3262_v49 = vsel %vm2076_vm8, %v3260_v48, %v3261_v43 }
 0xc94   : > { %5687 = vmatpush1.bf16.msra.mxu0 %v5686_v24  ;;  %v3401_v24 = vsel %vm1714_vm1, %v3396_v15, %v3400_v52  ;;  %v3265_v15 = vsel %vm2076_vm8, %v3263_v0, %v3264_v61  ;;  %v3267_v52 = vsel %vm2076_vm8, %v3261_v43, %v3266_v50  ;;  %v4691_v43 = vld [vmem:[%s8006_s7 + $0xd8] sm:$0xf]  ;;  %vm3546_vm1 = vcmask 878384  }
 0xc95   : > { %5822 = vmatpush1.bf16.msra.mxu1 %v5821_v62  ;;  %5688 = vmatprep.subr.bf16.mxu0 %v6112_v60  ;;  %v5758_v62 = vpack.c.bf16 %v4616_v54, %v4615_v53 }
 0xc96   : > { %5823 = vmatprep.subr.bf16.mxu1 %v6112_v60 }
 0xc98   : > { %5690 = vmatpush1.bf16.msra.mxu0 %v5689_v3  ;;  %v5761_v3 = vpack.c.bf16 %v4618_v46, %v4617_v2 }
 0xc99   : > { %5825 = vmatpush1.bf16.msra.mxu1 %v5824_v63  ;;  %5691 = vmatprep.subr.bf16.mxu0 %v6112_v60  ;;  %v4619_v63 = vld [vmem:[%s8004_s5 + $0x300] sm:$0xff] }
 0xc9a   : > { %5826 = vmatprep.subr.bf16.mxu1 %v6112_v60  ;;  %v5764_v7 = vpack.c.bf16 %v4620_v5, %v4619_v63 }
 0xc9c   : > { %5693 = vmatpush1.bf16.msra.mxu0 %v5692_v9  ;;  %v5767_v9 = vpack.c.bf16 %v4622_v8, %v4621_v1 }
 0xc9d   : > { %5828 = vmatpush1.bf16.msra.mxu1 %v5827_v4  ;;  %5694 = vmatprep.subr.bf16.mxu0 %v6112_v60  ;;  %v4623_v4 = vld [vmem:[%s8004_s5 + $0x320] sm:$0xff] }
 0xc9e   : > { %5829 = vmatprep.subr.bf16.mxu1 %v6112_v60  ;;  %v5770_v10 = vpack.c.bf16 %v4624_v6, %v4623_v4 }
 0xca0   : > { %5696 = vmatpush1.bf16.msra.mxu0 %v5695_v13  ;;  %v5773_v13 = vpack.c.bf16 %v4626_v12, %v4625_v11 }
 0xca1   : > { %5831 = vmatpush1.bf16.msra.mxu1 %v5830_v14  ;;  %5697 = vmatprep.subr.bf16.mxu0 %v6112_v60  ;;  %v4627_v14 = vld [vmem:[%s8004_s5 + $0x340] sm:$0xff] }
 0xca2   : > { %5832 = vmatprep.subr.bf16.mxu1 %v6112_v60  ;;  %v5776_v17 = vpack.c.bf16 %v4628_v16, %v4627_v14 }
 0xca4   : > { %5699 = vmatpush1.bf16.msra.mxu0 %v5698_v20  ;;  %v5779_v20 = vpack.c.bf16 %v4630_v19, %v4629_v18  ;;  %v4678_v19 = vld [vmem:[%s8006_s7 + $0x70] sm:$0xff] }
 0xca5   : > { %5834 = vmatpush1.bf16.msra.mxu1 %v5833_v21  ;;  %5700 = vmatprep.subr.bf16.mxu0 %v6112_v60  ;;  %v4631_v21 = vld [vmem:[%s8004_s5 + $0x360] sm:$0xff] }
 0xca6   : > { %5835 = vmatprep.subr.bf16.mxu1 %v6112_v60  ;;  %v5782_v23 = vpack.c.bf16 %v4632_v22, %v4631_v21  ;;  %v4680_v22 = vld [vmem:[%s8006_s7 + $0x80] sm:$0xff] }
 0xca8   : > { %5702 = vmatpush1.bf16.msra.mxu0 %v5701_v27  ;;  %v5785_v27 = vpack.c.bf16 %v4634_v26, %v4633_v25  ;;  %v4682_v26 = vld [vmem:[%s8006_s7 + $0x90] sm:$0xff] }
 0xca9   : > { %5837 = vmatpush1.bf16.msra.mxu1 %v5836_v28  ;;  %5703 = vmatprep.subr.bf16.mxu0 %v6112_v60  ;;  %v4635_v28 = vld [vmem:[%s8004_s5 + $0x380] sm:$0xff] }
 0xcaa   : > { %5838 = vmatprep.subr.bf16.mxu1 %v6112_v60  ;;  %v5788_v30 = vpack.c.bf16 %v4636_v29, %v4635_v28 }
 0xcac   : > { %5705 = vmatpush1.bf16.msra.mxu0 %v5704_v33  ;;  %v5791_v33 = vpack.c.bf16 %v4638_v32, %v4637_v31  ;;  %v4684_v31 = vld [vmem:[%s8006_s7 + $0xa0] sm:$0xff]  ;;  %v4685_v32 = vld [vmem:[%s8006_s7 + $0xa8] sm:$0xff] }
 0xcad   : > { %5840 = vmatpush1.bf16.msra.mxu1 %v5839_v34  ;;  %5706 = vmatprep.subr.bf16.mxu0 %v6112_v60  ;;  %v4639_v34 = vld [vmem:[%s8004_s5 + $0x3a0] sm:$0xff] }
 0xcae   : > { %5841 = vmatprep.subr.bf16.mxu1 %v6112_v60  ;;  %v5794_v36 = vpack.c.bf16 %v4640_v35, %v4639_v34  ;;  %v4686_v34 = vld [vmem:[%s8006_s7 + $0xb0] sm:$0xff]  ;;  %v4687_v35 = vld [vmem:[%s8006_s7 + $0xb8] sm:$0xff] }
 0xcb0   : > { %5708 = vmatpush1.bf16.msra.mxu0 %v5707_v39  ;;  %v5797_v39 = vpack.c.bf16 %v4642_v38, %v4641_v37  ;;  %v4688_v38 = vld [vmem:[%s8006_s7 + $0xc0] sm:$0xff] }
 0xcb1   : > { %5843 = vmatpush1.bf16.msra.mxu1 %v5842_v40  ;;  %5754 = vmatprep.subr.bf16.mxu0 %v6112_v60  ;;  %v3224_v40 = vld [vmem:[#allocation4 + $0x28] sm:$0x7] }
 0xcb2   : > { %v3268_v44 = vrot.slane %v3224_v40, 3  ;;  %v4690_v40 = vld [vmem:[%s8006_s7 + $0xd0] sm:$0xff] }
 0xcb3   : > { %3079 = vmatmul.mubr.f32.vlgmr.msra.gmra.mrb[6].mxu0 %v2842_v55 }
 0xcb4   : > { %3473 = vmatmul.mubr.f32.vlgmr.msra.gmra.mrb[10].mxu1 %v3394_v57  ;;  %4580 = vmatprep.mubr.msk.f32.mxu0 %vm2929_vm5, %v7377_v41 }
 0xcb5   : > { %5756 = vmatpush1.bf16.msra.mxu0 %v5755_v51  ;;  %4676 = vmatprep.mubr.msk.f32.mxu1 %vm2929_vm5, %v3401_v24  ;;  %v3269_v51 = vsel %vm2076_vm8, %v3264_v61, %v3268_v44  ;;  %vm3505_vm8 = vcmask 828465   ;;  %v5868_v44 = vpack.c.bf16 %v4691_v43, %v4690_v40  ;;  %v6056_v43 = vld [vmem:[%s6232_s21 + $0x8] sm:$0xff] }
 0xcb6   : > { %5757 = vmatprep.subr.bf16.mxu0 %v6112_v60 }
 0xcb7   : > { %3084 = vmatmul.mubr.f32.gmra.mrb[8].mxu0 %v7397_v56 }
 0xcb8   : > { %3478 = vmatmul.mubr.f32.gmra.mrb[12].mxu1 %v3399_v45  ;;  %4643 = vmatprep.mubr.msk.f32.mxu0 %vm2929_vm5, %v3265_v15 }
 0xcb9   : > { %5759 = vmatpush1.bf16.msra.mxu0 %v5758_v62 }
 0xcba   : > { %5760 = vmatprep.subr.bf16.mxu0 %v6112_v60 }
 0xcbd   : > { %5762 = vmatpush1.bf16.msra.mxu0 %v5761_v3 }
 0xcbe   : > { %5763 = vmatprep.subr.bf16.mxu0 %v6112_v60 }
 0xcc1   : > { %5765 = vmatpush1.bf16.msra.mxu0 %v5764_v7 }
 0xcc2   : > { %5766 = vmatprep.subr.bf16.mxu0 %v6112_v60 }
 0xcc5   : > { %5768 = vmatpush1.bf16.msra.mxu0 %v5767_v9  ;;  %v4677_v9 = vld [vmem:[%s8005_s6] ss:$0 sm:$0xff] }
 0xcc6   : > { %5769 = vmatprep.subr.bf16.mxu0 %v6112_v60 }
 0xcc9   : > { %5771 = vmatpush1.bf16.msra.mxu0 %v5770_v10 }
 0xcca   : > { %5772 = vmatprep.subr.bf16.mxu0 %v6112_v60 }
 0xccd   : > { %5774 = vmatpush1.bf16.msra.mxu0 %v5773_v13 }
 0xcce   : > { %5775 = vmatprep.subr.bf16.mxu0 %v6112_v60 }
 0xcd1   : > { %5777 = vmatpush1.bf16.msra.mxu0 %v5776_v17 }
 0xcd2   : > { %5778 = vmatprep.subr.bf16.mxu0 %v6112_v60 }
 0xcd5   : > { %5780 = vmatpush1.bf16.msra.mxu0 %v5779_v20  ;;  %v4679_v20 = vld [vmem:[%s8006_s7 + $0x78] sm:$0xff] }
 0xcd6   : > { %5781 = vmatprep.subr.bf16.mxu0 %v6112_v60  ;;  %v5844_v21 = vpack.c.bf16 %v4679_v20, %v4678_v19  ;;  %v4702_v19 = vld [vmem:[%s8006_s7 + $0x100] sm:$0xff]  ;;  %v4703_v20 = vld [vmem:[%s8006_s7 + $0x108] sm:$0xff] }
 0xcd9   : > { %5783 = vmatpush1.bf16.msra.mxu0 %v5782_v23  ;;  %v4681_v23 = vld [vmem:[%s8006_s7 + $0x88] sm:$0xff] }
 0xcda   : > { %5784 = vmatprep.subr.bf16.mxu0 %v6112_v60  ;;  %v5848_v25 = vpack.c.bf16 %v4681_v23, %v4680_v22  ;;  %v5912_v22 = vpack.c.bf16 %v4703_v20, %v4702_v19  ;;  %v4704_v23 = vld [vmem:[%s8006_s7 + $0x110] sm:$0xff]  ;;  %v4730_v19 = vld [vmem:[%s8008_s9 + $0x78] sm:$0xff]  ;;  %v4731_v20 = vld [vmem:[%s8008_s9 + $0x80] sm:$0xff] }
 0xcdd   : > { %5786 = vmatpush1.bf16.msra.mxu0 %v5785_v27  ;;  %v4683_v27 = vld [vmem:[%s8006_s7 + $0x98] sm:$0xff] }
 0xcde   : > { %5787 = vmatprep.subr.bf16.mxu0 %v6112_v60 }
 0xce1   : > { %5789 = vmatpush1.bf16.msra.mxu0 %v5788_v30  ;;  %v5852_v30 = vpack.c.bf16 %v4683_v27, %v4682_v26  ;;  %v4706_v27 = vld [vmem:[%s8006_s7 + $0x120] sm:$0xff] }
 0xce2   : > { %5790 = vmatprep.subr.bf16.mxu0 %v6112_v60 }
 0xce5   : > { %5792 = vmatpush1.bf16.msra.mxu0 %v5791_v33  ;;  %v5856_v33 = vpack.c.bf16 %v4685_v32, %v4684_v31  ;;  %v4709_v31 = vld [vmem:[%s8006_s7 + $0x138] sm:$0xff] }
 0xce6   : > { %5793 = vmatprep.subr.bf16.mxu0 %v6112_v60 }
 0xce9   : > { %5795 = vmatpush1.bf16.msra.mxu0 %v5794_v36  ;;  %v5860_v36 = vpack.c.bf16 %v4687_v35, %v4686_v34  ;;  %v4711_v34 = vld [vmem:[%s8006_s7 + $0x148] sm:$0xf] }
 0xcea   : > { %5796 = vmatprep.subr.bf16.mxu0 %v6112_v60 }
 0xced   : > { %5798 = vmatpush1.bf16.msra.mxu0 %v5797_v39  ;;  %v4689_v39 = vld [vmem:[%s8006_s7 + $0xc8] sm:$0xff] }
 0xcee   : > { %5845 = vmatprep.subr.bf16.mxu0 %v5844_v21  ;;  %v5864_v42 = vpack.c.bf16 %v4689_v39, %v4688_v38 }
 0xcf0   : > { %3341 = vmatmul.mubr.f32.vlgmr.msra.gmra.mrb[10].mxu0 %v3262_v49 }
 0xcf1   : > { %4644 = vmatprep.mubr.msk.f32.mxu0 %vm2929_vm5, %v3269_v51  ;;  %5847 = vmatpush3.bf16.msra.mxu0 %v5844_v21  ;;  %v3550_v51 = vld [vmem:[%s8006_s7] sm:$0xff]  ;;  %vm3916_vm5 = vcmask 435608  }
 0xcf2   : > { %5849 = vmatprep.subr.bf16.mxu0 %v5848_v25 }
 0xcf4   : > { %3346 = vmatmul.mubr.f32.gmra.mrb[12].mxu0 %v3267_v52  ;;  %v3551_v52 = vld [vmem:[%s8006_s7 + $0x8] sm:$0xff] }
 0xcf5   : > { %5851 = vmatpush3.bf16.msra.mxu0 %v5848_v25  ;;  %v4705_v25 = vld [vmem:[%s8006_s7 + $0x118] sm:$0xff] }
 0xcf6   : > { %5853 = vmatprep.subr.bf16.mxu0 %v5852_v30  ;;  %v5916_v26 = vpack.c.bf16 %v4705_v25, %v4704_v23 }
 0xcf9   : > { %5855 = vmatpush3.bf16.msra.mxu0 %v5852_v30  ;;  %v4708_v30 = vld [vmem:[%s8006_s7 + $0x130] sm:$0xff] }
 0xcfa   : > { %5857 = vmatprep.subr.bf16.mxu0 %v5856_v33  ;;  %v5924_v32 = vpack.c.bf16 %v4709_v31, %v4708_v30  ;;  %v4735_v30 = vld [vmem:[%s8008_s9 + $0xa0] sm:$0x3f] }
 0xcfd   : > { %5859 = vmatpush3.bf16.msra.mxu0 %v5856_v33  ;;  %v4710_v33 = vld [vmem:[%s8006_s7 + $0x140] sm:$0xff] }
 0xcfe   : > { %5861 = vmatprep.subr.bf16.mxu0 %v5860_v36  ;;  %v5928_v35 = vpack.c.bf16 %v4711_v34, %v4710_v33 }
 0xd01   : > { %5863 = vmatpush3.bf16.msra.mxu0 %v5860_v36 }
 0xd02   : > { %5865 = vmatprep.subr.bf16.mxu0 %v5864_v42 }
 0xd05   : > { %5867 = vmatpush3.bf16.msra.mxu0 %v5864_v42 }
 0xd06   : > { %5870 = vmatprep.subr.msk.bf16.mxu0 %vm7790_vm11, %v5868_v44 }
 0xd09   : > { %5873 = vmatpush3.bf16.msk.msra.mxu0 %vm7790_vm11, %v5868_v44 }
 0xd4a   : > { %v3000_v60 = vpop.f32.mrb[2].mxu0  ;;  %v3210_v53 = vpop.f32.mrb[6].mxu1 }
 0xd4b   : > { %v3002_v56 = vpop.f32.mrb[3].mxu0  ;;  %v3212_v54 = vpop.f32.mrb[7].mxu1 }
 0xd50   : > { %v3005_v55 = vpop.f32.mrb[4].mxu0 }
 0xd51   : > { %v3215_v57 = vpop.f32.mrb[8].mxu1  ;;  %v3007_v58 = vpop.f32.mrb[5].mxu0 }
 0xd52   : > { %v3217_v59 = vpop.f32.mrb[9].mxu1  ;;  %v3552_v58 = vld [vmem:[%s8006_s7 + $0x10] sm:$0xff] }
 0xd53   : > { %v3553_v59 = vld [vmem:[%s8006_s7 + $0x18] sm:$0xff] }
 0xd86   : > { %v3080_v24 = vpop.f32.mrb[6].mxu0 }
 0xd87   : > { %v3474_v62 = vpop.f32.mrb[10].mxu1  ;;  %v3081_v0 = vadd.f32 %v3080_v24, %v3000_v60  ;;  %v3082_v2 = vpop.f32.mrb[7].mxu0  ;;  %v5874_v60 = vpack.c.bf16 %v3551_v52, %v3550_v51 }
 0xd88   : > { %v3476_v41 = vpop.f32.mrb[11].mxu1  ;;  %v3554_v2 = vld [vmem:[%s8006_s7 + $0x20] sm:$0xff] }
 0xd89   : > { %v3219_v46 = vadd.f32 %v3210_v53, %v3081_v0  ;;  %5875 = vmatprep.subr.bf16.mxu0 %v5874_v60  ;;  %v5878_v0 = vpack.c.bf16 %v3553_v59, %v3552_v58  ;;  %v3555_v41 = vld [vmem:[%s8006_s7 + $0x28] sm:$0xff] }
 0xd8a   : > { %v3085_v61 = vpop.f32.mrb[8].mxu0 }
 0xd8b   : > { %v3479_v45 = vpop.f32.mrb[12].mxu1  ;;  %v3086_v15 = vadd.f32 %v3085_v61, %v3005_v55  ;;  %v3087_v3 = vpop.f32.mrb[9].mxu0  ;;  %v5882_v61 = vpack.c.bf16 %v3555_v41, %v3554_v2 }
 0xd8c   : > { %v3481_v63 = vpop.f32.mrb[13].mxu1 }
 0xd8d   : > { %v3220_v5 = vadd.f32 %v3215_v57, %v3086_v15  ;;  %v3557_v15 = vld [vmem:[%s8006_s7 + $0x38] sm:$0xff]  ;;  %v3558_v63 = vld [vmem:[%s8006_s7 + $0x40] sm:$0xff] }
 0xdc3   : > { %v3342_v7 = vpop.f32.mrb[10].mxu0 }
 0xdc4   : > { %v3351_v1 = vadd.f32 %v3342_v7, %v3219_v46  ;;  %v3344_v8 = vpop.f32.mrb[11].mxu0 }
 0xdc5   : > { %v3561_v8 = vld [vmem:[%s8006_s7 + $0x58] sm:$0xff] }
 0xdc6   : > { %v3483_v4 = vadd.f32 %v3474_v62, %v3351_v1  ;;  %v3560_v1 = vld [vmem:[%s8006_s7 + $0x50] sm:$0xff] }
 0xdc7   : > { %v3347_v6 = vpop.f32.mrb[12].mxu0 }
 0xdc8   : > { %v3352_v10 = vadd.f32 %v3347_v6, %v3220_v5  ;;  %v3349_v11 = vpop.f32.mrb[13].mxu0  ;;  %v3492_v12 = vadd.f32 %v4677_v9, %v3483_v4  ;;  %v3559_v5 = vld [vmem:[%s8006_s7 + $0x48] sm:$0xff]  ;;  %v3562_v4 = vld [vmem:[%s8006_s7 + $0x60] sm:$0xff] }
 0xdc9   : > { %v5890_v7 = vpack.c.bf16 %v3559_v5, %v3558_v63  ;;  %v3563_v6 = vld [vmem:[%s8006_s7 + $0x68] sm:$0xf]  ;;  %v4698_v11 = vld [vmem:[%s8006_s7 + $0xe0] sm:$0xff] }
 0xdca   : > { %v3484_v13 = vadd.f32 %v3479_v45, %v3352_v10  ;;  %3496 = vrot.lane.b32.xlu0 %v3492_v12, %s6103_s24  ;;  %v3556_v45 = vld [vmem:[%s8006_s7 + $0x30] sm:$0xff]  ;;  %v5898_v10 = vpack.c.bf16 %v3563_v6, %v3562_v4  ;;  %v4699_v12 = vld [vmem:[%s8006_s7 + $0xe8] sm:$0xff]  ;;  %v3923_v6 = vld [vmem:[%s8008_s9 + $0x18] sm:$0xff] }
 0xdcb   : > { %v5886_v3 = vpack.c.bf16 %v3557_v15, %v3556_v45  ;;  %v3921_v45 = vld [vmem:[%s8008_s9 + $0x8] sm:$0xff]  ;;  %v3922_v4 = vld [vmem:[%s8008_s9 + $0x10] sm:$0xff] }
 0xdcc   : > { %v3493_v14 = vadd.f32 %v4677_v9, %v3484_v13  ;;  %v5894_v9 = vpack.c.bf16 %v3561_v8, %v3560_v1  ;;  %v5904_v13 = vpack.c.bf16 %v4699_v12, %v4698_v11  ;;  %v3924_v12 = vld [vmem:[%s8008_s9 + $0x20] sm:$0xff] }
 0xdce   : > { %3498 = vrot.lane.b32.xlu1 %v3493_v14, %s6103_s24  ;;  %v4700_v14 = vld [vmem:[%s8006_s7 + $0xf0] sm:$0xff] }
 0xe3c   : > { %v3497_v16 = vpop.permute.xlu0 %3496 }
 0xe3d   : > { %3503 = vst.msk [vmem:[#allocation5 + $0x1] sm:$0xff] %vm3502_vm6, %v3497_v16 }
 0xe3e   : > { %3506 = vst.msk [vmem:[#allocation5 - $0x1] sm:$0x2] %vm3505_vm8, %v3497_v16  ;;  %v4701_v16 = vld [vmem:[%s8006_s7 + $0xf8] sm:$0xff]  ;;  %vm4215_vm8 = vcmask 392192  }
 0xe40   : > { %v3499_v17 = vpop.permute.xlu1 %3498 }
 0xe41   : > { %3504 = vst.msk [vmem:[#allocation5 + $0x9] sm:$0xff] %vm3502_vm6, %v3499_v17  ;;  %vm3937_vm6 = vcmask 441344  }
 0xe42   : > { %3508 = vst.msk [vmem:[#allocation5 + $0xb] sm:$0x40] %vm3507_vm9, %v3499_v17  ;;  %v5908_v17 = vpack.c.bf16 %v4701_v16, %v4700_v14 }
 0xe45   : > { %v3509_v18 = vld [vmem:[#allocation5] sm:$0xff] }
 0xe46   : > { %3515 = vrot.lane.b32.xlu0 %v3509_v18, %s6104_s25 }
 0xe48   : > { %v3510_v28 = vld [vmem:[#allocation5 + $0x8] sm:$0xff] }
 0xe49   : > { %v3511_v29 = vld [vmem:[#allocation5 + $0x10] sm:$0x3]  ;;  %3517 = vrot.lane.b32.xlu1 %v3510_v28, %s6104_s25 }
 0xe4a   : > { %3519 = vrot.lane.b32.xlu0 %v3511_v29, %s6104_s25  ;;  %v4707_v28 = vld [vmem:[%s8006_s7 + $0x128] sm:$0xff] }
 0xe4b   : > { %v5920_v29 = vpack.c.bf16 %v4707_v28, %v4706_v27  ;;  %v4734_v27 = vld [vmem:[%s8008_s9 + $0x98] sm:$0xff] }
 0xeb8   : > { %v3516_v37 = vpop.permute.xlu0 %3515 }
 0xeb9   : > { %3524 = vst.msk [vmem:[#allocation5] sm:$0xff] %vm1584_vm14, %v3516_v37  ;;  %v4715_v37 = vld [vmem:[%s8007_s8] ss:$0 sm:$0xff] }
 0xebb   : > { %v3518_v48 = vpop.permute.xlu1 %3517 }
 0xebc   : > { %v3520_v49 = vpop.permute.xlu0 %3519  ;;  %3525 = vst.msk [vmem:[#allocation5 + $0x8] sm:$0xff] %vm1584_vm14, %v3518_v48  ;;  %vm3543_vm14 = vcmask 884528   ;;  %v6057_v48 = vld [vmem:[%s6232_s21] sm:$0xff]  ;;  %s8028_s21 = smov 122  }
 0xebd   : > { %3527 = vst.msk [vmem:[#allocation5 + $0x10] sm:$0x3] %vm3526_vm0, %v3520_v49 }
 0xec0   : > { %v3528_v50 = vld [vmem:[#allocation5] sm:$0xff] }
 0xec1   : > { %3534 = vrot.lane.b32.xlu1 %v3528_v50, %s8027_s20 }
 0xec3   : > { %v3529_v53 = vld [vmem:[#allocation5 + $0x8] sm:$0xff] }
 0xec4   : > { %v3530_v56 = vld [vmem:[#allocation5 + $0x10] sm:$0x3]  ;;  %3536 = vrot.lane.b32.xlu0 %v3529_v53, %s8027_s20  ;;  %v4717_v53 = vld [vmem:[%s8008_s9 + $0x40] sm:$0xff] }
 0xec5   : > { %3538 = vrot.lane.b32.xlu1 %v3530_v56, %s8027_s20 }
 0xf33   : > { %v3535_v54 = vpop.permute.xlu1 %3534 }
 0xf34   : > { %3544 = vst.msk [vmem:[#allocation5] sm:$0xff] %vm3543_vm14, %v3535_v54 }
 0xf36   : > { %v3537_v57 = vpop.permute.xlu0 %3536 }
 0xf37   : > { %v3539_v55 = vpop.permute.xlu1 %3538  ;;  %3545 = vst.msk [vmem:[#allocation5 + $0x8] sm:$0xff] %vm3543_vm14, %v3537_v57  ;;  %v4719_v57 = vld [vmem:[%s8008_s9 + $0x50] sm:$0xff] }
 0xf38   : > { %3547 = vst.msk [vmem:[#allocation5 + $0x10] sm:$0x3] %vm3546_vm1, %v3539_v55  ;;  %v4718_v55 = vld [vmem:[%s8008_s9 + $0x48] sm:$0xff] }
 0xf39   : > { %v5938_v58 = vpack.c.bf16 %v4719_v57, %v4718_v55 }
 0xf3b   : > { %v3548_v46 = vld [vmem:[#allocation5] sm:$0xff] }
 0xf3e   : > { %v3564_v24 = vld [vmem:[#allocation5 + $0x1] sm:$0xff] }
 0xf3f   : > { %v3565_v62 = vld [vmem:[#allocation5 + $0x9] sm:$0xff]  ;;  %5135 = vmatprep.mubr.msk.f32.mxu0 %vm3581_vm12, %v3564_v24 }
 0xf40   : > { %5136 = vmatmul.mubr.msk.f32.vlgmr.msra.gmra.mrb[14].mxu0 %vm3581_vm12, %v3565_v62  ;;  %v3549_v18 = vld [vmem:[#allocation5 + $0x8] sm:$0xff]  ;;  %v4720_v62 = vld [vmem:[%s8008_s9 + $0x58] sm:$0xff] }
 0xf41   : > { %5877 = vmatpush3.bf16.msra.mxu0 %v5874_v60  ;;  %5166 = vmatprep.mubr.msk.f32.mxu0 %vm3581_vm12, %v3548_v46  ;;  %v3750_v21 = vld [vmem:[#allocation5 + $0x2] sm:$0xff]  ;;  %v3751_v36 = vld [vmem:[#allocation5 + $0xa] sm:$0xff] }
 0xf42   : > { %5879 = vmatprep.subr.bf16.mxu0 %v5878_v0  ;;  %v4716_v60 = vld [vmem:[%s8008_s9 + $0x38] sm:$0xff]  ;;  %v4722_v46 = vld [vmem:[%s8008_s9 + $0x68] sm:$0x3f] }
 0xf43   : > { %v5934_v56 = vpack.c.bf16 %v4717_v53, %v4716_v60 }
 0xf45   : > { %5881 = vmatpush3.bf16.msra.mxu0 %v5878_v0  ;;  %5935 = vmatprep.subr.bf16.mxu1 %v5934_v56  ;;  %v4721_v0 = vld [vmem:[%s8008_s9 + $0x60] sm:$0xff] }
 0xf46   : > { %5883 = vmatprep.subr.bf16.mxu0 %v5882_v61  ;;  %5937 = vmatpush3.bf16.msra.mxu1 %v5934_v56  ;;  %v5942_v2 = vpack.c.bf16 %v4721_v0, %v4720_v62 }
 0xf47   : > { %5939 = vmatprep.subr.bf16.mxu1 %v5938_v58 }
 0xf49   : > { %5885 = vmatpush3.bf16.msra.mxu0 %v5882_v61  ;;  %v3920_v61 = vld [vmem:[%s8008_s9] sm:$0xff] }
 0xf4a   : > { %5887 = vmatprep.subr.bf16.mxu0 %v5886_v3  ;;  %5941 = vmatpush3.bf16.msra.mxu1 %v5938_v58  ;;  %v5946_v15 = vpack.c.bf16 %v3921_v45, %v3920_v61 }
 0xf4b   : > { %5943 = vmatprep.subr.bf16.mxu1 %v5942_v2 }
 0xf4d   : > { %5889 = vmatpush3.bf16.msra.mxu0 %v5886_v3 }
 0xf4e   : > { %5891 = vmatprep.subr.bf16.mxu0 %v5890_v7  ;;  %5945 = vmatpush3.bf16.msra.mxu1 %v5942_v2 }
 0xf4f   : > { %5212 = vmatprep.subr.msk.mxu1 %vm1929_vm7, %v4722_v46 }
 0xf51   : > { %5893 = vmatpush3.bf16.msra.mxu0 %v5890_v7 }
 0xf52   : > { %5895 = vmatprep.subr.bf16.mxu0 %v5894_v9  ;;  %5213 = vmatpush3.msk.msra.mxu1 %vm1929_vm7, %v4722_v46 }
 0xf53   : > { %5947 = vmatprep.subr.bf16.mxu1 %v5946_v15 }
 0xf55   : > { %5897 = vmatpush3.bf16.msra.mxu0 %v5894_v9 }
 0xf56   : > { %5900 = vmatprep.subr.msk.bf16.mxu0 %vm7790_vm11, %v5898_v10 }
 0xf59   : > { %5903 = vmatpush3.bf16.msk.msra.mxu0 %vm7790_vm11, %v5898_v10  ;;  %v5950_v10 = vpack.c.bf16 %v3923_v6, %v3922_v4 }
 0xf5a   : > { %5905 = vmatprep.subr.bf16.mxu0 %v5904_v13 }
 0xf5c   : > { %5167 = vmatmul.mubr.msk.f32.vlgmr.msra.gmra.mrb[14].mxu0 %vm3581_vm12, %v3549_v18  ;;  %v4729_v18 = vld [vmem:[%s8008_s9 + $0x70] sm:$0xff] }
 0xf5d   : > { %5907 = vmatpush3.bf16.msra.mxu0 %v5904_v13  ;;  %5197 = vmatprep.mubr.msk.f32.mxu0 %vm3581_vm12, %v3750_v21  ;;  %v3925_v13 = vld [vmem:[%s8008_s9 + $0x28] sm:$0xff] }
 0xf5e   : > { %5909 = vmatprep.subr.bf16.mxu0 %v5908_v17  ;;  %v5954_v16 = vpack.c.bf16 %v3925_v13, %v3924_v12  ;;  %v4732_v21 = vld [vmem:[%s8008_s9 + $0x88] sm:$0xff] }
 0xf5f   : > { %v5962_v23 = vpack.c.bf16 %v4732_v21, %v4731_v20 }
 0xf61   : > { %5911 = vmatpush3.bf16.msra.mxu0 %v5908_v17  ;;  %v3926_v17 = vld [vmem:[%s8008_s9 + $0x30] sm:$0x3f] }
 0xf62   : > { %5913 = vmatprep.subr.bf16.mxu0 %v5912_v22 }
 0xf65   : > { %5915 = vmatpush3.bf16.msra.mxu0 %v5912_v22  ;;  %v5958_v22 = vpack.c.bf16 %v4730_v19, %v4729_v18 }
 0xf66   : > { %5917 = vmatprep.subr.bf16.mxu0 %v5916_v26 }
 0xf69   : > { %5919 = vmatpush3.bf16.msra.mxu0 %v5916_v26  ;;  %v4733_v26 = vld [vmem:[%s8008_s9 + $0x90] sm:$0xff] }
 0xf6a   : > { %5921 = vmatprep.subr.bf16.mxu0 %v5920_v29 }
 0xf6d   : > { %5923 = vmatpush3.bf16.msra.mxu0 %v5920_v29  ;;  %v5966_v29 = vpack.c.bf16 %v4734_v27, %v4733_v26 }
 0xf6e   : > { %5925 = vmatprep.subr.bf16.mxu0 %v5924_v32 }
 0xf71   : > { %5927 = vmatpush3.bf16.msra.mxu0 %v5924_v32  ;;  %v4739_v32 = vld [vmem:[%s8009_s10] ss:$0 sm:$0xff] }
 0xf72   : > { %5930 = vmatprep.subr.msk.bf16.mxu0 %vm7790_vm11, %v5928_v35 }
 0xf75   : > { %5933 = vmatpush3.bf16.msk.msra.mxu0 %vm7790_vm11, %v5928_v35 }
 0xf78   : > { %5198 = vmatmul.mubr.msk.f32.vlgmr.msra.gmra.mrb[14].mxu0 %vm3581_vm12, %v3751_v36 }
0x104b   : > { %v5199_v38 = vpop.f32.mrb[14].mxu0 }
0x104c   : > { %v3861_v39 = vadd.f32 %v5199_v38, %v4715_v37  ;;  %v3842_v40 = vpop.f32.mrb[15].mxu0 }
0x104d   : > { %v3860_v42 = vadd.f32 %v4715_v37, %v3842_v40 }
0x104e   : > { %v3863_v44 = vadd.f32 %v6056_v43, %v3861_v39 }
0x104f   : > { %v3862_v49 = vadd.f32 %v6057_v48, %v3860_v42 }
0x1050   : > { %3868 = vrot.lane.b32.xlu1 %v3863_v44, %s6116_s12 }
0x1051   : > { %3866 = vrot.lane.b32.xlu0 %v3862_v49, %s6116_s12 }
0x10c2   : > { %v3869_v47 = vpop.permute.xlu1 %3868 }
0x10c3   : > { %3874 = vst.msk [vmem:[#allocation6 + $0x9] sm:$0xff] %vm3872_vm15, %v3869_v47  ;;  %v3867_v50 = vpop.permute.xlu0 %3866 }
0x10c4   : > { %3878 = vst.msk [vmem:[#allocation6 + $0xb] sm:$0x40] %vm3877_vm2, %v3869_v47 }
0x10c5   : > { %3873 = vst.msk [vmem:[#allocation6 + $0x1] sm:$0xff] %vm3872_vm15, %v3867_v50 }
0x10c6   : > { %3876 = vst.msk [vmem:[#allocation6 - $0x1] sm:$0x2] %vm3875_vm3, %v3867_v50 }
0x10cb   : > { %v3881_v54 = vld [vmem:[#allocation6 + $0x10] sm:$0x3] }
0x10cc   : > { %v3880_v51 = vld [vmem:[#allocation6 + $0x8] sm:$0xff] }
0x10cd   : > { %v3879_v52 = vld [vmem:[#allocation6] sm:$0xff]  ;;  %3887 = vrot.lane.b32.xlu1 %v3880_v51, %s8028_s21 }
0x10ce   : > { %3885 = vrot.lane.b32.xlu0 %v3879_v52, %s8028_s21 }
0x10d2   : > { %3889 = vrot.lane.b32.xlu0 %v3881_v54, %s8028_s21 }
0x113f   : > { %v3888_v59 = vpop.permute.xlu1 %3887 }
0x1140   : > { %v3886_v24 = vpop.permute.xlu0 %3885  ;;  %3895 = vst.msk [vmem:[#allocation6 + $0x8] sm:$0xff] %vm558_vm13, %v3888_v59 }
0x1141   : > { %3894 = vst.msk [vmem:[#allocation6] sm:$0xff] %vm558_vm13, %v3886_v24  ;;  %vm3913_vm13 = vcmask 441752  }
0x1144   : > { %v3890_v41 = vpop.permute.xlu0 %3889 }
0x1145   : > { %3897 = vst.msk [vmem:[#allocation6 + $0x10] sm:$0x3] %vm3896_vm4, %v3890_v41 }
0x1147   : > { %v3899_v3 = vld [vmem:[#allocation6 + $0x8] sm:$0xff] }
0x1148   : > { %v3898_v63 = vld [vmem:[#allocation6] sm:$0xff]  ;;  %3906 = vrot.lane.b32.xlu0 %v3899_v3, %s6103_s24 }
0x1149   : > { %3904 = vrot.lane.b32.xlu1 %v3898_v63, %s6103_s24 }
0x114c   : > { %v3900_v5 = vld [vmem:[#allocation6 + $0x10] sm:$0x3] }
0x114d   : > { %3908 = vrot.lane.b32.xlu1 %v3900_v5, %s6103_s24 }
0x11ba   : > { %v3907_v1 = vpop.permute.xlu0 %3906 }
0x11bb   : > { %v3905_v7 = vpop.permute.xlu1 %3904  ;;  %3915 = vst.msk [vmem:[#allocation6 + $0x8] sm:$0xff] %vm3913_vm13, %v3907_v1 }
0x11bc   : > { %3914 = vst.msk [vmem:[#allocation6] sm:$0xff] %vm3913_vm13, %v3905_v7 }
0x11bf   : > { %v3909_v8 = vpop.permute.xlu1 %3908 }
0x11c0   : > { %3917 = vst.msk [vmem:[#allocation6 + $0x10] sm:$0x3] %vm3916_vm5, %v3909_v8 }
0x11c2   : > { %v3919_v25 = vld [vmem:[#allocation6 + $0x8] sm:$0xff] }
0x11c3   : > { %v3927_v9 = vld [vmem:[#allocation6 + $0x1] sm:$0xff] }
0x11c4   : > { %5214 = vmatprep.mubr.msk.f32.mxu1 %vm3937_vm6, %v3927_v9  ;;  %v3918_v14 = vld [vmem:[#allocation6] sm:$0xff] }
0x11c5   : > { %v4106_v28 = vld [vmem:[#allocation6 + $0x2] sm:$0xff] }
0x11c7   : > { %v3928_v11 = vld [vmem:[#allocation6 + $0x9] sm:$0xff] }
0x11c8   : > { %5215 = vmatmul.mubr.msk.f32.vlgmr.msra.gmra.mrb[14].mxu1 %vm3937_vm6, %v3928_v11  ;;  %v4107_v31 = vld [vmem:[#allocation6 + $0xa] sm:$0xff] }
0x11c9   : > { %5949 = vmatpush3.bf16.msra.mxu1 %v5946_v15  ;;  %5231 = vmatprep.mubr.msk.f32.mxu1 %vm3937_vm6, %v3918_v14 }
0x11ca   : > { %5951 = vmatprep.subr.bf16.mxu1 %v5950_v10 }
0x11cd   : > { %5953 = vmatpush3.bf16.msra.mxu1 %v5950_v10 }
0x11ce   : > { %5955 = vmatprep.subr.bf16.mxu1 %v5954_v16 }
0x11d1   : > { %5957 = vmatpush3.bf16.msra.mxu1 %v5954_v16 }
0x11d2   : > { %5229 = vmatprep.subr.msk.mxu1 %vm1929_vm7, %v3926_v17 }
0x11d5   : > { %5230 = vmatpush3.msk.msra.mxu1 %vm1929_vm7, %v3926_v17 }
0x11d6   : > { %5232 = vmatmul.mubr.msk.f32.vlgmr.msra.gmra.mrb[14].mxu1 %vm3937_vm6, %v3919_v25  ;;  %5959 = vmatprep.subr.bf16.mxu1 %v5958_v22 }
0x11d7   : > { %5961 = vmatpush3.bf16.msra.mxu1 %v5958_v22  ;;  %5248 = vmatprep.mubr.msk.f32.mxu1 %vm3937_vm6, %v4106_v28 }
0x11d8   : > { %5963 = vmatprep.subr.bf16.mxu1 %v5962_v23 }
0x11db   : > { %5965 = vmatpush3.bf16.msra.mxu1 %v5962_v23 }
0x11dc   : > { %5967 = vmatprep.subr.bf16.mxu1 %v5966_v29 }
0x11df   : > { %5969 = vmatpush3.bf16.msra.mxu1 %v5966_v29 }
0x11e0   : > { %5246 = vmatprep.subr.msk.mxu1 %vm1929_vm7, %v4735_v30 }
0x11e3   : > { %5247 = vmatpush3.msk.msra.mxu1 %vm1929_vm7, %v4735_v30 }
0x11e4   : > { %5249 = vmatmul.mubr.msk.f32.vlgmr.msra.gmra.mrb[14].mxu1 %vm3937_vm6, %v4107_v31 }
0x12b7   : > { %v5250_v33 = vpop.f32.mrb[14].mxu1 }
0x12b8   : > { %v4210_v34 = vadd.f32 %v5250_v33, %v4739_v32  ;;  %v4191_v35 = vpop.f32.mrb[15].mxu1 }
0x12b9   : > { %v4209_v36 = vadd.f32 %v4739_v32, %v4191_v35 }
0x12ba   : > { %v4212_v37 = vmax.f32 %v4210_v34, 0.0 }
0x12bb   : > { %v4211_v38 = vmax.f32 %v4209_v36, 0.0 }
0x12bc   : > { %v4214_v39 = vmin.f32 %v4212_v37, 1.0 }
0x12bd   : > { %v4213_v40 = vmin.f32 %v4211_v38, 1.0 }
0x12be   : > { %4217 = vst.msk [vmem:[%s401_s22 + $0x8] sm:$0xff] %vm4215_vm8, %v4214_v39 }
0x12bf   : > { %4216 = vst.msk [vmem:[%s401_s22] sm:$0xff] %vm4215_vm8, %v4213_v40 }
0x12c0 PF: > { %s22_s17 = sadd.s32 1, %s6096_s17  }
0x12c1   : > { %p19_p3 = scmp.ge.s32.totalorder %s22_s17, 4  }
0x12c3   :  { %21 = sbr.rel (!%p19_p3) target bundleno = 1 (0x1), region = 124 }
0x12ca   :  { %4239 = vsyncpa [#allocation8], 1 }
0x12cb   :  { %4241 = vsyncpa [#allocation8 + $0x1], 1 }

</bundles_post_ra>
